<compile_context>
chip_gen: v7x
topology: tpu7x:2x2x1
jax: 0.10.0
libtpu: 0.0.40
codegen_flags: <defaults>
</compile_context>

<pallas_src>
import jax
import jax.numpy as jnp
from jax.experimental import pallas as pl
from jax.experimental.pallas import tpu as pltpu


# ---------------------------------------------------------------------------
# Stage 1: row-tiled, K-blocked mean aggregation + fused projection + BN partials
# ---------------------------------------------------------------------------
def project_kernel(a_ref, xk_ref, xi_ref, wcat_ref, b_ref,       # inputs
                   h_ref, sum_ref, sumsq_ref,                     # outputs
                   acc_ref, xcat_ref=None):                       # VMEM scratch
    k = pl.program_id(1)
    last_k = pl.num_programs(1) - 1
    f_dim = xi_ref.shape[1]

    @pl.when(k == 0)
    def _():
        acc_ref[...] = jnp.zeros_like(acc_ref)
        if xcat_ref is not None:
            # xi's block index is (i, 0): resident from the first k step, so copy
            # it early and overlap the store with the aggregation matmuls.
            xcat_ref[:, :f_dim] = xi_ref[...]

    # Mean-aggregation partial: bf16 A tile @ bf16 x tile, f32 accumulation (MXU).
    acc_ref[...] += jnp.dot(a_ref[...], xk_ref[...],
                            preferred_element_type=jnp.float32)

    @pl.when(k == last_k)
    def _():
        if xcat_ref is not None:
            # Fused projection: [x | mean_neigh(x)] @ [W_self; W_neigh] + bias.
            # K = 2F fills the 256-deep v6e/v7x systolic K dim in one pass.
            xcat_ref[:, f_dim:] = acc_ref[...].astype(jnp.bfloat16)
            h = jnp.dot(xcat_ref[...], wcat_ref[...],
                        preferred_element_type=jnp.float32) + b_ref[...]
        else:
            # v5e path: the MXU is only 128 deep, so the K=2F fusion buys nothing
            # and only costs a VMEM round-trip -> two K=F dots, no concat scratch.
            h = (jnp.dot(xi_ref[...], wcat_ref[:f_dim, :],
                         preferred_element_type=jnp.float32)
                 + jnp.dot(acc_ref[...].astype(jnp.bfloat16), wcat_ref[f_dim:, :],
                           preferred_element_type=jnp.float32)
                 + b_ref[...])
        # Stage-1 BatchNorm statistics in f32 (before the bf16 writeback cast).
        sum_ref[...] = jnp.sum(h, axis=0).reshape(1, 1, -1)
        sumsq_ref[...] = jnp.sum(h * h, axis=0).reshape(1, 1, -1)
        h_ref[...] = h.astype(h_ref.dtype)   # bf16 writeback halves HBM traffic


# ---------------------------------------------------------------------------
# Stage 2: BatchNorm normalize + LeakyReLU + skip-sum + L2 normalize
# ---------------------------------------------------------------------------
def finalize_kernel(h_ref, xi_ref, mean_ref, inv_ref, g_ref, beta_ref, o_ref):
    h = h_ref[...].astype(jnp.float32)                            # [TM2, H]
    # BatchNorm1d (training mode, biased variance); stats come from stage 1.
    h = (h - mean_ref[...]) * inv_ref[...] * g_ref[...] + beta_ref[...]
    # dropout p=0.0 in this instantiation -> identity
    # TODO(synk): add pltpu.prng_random_bits-based dropout mask if p > 0.
    # LeakyReLU (torch default negative_slope = 0.01)
    h = jnp.where(h > 0, h, 0.01 * h)
    # skip connection 'sum' (heads == 1), full-precision identity
    h = h + xi_ref[...]
    # L2 normalize along last dim (F.normalize, eps=1e-12); rsqrt -> EUP slot.
    ss = jnp.sum(h * h, axis=-1, keepdims=True)
    h = h * jax.lax.rsqrt(jnp.maximum(ss, 1e-24))
    o_ref[...] = h.astype(o_ref.dtype)


def conv_layer_forward(x, a_mean, w_cat, bias, gamma, beta, *,
                       tm=256, tk=256, tm2=512, fuse_projection=True):
    """x: [N, F] f32, a_mean: [N, N] bf16 row-normalized adjacency,
    w_cat: [2F, H] bf16 ([W_self; W_neigh]), bias/gamma/beta: [1, H] f32.

    fuse_projection=True  -> single K=2F projection (best on 256-deep v6e/v7x MXU)
    fuse_projection=False -> two K=F projections, no concat scratch (best on v5e)
    """
    n, f = x.shape
    h_dim = w_cat.shape[1]
    assert f == h_dim, "skip == 'sum' requires in_features == hidden_channels"
    assert f % 128 == 0, "lane-aligned concat store requires F % 128 == 0"
    assert n % tm == 0 and n % tk == 0 and n % tm2 == 0, \
        "pad N to a multiple of the tile sizes"
    ti, nk, ti2 = n // tm, n // tk, n // tm2

    x_bf16 = x.astype(jnp.bfloat16)   # halves HBM traffic for the matmul inputs
    # Explicit VMEM limit with headroom under v7x's 64 MiB physical VMEM
    # (also valid on v5e/v6e's 128 MiB).
    vmem_limit = 48 * 1024 * 1024

    scratch = [pltpu.VMEM((tm, f), jnp.float32)]                  # agg accumulator
    if fuse_projection:
        scratch.append(pltpu.VMEM((tm, 2 * f), jnp.bfloat16))     # fused MXU operand

    # TODO(synk): if the A-stream DMA is still exposed after the tile bump, add
    # pipeline_mode=pl.Buffered(3) on the a_mean BlockSpec.
    h_pre, h_sum, h_sumsq = pl.pallas_call(
        project_kernel,
        out_shape=(jax.ShapeDtypeStruct((n, h_dim), jnp.bfloat16),
                   jax.ShapeDtypeStruct((ti, 1, h_dim), jnp.float32),
                   jax.ShapeDtypeStruct((ti, 1, h_dim), jnp.float32)),
        grid_spec=pltpu.PrefetchScalarGridSpec(
            num_scalar_prefetch=0,
            grid=(ti, nk),
            in_specs=[
                pl.BlockSpec((tm, tk), lambda i, k: (i, k)),        # A_mean tile
                pl.BlockSpec((tk, f), lambda i, k: (k, 0)),         # x rows (neighbors)
                pl.BlockSpec((tm, f), lambda i, k: (i, 0)),         # x rows (self)
                pl.BlockSpec((2 * f, h_dim), lambda i, k: (0, 0)),  # fused weights
                pl.BlockSpec((1, h_dim), lambda i, k: (0, 0)),      # bias
            ],
            out_specs=(
                pl.BlockSpec((tm, h_dim), lambda i, k: (i, 0)),       # h_pre (bf16)
                pl.BlockSpec((1, 1, h_dim), lambda i, k: (i, 0, 0)),  # per-tile sum
                pl.BlockSpec((1, 1, h_dim), lambda i, k: (i, 0, 0)),  # per-tile sumsq
            ),
            scratch_shapes=scratch,
        ),
        compiler_params=pltpu.CompilerParams(
            dimension_semantics=("parallel", "arbitrary"),
            vmem_limit_bytes=vmem_limit,
        ),
        cost_estimate=pl.CostEstimate(
            flops=2 * n * n * f + 2 * n * (2 * f) * h_dim,
            transcendentals=0,
            bytes_accessed=(n * n * 2 + (ti + 1) * n * f * 2
                            + 2 * f * h_dim * 2 + n * h_dim * 2
                            + 2 * ti * h_dim * 4),
        ),
    )(a_mean, x_bf16, x_bf16, w_cat, bias)

    # Stage-2 BN statistics: tiny [ti,1,H] -> [1,H] reduction (plain-JAX glue),
    # single-pass variance E[h^2] - mean^2 (biased, matches BN training stats).
    # TODO(synk): switch to a shifted / Welford-style combine if N grows large
    # enough for E[h^2]-mean^2 cancellation to matter.
    mean = jnp.sum(h_sum, axis=0) / n                         # [1, H]
    ex2 = jnp.sum(h_sumsq, axis=0) / n
    var = jnp.maximum(ex2 - mean * mean, 0.0)
    inv_std = jax.lax.rsqrt(var + 1e-5)                       # [1, H]

    out = pl.pallas_call(
        finalize_kernel,
        out_shape=jax.ShapeDtypeStruct((n, h_dim), jnp.float32),
        grid_spec=pltpu.PrefetchScalarGridSpec(
            num_scalar_prefetch=0,
            grid=(ti2,),
            in_specs=[
                pl.BlockSpec((tm2, h_dim), lambda i: (i, 0)),  # h_pre (bf16)
                pl.BlockSpec((tm2, f), lambda i: (i, 0)),      # x (f32 identity / skip)
                pl.BlockSpec((1, h_dim), lambda i: (0, 0)),    # mean
                pl.BlockSpec((1, h_dim), lambda i: (0, 0)),    # inv_std
                pl.BlockSpec((1, h_dim), lambda i: (0, 0)),    # gamma
                pl.BlockSpec((1, h_dim), lambda i: (0, 0)),    # beta
            ],
            out_specs=pl.BlockSpec((tm2, h_dim), lambda i: (i, 0)),
        ),
        compiler_params=pltpu.CompilerParams(
            dimension_semantics=("parallel",),
            vmem_limit_bytes=vmem_limit,
        ),
        cost_estimate=pl.CostEstimate(
            flops=12 * n * h_dim,
            transcendentals=2 * n,
            bytes_accessed=n * h_dim * 2 + n * f * 4 + n * h_dim * 4,
        ),
    )(h_pre, x, mean, inv_std, gamma, beta)
    # TODO(synk): emit bf16 output if the consuming layer tolerates it (halves writeback).
    return out


def build_mean_adjacency(edge_index, num_nodes):
    """Plain-JAX glue: dense row-normalized adjacency (mean aggregation), bf16."""
    src, dst = edge_index[0], edge_index[1]
    a = jnp.zeros((num_nodes, num_nodes), jnp.float32)
    a = a.at[dst, src].add(1.0)            # messages flow src -> dst
    deg = jnp.clip(a.sum(axis=1, keepdims=True), 1.0, None)
    # TODO(synk): for realistic sparsity (E << N^2) replace the dense A@x path with a
    # CSR scalar-prefetch gather/segment-mean kernel (PrefetchScalarGridSpec).
    # TODO(synk): on v7x only, try fp8 (e4m3) for A (halves N^2 HBM bytes, doubles
    # MXU peak) gated behind an accuracy check.
    return (a / deg).astype(jnp.bfloat16)  # bf16 halves HBM/VMEM cost of A@x


def reference_forward(x, a_mean, w_cat, bias, gamma, beta):
    """Pure-JAX reference mirroring the kernel's bf16-matmul / f32-accumulate math
    (including the bf16 h_pre HBM round-trip between the two kernel stages)."""
    xb = x.astype(jnp.bfloat16)
    agg = jnp.dot(a_mean, xb, preferred_element_type=jnp.float32)
    xcat = jnp.concatenate([xb, agg.astype(jnp.bfloat16)], axis=1)
    h = jnp.dot(xcat, w_cat, preferred_element_type=jnp.float32) + bias
    mean = h.mean(axis=0, keepdims=True)
    var = jnp.maximum((h * h).mean(axis=0, keepdims=True) - mean * mean, 0.0)
    h = h.astype(jnp.bfloat16).astype(jnp.float32)   # mirror bf16 h_pre round-trip
    h = (h - mean) * jax.lax.rsqrt(var + 1e-5) * gamma + beta
    h = jnp.where(h > 0, h, 0.01 * h)
    h = h + x
    ss = (h * h).sum(axis=-1, keepdims=True)
    return h * jax.lax.rsqrt(jnp.maximum(ss, 1e-24))


if __name__ == "__main__":
    N = 512           # num_nodes (multiple of tm=256, tk=256, tm2=512)
    F = 128           # in_features
    H = 128           # hidden_channels (== F, required by skip='sum')
    E = 2048          # num_edges

    key = jax.random.PRNGKey(0)
    kx, ke, kws, kwn, kb = jax.random.split(key, 5)

    x = jax.random.normal(kx, (N, F), jnp.float32)
    edge_index = jax.random.randint(ke, (2, E), 0, N, jnp.int32)

    # deterministic glorot-ish parameter init
    scale = 1.0 / jnp.sqrt(jnp.float32(F))
    w_self = jax.random.normal(kws, (F, H), jnp.float32) * scale
    w_neigh = jax.random.normal(kwn, (F, H), jnp.float32) * scale
    bias = jax.random.normal(kb, (1, H), jnp.float32) * 0.01
    gamma = jnp.ones((1, H), jnp.float32)
    beta = jnp.zeros((1, H), jnp.float32)

    a_mean = build_mean_adjacency(edge_index, N)                        # bf16 [N, N]
    w_cat = jnp.concatenate([w_self, w_neigh], axis=0).astype(jnp.bfloat16)  # [2F, H]

    fwd = jax.jit(conv_layer_forward)
    out = fwd(x, a_mean, w_cat, bias, gamma, beta)
    out = jax.block_until_ready(out)

    ref = reference_forward(x, a_mean, w_cat, bias, gamma, beta)
    assert out.shape == (N, H)
    assert jnp.allclose(out, ref, atol=2e-3, rtol=2e-3), \
        float(jnp.max(jnp.abs(out - ref)))

    print("KERNEL_OK")
</pallas_src>

<mosaic_0001>
module attributes {stable_mosaic.version = 11 : i64} {
  func.func @project_kernel(%arg0: i32, %arg1: i32, %arg2: memref<256x256xbf16, #tpu.memory_space<vmem>>, %arg3: memref<256x128xbf16, #tpu.memory_space<vmem>>, %arg4: memref<256x128xbf16, #tpu.memory_space<vmem>>, %arg5: memref<256x128xbf16, #tpu.memory_space<vmem>>, %arg6: memref<1x128xf32, #tpu.memory_space<vmem>>, %arg7: memref<256x128xbf16, #tpu.memory_space<vmem>>, %arg8: memref<1x1x128xf32, #tpu.memory_space<vmem>>, %arg9: memref<1x1x128xf32, #tpu.memory_space<vmem>>, %arg10: memref<256x128xf32, #tpu.memory_space<vmem>>, %arg11: memref<256x256xbf16, #tpu.memory_space<vmem>>) attributes {dimension_semantics = [#tpu.dimension_semantics<parallel>, #tpu.dimension_semantics<arbitrary>], iteration_bounds = array<i64: 2, 2>, scalar_prefetch = 0 : i64, scratch_operands = 2 : i64, tpu.core_type = #tpu.core_type<tc>, window_params = [{transform_indices = @transform_0, window_bounds = array<i64: 256, 256>}, {transform_indices = @transform_1, window_bounds = array<i64: 256, 128>}, {transform_indices = @transform_2, window_bounds = array<i64: 256, 128>}, {pipeline_mode = #tpu.pipeline_mode<synchronous>, transform_indices = @transform_3, window_bounds = array<i64: 256, 128>}, {pipeline_mode = #tpu.pipeline_mode<synchronous>, transform_indices = @transform_4, window_bounds = array<i64: 1, 128>}, {transform_indices = @transform_5, window_bounds = array<i64: 256, 128>}, {transform_indices = @transform_6, window_bounds = array<i64: 1, 1, 128>}, {transform_indices = @transform_7, window_bounds = array<i64: 1, 1, 128>}]} {
    %c0_i32 = arith.constant 0 : i32
    %0 = arith.cmpi eq, %arg1, %c0_i32 : i32
    %1 = arith.extui %0 : i1 to i32
    %c0_i32_0 = arith.constant 0 : i32
    %2 = arith.cmpi ne, %1, %c0_i32_0 : i32
    scf.if %2 {
      %cst_9 = arith.constant 0.000000e+00 : f32
      %12 = vector.broadcast %cst_9 : f32 to vector<256x128xf32>
      %c0_10 = arith.constant 0 : index
      %c0_11 = arith.constant 0 : index
      %13 = vector.load %arg10[%c0_10, %c0_11] : memref<256x128xf32, #tpu.memory_space<vmem>>, vector<256x128xf32>
      tpu.vector_store %arg10[%c0_10, %c0_11], %12 {strides = array<i32>} : memref<256x128xf32, #tpu.memory_space<vmem>>, vector<256x128xf32>,
      %c0_12 = arith.constant 0 : index
      %c0_13 = arith.constant 0 : index
      %14 = vector.load %arg4[%c0_12, %c0_13] : memref<256x128xbf16, #tpu.memory_space<vmem>>, vector<256x128xbf16>
      %c0_14 = arith.constant 0 : index
      %c0_15 = arith.constant 0 : index
      %15 = vector.load %arg11[%c0_14, %c0_15] : memref<256x256xbf16, #tpu.memory_space<vmem>>, vector<256x128xbf16>
      tpu.vector_store %arg11[%c0_14, %c0_15], %14 {strides = array<i32>} : memref<256x256xbf16, #tpu.memory_space<vmem>>, vector<256x128xbf16>,
    } else {
    }
    %c0 = arith.constant 0 : index
    %c0_1 = arith.constant 0 : index
    %3 = vector.load %arg10[%c0, %c0_1] : memref<256x128xf32, #tpu.memory_space<vmem>>, vector<256x128xf32>
    %c0_2 = arith.constant 0 : index
    %c0_3 = arith.constant 0 : index
    %4 = vector.load %arg2[%c0_2, %c0_3] : memref<256x256xbf16, #tpu.memory_space<vmem>>, vector<256x256xbf16>
    %c0_4 = arith.constant 0 : index
    %c0_5 = arith.constant 0 : index
    %5 = vector.load %arg3[%c0_4, %c0_5] : memref<256x128xbf16, #tpu.memory_space<vmem>>, vector<256x128xbf16>
    %cst = arith.constant dense<0.000000e+00> : vector<256x128xf32>
    %6 = tpu.matmul %4, %5, %cst {dimension_numbers = #tpu.dot_dimension_numbers<[1], [0], [0], [1], [0, 0, 1, 1], [], []>} : vector<256x256xbf16>, vector<256x128xbf16>, vector<256x128xf32> -> vector<256x128xf32>
    %7 = arith.addf %3, %6 : vector<256x128xf32>
    %c0_6 = arith.constant 0 : index
    %c0_7 = arith.constant 0 : index
    %8 = vector.load %arg10[%c0_6, %c0_7] : memref<256x128xf32, #tpu.memory_space<vmem>>, vector<256x128xf32>
    tpu.vector_store %arg10[%c0_6, %c0_7], %7 {strides = array<i32>} : memref<256x128xf32, #tpu.memory_space<vmem>>, vector<256x128xf32>,
    %c1_i32 = arith.constant 1 : i32
    %9 = arith.cmpi eq, %arg1, %c1_i32 : i32
    %10 = arith.extui %9 : i1 to i32
    %c0_i32_8 = arith.constant 0 : i32
    %11 = arith.cmpi ne, %10, %c0_i32_8 : i32
    scf.if %11 {
      %c0_9 = arith.constant 0 : index
      %c0_10 = arith.constant 0 : index
      %12 = vector.load %arg10[%c0_9, %c0_10] : memref<256x128xf32, #tpu.memory_space<vmem>>, vector<256x128xf32>
      %13 = arith.truncf %12 : vector<256x128xf32> to vector<256x128xbf16>
      %c0_11 = arith.constant 0 : index
      %c128 = arith.constant 128 : index
      %14 = vector.load %arg11[%c0_11, %c128] : memref<256x256xbf16, #tpu.memory_space<vmem>>, vector<256x128xbf16>
      tpu.vector_store %arg11[%c0_11, %c128], %13 {strides = array<i32>} : memref<256x256xbf16, #tpu.memory_space<vmem>>, vector<256x128xbf16>,
      %c0_12 = arith.constant 0 : index
      %c0_13 = arith.constant 0 : index
      %15 = vector.load %arg11[%c0_12, %c0_13] : memref<256x256xbf16, #tpu.memory_space<vmem>>, vector<256x256xbf16>
      %c0_14 = arith.constant 0 : index
      %c0_15 = arith.constant 0 : index
      %16 = vector.load %arg5[%c0_14, %c0_15] : memref<256x128xbf16, #tpu.memory_space<vmem>>, vector<256x128xbf16>
      %cst_16 = arith.constant dense<0.000000e+00> : vector<256x128xf32>
      %17 = tpu.matmul %15, %16, %cst_16 {dimension_numbers = #tpu.dot_dimension_numbers<[1], [0], [0], [1], [0, 0, 1, 1], [], []>} : vector<256x256xbf16>, vector<256x128xbf16>, vector<256x128xf32> -> vector<256x128xf32>
      %c0_17 = arith.constant 0 : index
      %c0_18 = arith.constant 0 : index
      %18 = vector.load %arg6[%c0_17, %c0_18] : memref<1x128xf32, #tpu.memory_space<vmem>>, vector<1x128xf32>
      %19 = vector.broadcast %18 : vector<1x128xf32> to vector<256x128xf32>
      %20 = arith.addf %17, %19 : vector<256x128xf32>
      %cst_19 = arith.constant dense<0.000000e+00> : vector<128xf32>
      %21 = vector.multi_reduction <add>, %20, %cst_19 [0] : vector<256x128xf32> to vector<128xf32>
      %22 = vector.shape_cast %21 : vector<128xf32> to vector<1x1x128xf32>
      %c0_20 = arith.constant 0 : index
      %c0_21 = arith.constant 0 : index
      %c0_22 = arith.constant 0 : index
      %23 = vector.load %arg8[%c0_20, %c0_21, %c0_22] : memref<1x1x128xf32, #tpu.memory_space<vmem>>, vector<1x1x128xf32>
      tpu.vector_store %arg8[%c0_20, %c0_21, %c0_22], %22 {strides = array<i32>} : memref<1x1x128xf32, #tpu.memory_space<vmem>>, vector<1x1x128xf32>,
      %24 = arith.mulf %20, %20 : vector<256x128xf32>
      %cst_23 = arith.constant dense<0.000000e+00> : vector<128xf32>
      %25 = vector.multi_reduction <add>, %24, %cst_23 [0] : vector<256x128xf32> to vector<128xf32>
      %26 = vector.shape_cast %25 : vector<128xf32> to vector<1x1x128xf32>
      %c0_24 = arith.constant 0 : index
      %c0_25 = arith.constant 0 : index
      %c0_26 = arith.constant 0 : index
      %27 = vector.load %arg9[%c0_24, %c0_25, %c0_26] : memref<1x1x128xf32, #tpu.memory_space<vmem>>, vector<1x1x128xf32>
      tpu.vector_store %arg9[%c0_24, %c0_25, %c0_26], %26 {strides = array<i32>} : memref<1x1x128xf32, #tpu.memory_space<vmem>>, vector<1x1x128xf32>,
      %28 = arith.truncf %20 : vector<256x128xf32> to vector<256x128xbf16>
      %c0_27 = arith.constant 0 : index
      %c0_28 = arith.constant 0 : index
      %29 = vector.load %arg7[%c0_27, %c0_28] : memref<256x128xbf16, #tpu.memory_space<vmem>>, vector<256x128xbf16>
      tpu.vector_store %arg7[%c0_27, %c0_28], %28 {strides = array<i32>} : memref<256x128xbf16, #tpu.memory_space<vmem>>, vector<256x128xbf16>,
    } else {
    }
    return
  }
  func.func @transform_0(%arg0: i32, %arg1: i32) -> (i32, i32) {
    %c0_i32 = arith.constant 0 : i32
    return %arg0, %arg1 : i32, i32
  }
  func.func @transform_1(%arg0: i32, %arg1: i32) -> (i32, i32) {
    %c0_i32 = arith.constant 0 : i32
    %c0_i32_0 = arith.constant 0 : i32
    return %arg1, %c0_i32 : i32, i32
  }
  func.func @transform_2(%arg0: i32, %arg1: i32) -> (i32, i32) {
    %c0_i32 = arith.constant 0 : i32
    %c0_i32_0 = arith.constant 0 : i32
    return %arg0, %c0_i32 : i32, i32
  }
  func.func @transform_3(%arg0: i32, %arg1: i32) -> (i32, i32) {
    %c0_i32 = arith.constant 0 : i32
    %c0_i32_0 = arith.constant 0 : i32
    %c0_i32_1 = arith.constant 0 : i32
    return %c0_i32, %c0_i32_0 : i32, i32
  }
  func.func @transform_4(%arg0: i32, %arg1: i32) -> (i32, i32) {
    %c0_i32 = arith.constant 0 : i32
    %c0_i32_0 = arith.constant 0 : i32
    %c0_i32_1 = arith.constant 0 : i32
    return %c0_i32, %c0_i32_0 : i32, i32
  }
  func.func @transform_5(%arg0: i32, %arg1: i32) -> (i32, i32) {
    %c0_i32 = arith.constant 0 : i32
    %c0_i32_0 = arith.constant 0 : i32
    return %arg0, %c0_i32 : i32, i32
  }
  func.func @transform_6(%arg0: i32, %arg1: i32) -> (i32, i32, i32) {
    %c0_i32 = arith.constant 0 : i32
    %c0_i32_0 = arith.constant 0 : i32
    %c0_i32_1 = arith.constant 0 : i32
    return %arg0, %c0_i32, %c0_i32_0 : i32, i32, i32
  }
  func.func @transform_7(%arg0: i32, %arg1: i32) -> (i32, i32, i32) {
    %c0_i32 = arith.constant 0 : i32
    %c0_i32_0 = arith.constant 0 : i32
    %c0_i32_1 = arith.constant 0 : i32
    return %arg0, %c0_i32, %c0_i32_0 : i32, i32, i32
  }
}

module attributes {stable_mosaic.version = 11 : i64} {
  func.func @finalize_kernel(%arg0: i32, %arg1: memref<512x128xbf16, #tpu.memory_space<vmem>>, %arg2: memref<512x128xf32, #tpu.memory_space<vmem>>, %arg3: memref<1x128xf32, #tpu.memory_space<vmem>>, %arg4: memref<1x128xf32, #tpu.memory_space<vmem>>, %arg5: memref<1x128xf32, #tpu.memory_space<vmem>>, %arg6: memref<1x128xf32, #tpu.memory_space<vmem>>, %arg7: memref<512x128xf32, #tpu.memory_space<vmem>>) attributes {dimension_semantics = [#tpu.dimension_semantics<parallel>], iteration_bounds = array<i64: 1>, scalar_prefetch = 0 : i64, scratch_operands = 0 : i64, tpu.core_type = #tpu.core_type<tc>, window_params = [{transform_indices = @transform_0, window_bounds = array<i64: 512, 128>}, {transform_indices = @transform_1, window_bounds = array<i64: 512, 128>}, {pipeline_mode = #tpu.pipeline_mode<synchronous>, transform_indices = @transform_2, window_bounds = array<i64: 1, 128>}, {pipeline_mode = #tpu.pipeline_mode<synchronous>, transform_indices = @transform_3, window_bounds = array<i64: 1, 128>}, {pipeline_mode = #tpu.pipeline_mode<synchronous>, transform_indices = @transform_4, window_bounds = array<i64: 1, 128>}, {pipeline_mode = #tpu.pipeline_mode<synchronous>, transform_indices = @transform_5, window_bounds = array<i64: 1, 128>}, {transform_indices = @transform_6, window_bounds = array<i64: 512, 128>}]} {
    %c0 = arith.constant 0 : index
    %c0_0 = arith.constant 0 : index
    %0 = vector.load %arg1[%c0, %c0_0] : memref<512x128xbf16, #tpu.memory_space<vmem>>, vector<512x128xbf16>
    %1 = arith.extf %0 : vector<512x128xbf16> to vector<512x128xf32>
    %c0_1 = arith.constant 0 : index
    %c0_2 = arith.constant 0 : index
    %2 = vector.load %arg3[%c0_1, %c0_2] : memref<1x128xf32, #tpu.memory_space<vmem>>, vector<1x128xf32>
    %3 = vector.broadcast %2 : vector<1x128xf32> to vector<512x128xf32>
    %4 = arith.subf %1, %3 : vector<512x128xf32>
    %c0_3 = arith.constant 0 : index
    %c0_4 = arith.constant 0 : index
    %5 = vector.load %arg4[%c0_3, %c0_4] : memref<1x128xf32, #tpu.memory_space<vmem>>, vector<1x128xf32>
    %6 = vector.broadcast %5 : vector<1x128xf32> to vector<512x128xf32>
    %7 = arith.mulf %4, %6 : vector<512x128xf32>
    %c0_5 = arith.constant 0 : index
    %c0_6 = arith.constant 0 : index
    %8 = vector.load %arg5[%c0_5, %c0_6] : memref<1x128xf32, #tpu.memory_space<vmem>>, vector<1x128xf32>
    %9 = vector.broadcast %8 : vector<1x128xf32> to vector<512x128xf32>
    %10 = arith.mulf %7, %9 : vector<512x128xf32>
    %c0_7 = arith.constant 0 : index
    %c0_8 = arith.constant 0 : index
    %11 = vector.load %arg6[%c0_7, %c0_8] : memref<1x128xf32, #tpu.memory_space<vmem>>, vector<1x128xf32>
    %12 = vector.broadcast %11 : vector<1x128xf32> to vector<512x128xf32>
    %13 = arith.addf %10, %12 : vector<512x128xf32>
    %cst = arith.constant 0.000000e+00 : f32
    %14 = vector.broadcast %cst : f32 to vector<512x128xf32>
    %15 = arith.cmpf ogt, %13, %14 : vector<512x128xf32>
    %cst_9 = arith.constant 0.00999999977 : f32
    %16 = vector.broadcast %cst_9 : f32 to vector<512x128xf32>
    %17 = arith.mulf %16, %13 : vector<512x128xf32>
    %18 = arith.select %15, %13, %17 : vector<512x128xi1>, vector<512x128xf32>
    %c0_10 = arith.constant 0 : index
    %c0_11 = arith.constant 0 : index
    %19 = vector.load %arg2[%c0_10, %c0_11] : memref<512x128xf32, #tpu.memory_space<vmem>>, vector<512x128xf32>
    %20 = arith.addf %18, %19 : vector<512x128xf32>
    %21 = arith.mulf %20, %20 : vector<512x128xf32>
    %cst_12 = arith.constant dense<0.000000e+00> : vector<512xf32>
    %22 = vector.multi_reduction <add>, %21, %cst_12 [1] : vector<512x128xf32> to vector<512xf32>
    %23 = vector.shape_cast %22 : vector<512xf32> to vector<512x1xf32>
    %cst_13 = arith.constant 1.000000e-24 : f32
    %24 = vector.broadcast %cst_13 : f32 to vector<512x1xf32>
    %25 = arith.maximumf %23, %24 : vector<512x1xf32>
    %26 = math.rsqrt %25 : vector<512x1xf32>
    %27 = vector.broadcast %26 : vector<512x1xf32> to vector<512x128xf32>
    %28 = arith.mulf %20, %27 : vector<512x128xf32>
    %c0_14 = arith.constant 0 : index
    %c0_15 = arith.constant 0 : index
    %29 = vector.load %arg7[%c0_14, %c0_15] : memref<512x128xf32, #tpu.memory_space<vmem>>, vector<512x128xf32>
    tpu.vector_store %arg7[%c0_14, %c0_15], %28 {strides = array<i32>} : memref<512x128xf32, #tpu.memory_space<vmem>>, vector<512x128xf32>,
    return
  }
  func.func @transform_0(%arg0: i32) -> (i32, i32) {
    %c0_i32 = arith.constant 0 : i32
    %c0_i32_0 = arith.constant 0 : i32
    return %arg0, %c0_i32 : i32, i32
  }
  func.func @transform_1(%arg0: i32) -> (i32, i32) {
    %c0_i32 = arith.constant 0 : i32
    %c0_i32_0 = arith.constant 0 : i32
    return %arg0, %c0_i32 : i32, i32
  }
  func.func @transform_2(%arg0: i32) -> (i32, i32) {
    %c0_i32 = arith.constant 0 : i32
    %c0_i32_0 = arith.constant 0 : i32
    %c0_i32_1 = arith.constant 0 : i32
    return %c0_i32, %c0_i32_0 : i32, i32
  }
  func.func @transform_3(%arg0: i32) -> (i32, i32) {
    %c0_i32 = arith.constant 0 : i32
    %c0_i32_0 = arith.constant 0 : i32
    %c0_i32_1 = arith.constant 0 : i32
    return %c0_i32, %c0_i32_0 : i32, i32
  }
  func.func @transform_4(%arg0: i32) -> (i32, i32) {
    %c0_i32 = arith.constant 0 : i32
    %c0_i32_0 = arith.constant 0 : i32
    %c0_i32_1 = arith.constant 0 : i32
    return %c0_i32, %c0_i32_0 : i32, i32
  }
  func.func @transform_5(%arg0: i32) -> (i32, i32) {
    %c0_i32 = arith.constant 0 : i32
    %c0_i32_0 = arith.constant 0 : i32
    %c0_i32_1 = arith.constant 0 : i32
    return %c0_i32, %c0_i32_0 : i32, i32
  }
  func.func @transform_6(%arg0: i32) -> (i32, i32) {
    %c0_i32 = arith.constant 0 : i32
    %c0_i32_0 = arith.constant 0 : i32
    return %arg0, %c0_i32 : i32, i32
  }
}

</mosaic_0001>

<bundles_post_ra>
// kernel: conv_layer_forward.3
= control target key start
LH: loop header
LB: loop body
LE: loop exit
PB: predicated region body
PF: predicated region fallthrough
CT: control target
= control target key end

     0   :  { %s2504_s0 = inlined_call_operand.vmem [shape: bf16[512,128], index: 0, kind: input, shape index: {}]   ;;  %s2505_s1 = inlined_call_operand.vmem [shape: f32[512,128], index: 1, kind: input, shape index: {}]   ;;  %s2506_s2 = inlined_call_operand.vmem [shape: f32[1,128], index: 2, kind: input, shape index: {}]   ;;  %s2507_s3 = inlined_call_operand.vmem [shape: f32[1,128], index: 3, kind: input, shape index: {}]   ;;  %s2508_s4 = inlined_call_operand.vmem [shape: f32[1,128], index: 4, kind: input, shape index: {}]   ;;  %s2509_s5 = inlined_call_operand.vmem [shape: f32[1,128], index: 5, kind: input, shape index: {}]   ;;  %s2510_s6 = inlined_call_operand.hbm [shape: f32[512,128], index: 6, kind: output, shape index: {}]  }
   0x1   :  { %v1352_v0 = vld [vmem:[%s2504_s0 + $0x8] sm:$0xff]   ;;  %v1586_v1 = vld [vmem:[%s2506_s2] ss:$0 sm:$0xff]  ;;  %v1353_v10 = vld [vmem:[%s2504_s0 + $0x10] sm:$0xff]  }
   0x2   :  { %v1230_v2 = vunpack.c.l.bf16 %v1352_v0  ;;  %v1231_v3 = vunpack.c.h.bf16 %v1352_v0  ;;  %v1591_v4 = vld [vmem:[%s2507_s3] ss:$0 sm:$0xff]  ;;  %v1235_v12 = vunpack.c.h.bf16 %v1353_v10  ;;  %v1234_v13 = vunpack.c.l.bf16 %v1353_v10  ;;  %v1354_v14 = vld [vmem:[%s2504_s0 + $0x18] sm:$0xff]   ;;  %v630_v41 = vld [vmem:[%s2505_s1 + $0x10] sm:$0xff] }
   0x3   :  { %v1225_v5 = vld [vmem:[%s2504_s0] sm:$0xff]   ;;  %v1239_v22 = vunpack.c.h.bf16 %v1354_v14  ;;  %v1238_v23 = vunpack.c.l.bf16 %v1354_v14  ;;  %v631_v44 = vld [vmem:[%s2505_s1 + $0x18] sm:$0xff]  ;;  %v629_v55 = vld [vmem:[%s2505_s1 + $0x8] sm:$0xff] }
   0x4   :  { %v161_v6 = vsub.f32 %v1230_v2, %v1586_v1  ;;  %v1226_v7 = vunpack.c.l.bf16 %v1225_v5  ;;  %v162_v8 = vsub.f32 %v1231_v3, %v1586_v1  ;;  %v1227_v9 = vunpack.c.h.bf16 %v1225_v5  ;;  %v1604_v11 = vld [vmem:[%s2508_s4] ss:$0 sm:$0xff]  ;;  %v633_v59 = vld [vmem:[%s2505_s1 + $0x28] sm:$0xff] }
   0x5   :  { %v1616_v19 = vld [vmem:[%s2509_s5] ss:$0 sm:$0xff]  ;;  %v164_v20 = vsub.f32 %v1235_v12, %v1586_v1  ;;  %v163_v21 = vsub.f32 %v1234_v13, %v1586_v1  ;;  %v166_v30 = vsub.f32 %v1239_v22, %v1586_v1  ;;  %v165_v31 = vsub.f32 %v1238_v23, %v1586_v1  ;;  %v1356_v12 = vld [vmem:[%s2504_s0 + $0x28] sm:$0xff]   ;;  %v635_v22 = vld [vmem:[%s2505_s1 + $0x38] sm:$0xff] }
   0x6   :  { %v232_v15 = vmul.f32 %v1591_v4, %v161_v6  ;;  %v159_v16 = vsub.f32 %v1226_v7, %v1586_v1  ;;  %v233_v17 = vmul.f32 %v1591_v4, %v162_v8  ;;  %v160_v18 = vsub.f32 %v1227_v9, %v1586_v1  ;;  %v628_v50 = vld [vmem:[%s2505_s1] sm:$0xff] }
   0x7   :  { %v235_v28 = vmul.f32 %v1591_v4, %v164_v20  ;;  %v234_v29 = vmul.f32 %v1591_v4, %v163_v21  ;;  %v237_v38 = vmul.f32 %v1591_v4, %v166_v30  ;;  %v236_v39 = vmul.f32 %v1591_v4, %v165_v31  ;;  %v1355_v63 = vld [vmem:[%s2504_s0 + $0x20] sm:$0xff]  }
   0x8   :  { %v303_v24 = vmul.f32 %v1604_v11, %v232_v15  ;;  %v230_v25 = vmul.f32 %v1591_v4, %v159_v16  ;;  %v304_v26 = vmul.f32 %v1604_v11, %v233_v17  ;;  %v231_v27 = vmul.f32 %v1591_v4, %v160_v18  ;;  %v632_v6 = vld [vmem:[%s2505_s1 + $0x20] sm:$0xff]  ;;  %v1357_v17 = vld [vmem:[%s2504_s0 + $0x30] sm:$0xff]  }
   0x9   :  { %v306_v36 = vmul.f32 %v1604_v11, %v235_v28  ;;  %v305_v37 = vmul.f32 %v1604_v11, %v234_v29  ;;  %v308_v51 = vmul.f32 %v1604_v11, %v237_v38  ;;  %v307_v10 = vmul.f32 %v1604_v11, %v236_v39  ;;  %v1713_v39 = vld [vmem:[%s2504_s0 + $0x38] sm:$0xff]  }
   0xa   :  { %v374_v32 = vadd.f32 %v1616_v19, %v303_v24  ;;  %v301_v33 = vmul.f32 %v1604_v11, %v230_v25  ;;  %v375_v34 = vadd.f32 %v1616_v19, %v304_v26  ;;  %v302_v35 = vmul.f32 %v1604_v11, %v231_v27 }
   0xb   :  { %v377_v46 = vadd.f32 %v1616_v19, %v306_v36  ;;  %v376_v47 = vadd.f32 %v1616_v19, %v305_v37  ;;  %v379_v9 = vadd.f32 %v1616_v19, %v308_v51  ;;  %v1243_v15 = vunpack.c.h.bf16 %v1355_v63 }
   0xc   :  { %vm438_vm0 = vcmp.gt.f32.partialorder %v374_v32, 0.0  ;;  %v502_v40 = vmul.f32 0.01, %v374_v32  ;;  %v372_v42 = vadd.f32 %v1616_v19, %v301_v33  ;;  %vm439_vm1 = vcmp.gt.f32.partialorder %v375_v34, 0.0  ;;  %v634_v33 = vld [vmem:[%s2505_s1 + $0x30] sm:$0xff] }
   0xd   :  { %v503_v43 = vmul.f32 0.01, %v375_v34  ;;  %v373_v45 = vadd.f32 %v1616_v19, %v302_v35  ;;  %vm441_vm4 = vcmp.gt.f32.partialorder %v377_v46, 0.0  ;;  %v505_v58 = vmul.f32 0.01, %v377_v46 }
   0xe   :  { %v566_v48 = vsel %vm438_vm0, %v374_v32, %v502_v40  ;;  %vm436_vm2 = vcmp.gt.f32.partialorder %v372_v42, 0.0  ;;  %v500_v49 = vmul.f32 0.01, %v372_v42  ;;  %vm440_vm5 = vcmp.gt.f32.partialorder %v376_v47, 0.0 }
   0xf   :  { %v1650_v52 = vadd.f32 %v630_v41, %v566_v48  ;;  %v567_v53 = vsel %vm439_vm1, %v375_v34, %v503_v43  ;;  %vm437_vm3 = vcmp.gt.f32.partialorder %v373_v45, 0.0  ;;  %v501_v54 = vmul.f32 0.01, %v373_v45 }
  0x10   :  { %v564_v56 = vsel %vm436_vm2, %v372_v42, %v500_v49  ;;  %v1655_v57 = vadd.f32 %v631_v44, %v567_v53  ;;  %v569_v3 = vsel %vm441_vm4, %v377_v46, %v505_v58  ;;  %v504_v5 = vmul.f32 0.01, %v376_v47 }
  0x11   :  { %v758_v60 = vmul.f32 %v1650_v52, %v1650_v52  ;;  %v1662_v61 = vadd.f32 %v628_v50, %v564_v56  ;;  %v565_v62 = vsel %vm437_vm3, %v373_v45, %v501_v54  ;;  %v1676_v8 = vadd.f32 %v633_v59, %v569_v3  ;;  %v637_v59 = vld [vmem:[%s2505_s1 + $0x48] sm:$0xff] }
  0x12   :  { %v759_v0 = vmul.f32 %v1655_v57, %v1655_v57  ;;  %v1669_v2 = vadd.f32 %v629_v55, %v565_v62  ;;  %v568_v14 = vsel %vm440_vm5, %v376_v47, %v504_v5  ;;  %v1242_v16 = vunpack.c.l.bf16 %v1355_v63 }
  0x13   :  { %824 = vadd.xlane.f32.xlu1 %v758_v60  ;;  %v756_v7 = vmul.f32 %v1662_v61, %v1662_v61  ;;  %v761_v18 = vmul.f32 %v1676_v8, %v1676_v8  ;;  %v1690_v20 = vadd.f32 %v632_v6, %v568_v14  ;;  %vm443_vm6 = vcmp.gt.f32.partialorder %v379_v9, 0.0 }
  0x14   :  { %v757_v13 = vmul.f32 %v1669_v2, %v1669_v2  ;;  %v507_v21 = vmul.f32 0.01, %v379_v9  ;;  %v378_v23 = vadd.f32 %v1616_v19, %v307_v10  ;;  %v168_v24 = vsub.f32 %v1243_v15, %v1586_v1  ;;  %v639_v15 = vld [vmem:[%s2505_s1 + $0x58] sm:$0xff] }
  0x15   :  { %820 = vadd.xlane.f32.xlu0 %v756_v7  ;;  %v167_v25 = vsub.f32 %v1242_v16, %v1586_v1  ;;  %v1247_v26 = vunpack.c.h.bf16 %v1356_v12  ;;  %v760_v27 = vmul.f32 %v1690_v20, %v1690_v20  ;;  %v1246_v29 = vunpack.c.l.bf16 %v1356_v12 }
  0x16   :  { %v571_v28 = vsel %vm443_vm6, %v379_v9, %v507_v21  ;;  %v1251_v30 = vunpack.c.h.bf16 %v1357_v17  ;;  %vm442_vm7 = vcmp.gt.f32.partialorder %v378_v23, 0.0  ;;  %v506_v32 = vmul.f32 0.01, %v378_v23 }
  0x17   :  { %826 = vadd.xlane.f32.xlu1 %v759_v0  ;;  %v1700_v31 = vadd.f32 %v635_v22, %v571_v28  ;;  %v239_v34 = vmul.f32 %v1591_v4, %v168_v24  ;;  %v238_v35 = vmul.f32 %v1591_v4, %v167_v25  ;;  %v170_v36 = vsub.f32 %v1247_v26, %v1586_v1  ;;  %v636_v0 = vld [vmem:[%s2505_s1 + $0x40] sm:$0xff] }
  0x18   :  { %v169_v37 = vsub.f32 %v1246_v29, %v1586_v1  ;;  %v172_v38 = vsub.f32 %v1251_v30, %v1586_v1  ;;  %v570_v41 = vsel %vm442_vm7, %v378_v23, %v506_v32  ;;  %v1250_v43 = vunpack.c.l.bf16 %v1357_v17 }
  0x19   :  { %822 = vadd.xlane.f32.xlu0 %v757_v13  ;;  %v763_v40 = vmul.f32 %v1700_v31, %v1700_v31  ;;  %v310_v42 = vmul.f32 %v1604_v11, %v239_v34  ;;  %v1718_v44 = vadd.f32 %v634_v33, %v570_v41  ;;  %v309_v45 = vmul.f32 %v1604_v11, %v238_v35 }
  0x1a   :  { %v241_v46 = vmul.f32 %v1591_v4, %v170_v36  ;;  %v240_v47 = vmul.f32 %v1591_v4, %v169_v37  ;;  %v243_v49 = vmul.f32 %v1591_v4, %v172_v38  ;;  %v171_v50 = vsub.f32 %v1250_v43, %v1586_v1 }
  0x1b   :  { %830 = vadd.xlane.f32.xlu1 %v761_v18  ;;  %v381_v48 = vadd.f32 %v1616_v19, %v310_v42  ;;  %v1255_v51 = vunpack.c.h.bf16 %v1713_v39  ;;  %v762_v53 = vmul.f32 %v1718_v44, %v1718_v44  ;;  %v380_v54 = vadd.f32 %v1616_v19, %v309_v45 }
  0x1c   :  { %v312_v55 = vmul.f32 %v1604_v11, %v241_v46  ;;  %v311_v56 = vmul.f32 %v1604_v11, %v240_v47  ;;  %v314_v60 = vmul.f32 %v1604_v11, %v243_v49  ;;  %v242_v62 = vmul.f32 %v1591_v4, %v171_v50 }
  0x1d   :  { %828 = vadd.xlane.f32.xlu0 %v760_v27  ;;  %vm445_vm8 = vcmp.gt.f32.partialorder %v381_v48, 0.0  ;;  %v509_v58 = vmul.f32 0.01, %v381_v48  ;;  %vm444_vm9 = vcmp.gt.f32.partialorder %v380_v54, 0.0  ;;  %v508_v63 = vmul.f32 0.01, %v380_v54 }
  0x1e   :  { %v383_v3 = vadd.f32 %v1616_v19, %v312_v55  ;;  %v382_v5 = vadd.f32 %v1616_v19, %v311_v56  ;;  %v385_v7 = vadd.f32 %v1616_v19, %v314_v60  ;;  %v313_v9 = vmul.f32 %v1604_v11, %v242_v62 }
  0x1f   :  { %834 = vadd.xlane.f32.xlu1 %v763_v40  ;;  %v573_v6 = vsel %vm445_vm8, %v381_v48, %v509_v58  ;;  %v174_v10 = vsub.f32 %v1255_v51, %v1586_v1  ;;  %v572_v13 = vsel %vm444_vm9, %v380_v54, %v508_v63 }
  0x20   :  { %v1745_v12 = vadd.f32 %v637_v59, %v573_v6  ;;  %vm447_vm10 = vcmp.gt.f32.partialorder %v383_v3, 0.0  ;;  %v511_v14 = vmul.f32 0.01, %v383_v3 }
  0x21   :  { %832 = vadd.xlane.f32.xlu0 %v762_v53 }
  0x22   :  { %11 = vsyncpa [#allocation3], 0  ;;  %v1750_v16 = vadd.f32 %v636_v0, %v572_v13  ;;  %vm446_vm11 = vcmp.gt.f32.partialorder %v382_v5, 0.0  ;;  %v510_v17 = vmul.f32 0.01, %v382_v5  ;;  %v638_v18 = vld [vmem:[%s2505_s1 + $0x50] sm:$0xff]  ;;  %v765_v21 = vmul.f32 %v1745_v12, %v1745_v12 }
  0x23   :  { %vm449_vm12 = vcmp.gt.f32.partialorder %v385_v7, 0.0  ;;  %v575_v22 = vsel %vm447_vm10, %v383_v3, %v511_v14  ;;  %v513_v23 = vmul.f32 0.01, %v385_v7  ;;  %v641_v24 = vld [vmem:[%s2505_s1 + $0x68] sm:$0xff]  ;;  %v384_v25 = vadd.f32 %v1616_v19, %v313_v9  ;;  %v1359_v30 = vld [vmem:[%s2504_s0 + $0x40] sm:$0xff]   ;;  %v1361_v55 = vld [vmem:[%s2504_s0 + $0x50] sm:$0xff]  }
  0x24   :  { %v764_v26 = vmul.f32 %v1750_v16, %v1750_v16  ;;  %v1763_v27 = vadd.f32 %v639_v15, %v575_v22  ;;  %v574_v28 = vsel %vm446_vm11, %v382_v5, %v510_v17  ;;  %v245_v29 = vmul.f32 %v1591_v4, %v174_v10  ;;  %838 = vadd.xlane.f32.xlu1 %v765_v21  ;;  %v640_v35 = vld [vmem:[%s2505_s1 + $0x60] sm:$0xff]  ;;  %v1360_v41 = vld [vmem:[%s2504_s0 + $0x48] sm:$0xff]   ;;  %v643_v59 = vld [vmem:[%s2505_s1 + $0x78] sm:$0xff] }
  0x25   :  { %v1769_v32 = vadd.f32 %v638_v18, %v574_v28  ;;  %v577_v33 = vsel %vm449_vm12, %v385_v7, %v513_v23  ;;  %vm448_vm13 = vcmp.gt.f32.partialorder %v384_v25, 0.0  ;;  %v512_v34 = vmul.f32 0.01, %v384_v25 }
  0x26   :  { %836 = vadd.xlane.f32.xlu0 %v764_v26  ;;  %v767_v36 = vmul.f32 %v1763_v27, %v1763_v27  ;;  %v1776_v37 = vadd.f32 %v641_v24, %v577_v33  ;;  %v316_v38 = vmul.f32 %v1604_v11, %v245_v29  ;;  %v1254_v40 = vunpack.c.l.bf16 %v1713_v39  ;;  %v642_v29 = vld [vmem:[%s2505_s1 + $0x70] sm:$0xff]  ;;  %v644_v33 = vld [vmem:[%s2505_s1 + $0x80] sm:$0xff] }
  0x27   :  { %v766_v42 = vmul.f32 %v1769_v32, %v1769_v32  ;;  %v576_v43 = vsel %vm448_vm13, %v384_v25, %v512_v34  ;;  %v1259_v45 = vunpack.c.h.bf16 %v1359_v30  ;;  %v1258_v46 = vunpack.c.l.bf16 %v1359_v30  ;;  %v645_v30 = vld [vmem:[%s2505_s1 + $0x88] sm:$0xff] }
  0x28   :  { %v769_v47 = vmul.f32 %v1776_v37, %v1776_v37  ;;  %v1787_v48 = vadd.f32 %v640_v35, %v576_v43  ;;  %v387_v49 = vadd.f32 %v1616_v19, %v316_v38  ;;  %v173_v50 = vsub.f32 %v1254_v40, %v1586_v1  ;;  %842 = vadd.xlane.f32.xlu1 %v767_v36 }
  0x29   :  { %v176_v39 = vsub.f32 %v1259_v45, %v1586_v1  ;;  %v175_v51 = vsub.f32 %v1258_v46, %v1586_v1  ;;  %v1263_v53 = vunpack.c.h.bf16 %v1360_v41  ;;  %v1262_v54 = vunpack.c.l.bf16 %v1360_v41 }
  0x2a   :  { %840 = vadd.xlane.f32.xlu0 %v766_v42  ;;  %v768_v56 = vmul.f32 %v1787_v48, %v1787_v48  ;;  %vm451_vm14 = vcmp.gt.f32.partialorder %v387_v49, 0.0  ;;  %v515_v58 = vmul.f32 0.01, %v387_v49  ;;  %v244_v60 = vmul.f32 %v1591_v4, %v173_v50 }
  0x2b   :  { %v247_v62 = vmul.f32 %v1591_v4, %v176_v39  ;;  %v246_v63 = vmul.f32 %v1591_v4, %v175_v51  ;;  %v178_v0 = vsub.f32 %v1263_v53, %v1586_v1  ;;  %v177_v3 = vsub.f32 %v1262_v54, %v1586_v1  ;;  %v647_v53 = vld [vmem:[%s2505_s1 + $0x98] sm:$0xff] }
  0x2c   :  { %v579_v5 = vsel %vm451_vm14, %v387_v49, %v515_v58  ;;  %v315_v6 = vmul.f32 %v1604_v11, %v244_v60  ;;  %v1267_v7 = vunpack.c.h.bf16 %v1361_v55  ;;  %v1266_v9 = vunpack.c.l.bf16 %v1361_v55  ;;  %846 = vadd.xlane.f32.xlu1 %v769_v47 }
  0x2d   :  { %v1807_v10 = vadd.f32 %v643_v59, %v579_v5  ;;  %v318_v13 = vmul.f32 %v1604_v11, %v247_v62  ;;  %v317_v14 = vmul.f32 %v1604_v11, %v246_v63  ;;  %v249_v15 = vmul.f32 %v1591_v4, %v178_v0  ;;  %v1362_v59 = vld [vmem:[%s2504_s0 + $0x58] sm:$0xff]  }
  0x2e   :  { %844 = vadd.xlane.f32.xlu0 %v768_v56  ;;  %v386_v17 = vadd.f32 %v1616_v19, %v315_v6  ;;  %v248_v18 = vmul.f32 %v1591_v4, %v177_v3  ;;  %v180_v21 = vsub.f32 %v1267_v7, %v1586_v1  ;;  %v179_v22 = vsub.f32 %v1266_v9, %v1586_v1  ;;  %v646_v56 = vld [vmem:[%s2505_s1 + $0x90] sm:$0xff]  ;;  %v1363_v3 = vld [vmem:[%s2504_s0 + $0x60] sm:$0xff]   ;;  %v649_v9 = vld [vmem:[%s2505_s1 + $0xa8] sm:$0xff] }
  0x2f   :  { %v771_v23 = vmul.f32 %v1807_v10, %v1807_v10  ;;  %v389_v24 = vadd.f32 %v1616_v19, %v318_v13  ;;  %v388_v25 = vadd.f32 %v1616_v19, %v317_v14  ;;  %v320_v26 = vmul.f32 %v1604_v11, %v249_v15 }
  0x30   :  { %vm450_vm15 = vcmp.gt.f32.partialorder %v386_v17, 0.0  ;;  %v514_v28 = vmul.f32 0.01, %v386_v17  ;;  %v319_v34 = vmul.f32 %v1604_v11, %v248_v18  ;;  %v251_v35 = vmul.f32 %v1591_v4, %v180_v21 }
  0x31   :  { %850 = vadd.xlane.f32.xlu1 %v771_v23  ;;  %vm453_vm0 = vcmp.gt.f32.partialorder %v389_v24, 0.0  ;;  %v517_v36 = vmul.f32 0.01, %v389_v24  ;;  %vm452_vm1 = vcmp.gt.f32.partialorder %v388_v25, 0.0  ;;  %v516_v38 = vmul.f32 0.01, %v388_v25 }
  0x32   :  { %v578_v40 = vsel %vm450_vm15, %v386_v17, %v514_v28  ;;  %v391_v41 = vadd.f32 %v1616_v19, %v320_v26  ;;  %v390_v42 = vadd.f32 %v1616_v19, %v319_v34  ;;  %v322_v43 = vmul.f32 %v1604_v11, %v251_v35 }
  0x33   :  { %v1835_v45 = vadd.f32 %v642_v29, %v578_v40  ;;  %v581_v46 = vsel %vm453_vm0, %v389_v24, %v517_v36  ;;  %v580_v47 = vsel %vm452_vm1, %v388_v25, %v516_v38  ;;  %v250_v49 = vmul.f32 %v1591_v4, %v179_v22  ;;  %v1364_v24 = vld [vmem:[%s2504_s0 + $0x68] sm:$0xff]   ;;  %v648_v29 = vld [vmem:[%s2505_s1 + $0xa0] sm:$0xff]  ;;  %v1889_v36 = vld [vmem:[%s2504_s0 + $0x70] sm:$0xff]  }
  0x34   :  { %v1838_v50 = vadd.f32 %v645_v30, %v581_v46  ;;  %v1840_v39 = vadd.f32 %v644_v33, %v580_v47  ;;  %vm455_vm2 = vcmp.gt.f32.partialorder %v391_v41, 0.0  ;;  %v519_v51 = vmul.f32 0.01, %v391_v41 }
  0x35   :  { %v770_v54 = vmul.f32 %v1835_v45, %v1835_v45  ;;  %vm454_vm3 = vcmp.gt.f32.partialorder %v390_v42, 0.0  ;;  %v518_v55 = vmul.f32 0.01, %v390_v42  ;;  %v393_v58 = vadd.f32 %v1616_v19, %v322_v43 }
  0x36   :  { %v773_v60 = vmul.f32 %v1838_v50, %v1838_v50  ;;  %v772_v62 = vmul.f32 %v1840_v39, %v1840_v39  ;;  %v583_v63 = vsel %vm455_vm2, %v391_v41, %v519_v51  ;;  %v321_v0 = vmul.f32 %v1604_v11, %v250_v49 }
  0x37   :  { %848 = vadd.xlane.f32.xlu0 %v770_v54  ;;  %v1862_v5 = vadd.f32 %v647_v53, %v583_v63  ;;  %v582_v6 = vsel %vm454_vm3, %v390_v42, %v518_v55  ;;  %vm457_vm4 = vcmp.gt.f32.partialorder %v393_v58, 0.0  ;;  %v521_v7 = vmul.f32 0.01, %v393_v58 }
  0x38   :  { %854 = vadd.xlane.f32.xlu1 %v773_v60  ;;  %v1867_v13 = vadd.f32 %v646_v56, %v582_v6  ;;  %v392_v14 = vadd.f32 %v1616_v19, %v321_v0  ;;  %v1271_v15 = vunpack.c.h.bf16 %v1362_v59  ;;  %v1270_v17 = vunpack.c.l.bf16 %v1362_v59 }
  0x39   :  { %v775_v18 = vmul.f32 %v1862_v5, %v1862_v5  ;;  %v585_v21 = vsel %vm457_vm4, %v393_v58, %v521_v7  ;;  %v1275_v22 = vunpack.c.h.bf16 %v1363_v3  ;;  %v1274_v23 = vunpack.c.l.bf16 %v1363_v3  ;;  %v651_v7 = vld [vmem:[%s2505_s1 + $0xb8] sm:$0xff] }
  0x3a   :  { %v774_v25 = vmul.f32 %v1867_v13, %v1867_v13  ;;  %v1877_v26 = vadd.f32 %v649_v9, %v585_v21  ;;  %vm456_vm5 = vcmp.gt.f32.partialorder %v392_v14, 0.0  ;;  %v520_v28 = vmul.f32 0.01, %v392_v14 }
  0x3b   :  { %852 = vadd.xlane.f32.xlu0 %v772_v62  ;;  %v182_v30 = vsub.f32 %v1271_v15, %v1586_v1  ;;  %v181_v33 = vsub.f32 %v1270_v17, %v1586_v1  ;;  %v184_v34 = vsub.f32 %v1275_v22, %v1586_v1  ;;  %v183_v35 = vsub.f32 %v1274_v23, %v1586_v1  ;;  %v650_v17 = vld [vmem:[%s2505_s1 + $0xb0] sm:$0xff]  ;;  %v652_v22 = vld [vmem:[%s2505_s1 + $0xc0] sm:$0xff] }
  0x3c   :  { %858 = vadd.xlane.f32.xlu1 %v775_v18  ;;  %v777_v38 = vmul.f32 %v1877_v26, %v1877_v26  ;;  %v584_v40 = vsel %vm456_vm5, %v392_v14, %v520_v28  ;;  %v1279_v41 = vunpack.c.h.bf16 %v1364_v24  ;;  %v1278_v42 = vunpack.c.l.bf16 %v1364_v24  ;;  %v653_v18 = vld [vmem:[%s2505_s1 + $0xc8] sm:$0xff] }
  0x3d   :  { %v1893_v43 = vadd.f32 %v648_v29, %v584_v40  ;;  %v253_v46 = vmul.f32 %v1591_v4, %v182_v30  ;;  %v252_v47 = vmul.f32 %v1591_v4, %v181_v33  ;;  %v255_v49 = vmul.f32 %v1591_v4, %v184_v34 }
  0x3e   :  { %v254_v51 = vmul.f32 %v1591_v4, %v183_v35  ;;  %v186_v53 = vsub.f32 %v1279_v41, %v1586_v1  ;;  %v185_v54 = vsub.f32 %v1278_v42, %v1586_v1  ;;  %v1283_v55 = vunpack.c.h.bf16 %v1889_v36 }
  0x3f   :  { %856 = vadd.xlane.f32.xlu0 %v774_v25  ;;  %v776_v56 = vmul.f32 %v1893_v43, %v1893_v43  ;;  %v324_v58 = vmul.f32 %v1604_v11, %v253_v46  ;;  %v323_v59 = vmul.f32 %v1604_v11, %v252_v47  ;;  %v326_v60 = vmul.f32 %v1604_v11, %v255_v49 }
  0x40   :  { %862 = vadd.xlane.f32.xlu1 %v777_v38  ;;  %v325_v62 = vmul.f32 %v1604_v11, %v254_v51  ;;  %v257_v63 = vmul.f32 %v1591_v4, %v186_v53  ;;  %v256_v0 = vmul.f32 %v1591_v4, %v185_v54  ;;  %v188_v3 = vsub.f32 %v1283_v55, %v1586_v1  ;;  %v655_v53 = vld [vmem:[%s2505_s1 + $0xd8] sm:$0xff] }
  0x41   :  { %v395_v6 = vadd.f32 %v1616_v19, %v324_v58  ;;  %v394_v9 = vadd.f32 %v1616_v19, %v323_v59  ;;  %v397_v14 = vadd.f32 %v1616_v19, %v326_v60  ;;  %v1282_v15 = vunpack.c.l.bf16 %v1889_v36  ;;  %v1366_v54 = vld [vmem:[%s2504_s0 + $0x78] sm:$0xff]   ;;  %v654_v59 = vld [vmem:[%s2505_s1 + $0xd0] sm:$0xff]  ;;  %v1367_v60 = vld [vmem:[%s2504_s0 + $0x80] sm:$0xff]  }
  0x42   :  { %v396_v21 = vadd.f32 %v1616_v19, %v325_v62  ;;  %v328_v23 = vmul.f32 %v1604_v11, %v257_v63  ;;  %v327_v24 = vmul.f32 %v1604_v11, %v256_v0  ;;  %v259_v25 = vmul.f32 %v1591_v4, %v188_v3 }
  0x43   :  { %860 = vadd.xlane.f32.xlu0 %v776_v56  ;;  %vm459_vm6 = vcmp.gt.f32.partialorder %v395_v6, 0.0  ;;  %v523_v28 = vmul.f32 0.01, %v395_v6  ;;  %vm458_vm7 = vcmp.gt.f32.partialorder %v394_v9, 0.0  ;;  %v522_v29 = vmul.f32 0.01, %v394_v9 }
  0x44   :  { %vm461_vm8 = vcmp.gt.f32.partialorder %v397_v14, 0.0  ;;  %v525_v30 = vmul.f32 0.01, %v397_v14  ;;  %vm460_vm9 = vcmp.gt.f32.partialorder %v396_v21, 0.0  ;;  %v524_v33 = vmul.f32 0.01, %v396_v21 }
  0x45   :  { %v587_v34 = vsel %vm459_vm6, %v395_v6, %v523_v28  ;;  %v586_v35 = vsel %vm458_vm7, %v394_v9, %v522_v29  ;;  %v399_v36 = vadd.f32 %v1616_v19, %v328_v23  ;;  %v398_v38 = vadd.f32 %v1616_v19, %v327_v24  ;;  %v1368_v23 = vld [vmem:[%s2504_s0 + $0x88] sm:$0xff]  }
  0x46   :  { %v1933_v40 = vadd.f32 %v651_v7, %v587_v34  ;;  %v1935_v41 = vadd.f32 %v650_v17, %v586_v35  ;;  %v589_v42 = vsel %vm461_vm8, %v397_v14, %v525_v30  ;;  %v588_v46 = vsel %vm460_vm9, %v396_v21, %v524_v33  ;;  %v657_v33 = vld [vmem:[%s2505_s1 + $0xe8] sm:$0xff] }
  0x47   :  { %v1937_v47 = vadd.f32 %v653_v18, %v589_v42  ;;  %v1939_v49 = vadd.f32 %v652_v22, %v588_v46  ;;  %vm463_vm10 = vcmp.gt.f32.partialorder %v399_v36, 0.0  ;;  %v527_v51 = vmul.f32 0.01, %v399_v36 }
  0x48   :  { %v779_v55 = vmul.f32 %v1933_v40, %v1933_v40  ;;  %v778_v56 = vmul.f32 %v1935_v41, %v1935_v41  ;;  %vm462_vm11 = vcmp.gt.f32.partialorder %v398_v38, 0.0  ;;  %v526_v58 = vmul.f32 0.01, %v398_v38 }
  0x49   :  { %v781_v62 = vmul.f32 %v1937_v47, %v1937_v47  ;;  %v780_v63 = vmul.f32 %v1939_v49, %v1939_v49  ;;  %v591_v0 = vsel %vm463_vm10, %v399_v36, %v527_v51  ;;  %v330_v3 = vmul.f32 %v1604_v11, %v259_v25 }
  0x4a   :  { %866 = vadd.xlane.f32.xlu1 %v779_v55  ;;  %864 = vadd.xlane.f32.xlu0 %v778_v56  ;;  %v1962_v6 = vadd.f32 %v655_v53, %v591_v0  ;;  %v590_v7 = vsel %vm462_vm11, %v398_v38, %v526_v58  ;;  %v187_v9 = vsub.f32 %v1282_v15, %v1586_v1  ;;  %v1287_v14 = vunpack.c.h.bf16 %v1366_v54 }
  0x4b   :  { %v1965_v17 = vadd.f32 %v654_v59, %v590_v7  ;;  %v401_v18 = vadd.f32 %v1616_v19, %v330_v3  ;;  %v1286_v21 = vunpack.c.l.bf16 %v1366_v54  ;;  %v1291_v22 = vunpack.c.h.bf16 %v1367_v60 }
  0x4c   :  { %v783_v24 = vmul.f32 %v1962_v6, %v1962_v6  ;;  %v258_v25 = vmul.f32 %v1591_v4, %v187_v9  ;;  %v190_v28 = vsub.f32 %v1287_v14, %v1586_v1  ;;  %v1290_v29 = vunpack.c.l.bf16 %v1367_v60  ;;  %v656_v9 = vld [vmem:[%s2505_s1 + $0xe0] sm:$0xff] }
  0x4d   :  { %v782_v15 = vmul.f32 %v1965_v17, %v1965_v17  ;;  %vm465_vm12 = vcmp.gt.f32.partialorder %v401_v18, 0.0  ;;  %v529_v30 = vmul.f32 0.01, %v401_v18  ;;  %v189_v34 = vsub.f32 %v1286_v21, %v1586_v1 }
  0x4e   :  { %870 = vadd.xlane.f32.xlu1 %v781_v62  ;;  %868 = vadd.xlane.f32.xlu0 %v780_v63  ;;  %v329_v35 = vmul.f32 %v1604_v11, %v258_v25  ;;  %v261_v36 = vmul.f32 %v1591_v4, %v190_v28  ;;  %v192_v38 = vsub.f32 %v1291_v22, %v1586_v1  ;;  %v1295_v42 = vunpack.c.h.bf16 %v1368_v23  ;;  %v659_v28 = vld [vmem:[%s2505_s1 + $0xf8] sm:$0xff] }
  0x4f   :  { %v593_v46 = vsel %vm465_vm12, %v401_v18, %v529_v30  ;;  %v260_v51 = vmul.f32 %v1591_v4, %v189_v34  ;;  %v191_v53 = vsub.f32 %v1290_v29, %v1586_v1  ;;  %v1294_v54 = vunpack.c.l.bf16 %v1368_v23 }
  0x50   :  { %v1986_v55 = vadd.f32 %v657_v33, %v593_v46  ;;  %v400_v56 = vadd.f32 %v1616_v19, %v329_v35  ;;  %v332_v58 = vmul.f32 %v1604_v11, %v261_v36  ;;  %v263_v59 = vmul.f32 %v1591_v4, %v192_v38  ;;  %v658_v33 = vld [vmem:[%s2505_s1 + $0xf0] sm:$0xff] }
  0x51   :  { %v331_v60 = vmul.f32 %v1604_v11, %v260_v51  ;;  %v262_v62 = vmul.f32 %v1591_v4, %v191_v53  ;;  %v194_v63 = vsub.f32 %v1295_v42, %v1586_v1  ;;  %v193_v0 = vsub.f32 %v1294_v54, %v1586_v1  ;;  %v1369_v46 = vld [vmem:[%s2504_s0 + $0x90] sm:$0xff]  }
  0x52   :  { %874 = vadd.xlane.f32.xlu1 %v783_v24  ;;  %872 = vadd.xlane.f32.xlu0 %v782_v15  ;;  %v785_v3 = vmul.f32 %v1986_v55, %v1986_v55  ;;  %vm464_vm13 = vcmp.gt.f32.partialorder %v400_v56, 0.0  ;;  %v528_v7 = vmul.f32 0.01, %v400_v56  ;;  %v403_v14 = vadd.f32 %v1616_v19, %v332_v58 }
  0x53   :  { %v402_v18 = vadd.f32 %v1616_v19, %v331_v60  ;;  %v334_v21 = vmul.f32 %v1604_v11, %v263_v59  ;;  %v333_v22 = vmul.f32 %v1604_v11, %v262_v62  ;;  %v265_v23 = vmul.f32 %v1591_v4, %v194_v63  ;;  %v660_v62 = vld [vmem:[%s2505_s1 + $0x100] sm:$0xff] }
  0x54   :  { %v592_v24 = vsel %vm464_vm13, %v400_v56, %v528_v7  ;;  %vm467_vm14 = vcmp.gt.f32.partialorder %v403_v14, 0.0  ;;  %v531_v25 = vmul.f32 0.01, %v403_v14  ;;  %v264_v29 = vmul.f32 %v1591_v4, %v193_v0  ;;  %v661_v56 = vld [vmem:[%s2505_s1 + $0x108] sm:$0xff] }
  0x55   :  { %v2009_v15 = vadd.f32 %v656_v9, %v592_v24  ;;  %vm466_vm15 = vcmp.gt.f32.partialorder %v402_v18, 0.0  ;;  %v530_v30 = vmul.f32 0.01, %v402_v18  ;;  %v405_v34 = vadd.f32 %v1616_v19, %v334_v21 }
  0x56   :  { %878 = vadd.xlane.f32.xlu1 %v785_v3  ;;  %v595_v35 = vsel %vm467_vm14, %v403_v14, %v531_v25  ;;  %v404_v36 = vadd.f32 %v1616_v19, %v333_v22  ;;  %v336_v38 = vmul.f32 %v1604_v11, %v265_v23  ;;  %v335_v42 = vmul.f32 %v1604_v11, %v264_v29  ;;  %v1370_v22 = vld [vmem:[%s2504_s0 + $0x98] sm:$0xff]  }
  0x57   :  { %v784_v51 = vmul.f32 %v2009_v15, %v2009_v15  ;;  %v2023_v53 = vadd.f32 %v659_v28, %v595_v35  ;;  %v594_v54 = vsel %vm466_vm15, %v402_v18, %v530_v30  ;;  %vm469_vm0 = vcmp.gt.f32.partialorder %v405_v34, 0.0  ;;  %v663_v28 = vld [vmem:[%s2505_s1 + $0x118] sm:$0xff]  ;;  %v662_v30 = vld [vmem:[%s2505_s1 + $0x110] sm:$0xff]  ;;  %v1371_v35 = vld [vmem:[%s2504_s0 + $0xa0] sm:$0xff]  }
  0x58   :  { %v2028_v58 = vadd.f32 %v658_v33, %v594_v54  ;;  %v533_v59 = vmul.f32 0.01, %v405_v34  ;;  %vm468_vm1 = vcmp.gt.f32.partialorder %v404_v36, 0.0  ;;  %v532_v60 = vmul.f32 0.01, %v404_v36 }
  0x59   :  { %876 = vadd.xlane.f32.xlu0 %v784_v51  ;;  %v787_v63 = vmul.f32 %v2023_v53, %v2023_v53  ;;  %v407_v0 = vadd.f32 %v1616_v19, %v336_v38  ;;  %v406_v3 = vadd.f32 %v1616_v19, %v335_v42  ;;  %v1299_v7 = vunpack.c.h.bf16 %v1369_v46 }
  0x5a   :  { %v786_v9 = vmul.f32 %v2028_v58, %v2028_v58  ;;  %v597_v14 = vsel %vm469_vm0, %v405_v34, %v533_v59  ;;  %v596_v18 = vsel %vm468_vm1, %v404_v36, %v532_v60  ;;  %v1298_v21 = vunpack.c.l.bf16 %v1369_v46 }
  0x5b   :  { %882 = vadd.xlane.f32.xlu1 %v787_v63  ;;  %v2042_v23 = vadd.f32 %v661_v56, %v597_v14  ;;  %v2044_v24 = vadd.f32 %v660_v62, %v596_v18  ;;  %vm471_vm2 = vcmp.gt.f32.partialorder %v407_v0, 0.0  ;;  %v535_v25 = vmul.f32 0.01, %v407_v0 }
  0x5c   :  { %vm470_vm3 = vcmp.gt.f32.partialorder %v406_v3, 0.0  ;;  %v534_v29 = vmul.f32 0.01, %v406_v3  ;;  %v196_v33 = vsub.f32 %v1299_v7, %v1586_v1  ;;  %v195_v34 = vsub.f32 %v1298_v21, %v1586_v1 }
  0x5d   :  { %880 = vadd.xlane.f32.xlu0 %v786_v9  ;;  %v789_v36 = vmul.f32 %v2042_v23, %v2042_v23  ;;  %v788_v38 = vmul.f32 %v2044_v24, %v2044_v24  ;;  %v599_v42 = vsel %vm471_vm2, %v407_v0, %v535_v25  ;;  %v1303_v46 = vunpack.c.h.bf16 %v1370_v22  ;;  %v1372_v9 = vld [vmem:[%s2504_s0 + $0xa8] sm:$0xff]  }
  0x5e   :  { %v2061_v51 = vadd.f32 %v663_v28, %v599_v42  ;;  %v598_v54 = vsel %vm470_vm3, %v406_v3, %v534_v29  ;;  %v267_v56 = vmul.f32 %v1591_v4, %v196_v33  ;;  %v266_v59 = vmul.f32 %v1591_v4, %v195_v34 }
  0x5f   :  { %886 = vadd.xlane.f32.xlu1 %v789_v36  ;;  %v2065_v60 = vadd.f32 %v662_v30, %v598_v54  ;;  %v198_v62 = vsub.f32 %v1303_v46, %v1586_v1  ;;  %v1302_v63 = vunpack.c.l.bf16 %v1370_v22  ;;  %v1307_v7 = vunpack.c.h.bf16 %v1371_v35  ;;  %v664_v36 = vld [vmem:[%s2505_s1 + $0x120] sm:$0xff] }
  0x60   :  { %v791_v0 = vmul.f32 %v2061_v51, %v2061_v51  ;;  %v338_v3 = vmul.f32 %v1604_v11, %v267_v56  ;;  %v337_v14 = vmul.f32 %v1604_v11, %v266_v59  ;;  %v1306_v18 = vunpack.c.l.bf16 %v1371_v35  ;;  %v665_v35 = vld [vmem:[%s2505_s1 + $0x128] sm:$0xff] }
  0x61   :  { %884 = vadd.xlane.f32.xlu0 %v788_v38  ;;  %v790_v21 = vmul.f32 %v2065_v60, %v2065_v60  ;;  %v269_v25 = vmul.f32 %v1591_v4, %v198_v62  ;;  %v197_v22 = vsub.f32 %v1302_v63, %v1586_v1  ;;  %v200_v28 = vsub.f32 %v1307_v7, %v1586_v1 }
  0x62   :  { %v409_v29 = vadd.f32 %v1616_v19, %v338_v3  ;;  %v408_v30 = vadd.f32 %v1616_v19, %v337_v14  ;;  %v199_v33 = vsub.f32 %v1306_v18, %v1586_v1  ;;  %v1311_v34 = vunpack.c.h.bf16 %v1372_v9 }
  0x63   :  { %890 = vadd.xlane.f32.xlu1 %v791_v0  ;;  %v340_v38 = vmul.f32 %v1604_v11, %v269_v25  ;;  %v268_v42 = vmul.f32 %v1591_v4, %v197_v22  ;;  %v271_v46 = vmul.f32 %v1591_v4, %v200_v28  ;;  %v1310_v54 = vunpack.c.l.bf16 %v1372_v9  ;;  %v667_v28 = vld [vmem:[%s2505_s1 + $0x138] sm:$0xff] }
  0x64   :  { %vm473_vm4 = vcmp.gt.f32.partialorder %v409_v29, 0.0  ;;  %v537_v56 = vmul.f32 0.01, %v409_v29  ;;  %vm472_vm5 = vcmp.gt.f32.partialorder %v408_v30, 0.0  ;;  %v536_v59 = vmul.f32 0.01, %v408_v30 }
  0x65   :  { %888 = vadd.xlane.f32.xlu0 %v790_v21  ;;  %v411_v62 = vadd.f32 %v1616_v19, %v340_v38  ;;  %v339_v63 = vmul.f32 %v1604_v11, %v268_v42  ;;  %v342_v7 = vmul.f32 %v1604_v11, %v271_v46  ;;  %v270_v0 = vmul.f32 %v1591_v4, %v199_v33  ;;  %v1373_v42 = vld [vmem:[%s2504_s0 + $0xb0] sm:$0xff]  }
  0x66   :  { %v601_v3 = vsel %vm473_vm4, %v409_v29, %v537_v56  ;;  %v600_v14 = vsel %vm472_vm5, %v408_v30, %v536_v59  ;;  %v202_v18 = vsub.f32 %v1311_v34, %v1586_v1  ;;  %v201_v25 = vsub.f32 %v1310_v54, %v1586_v1  ;;  %v666_v56 = vld [vmem:[%s2505_s1 + $0x130] sm:$0xff] }
  0x67   :  { %v2098_v9 = vadd.f32 %v665_v35, %v601_v3  ;;  %v2100_v22 = vadd.f32 %v664_v36, %v600_v14  ;;  %vm475_vm6 = vcmp.gt.f32.partialorder %v411_v62, 0.0  ;;  %v539_v21 = vmul.f32 0.01, %v411_v62 }
  0x68   :  { %v410_v38 = vadd.f32 %v1616_v19, %v339_v63  ;;  %v413_v33 = vadd.f32 %v1616_v19, %v342_v7  ;;  %v341_v29 = vmul.f32 %v1604_v11, %v270_v0  ;;  %v273_v30 = vmul.f32 %v1591_v4, %v202_v18 }
  0x69   :  { %2529 = vst [vmem:[#allocation5_spill] sm:$0xff] %v2100_v22  ;;  %v793_v1 = vmul.f32 %v2098_v9, %v2098_v9  ;;  %v792_v34 = vmul.f32 %v2100_v22, %v2100_v22  ;;  %v603_v35 = vsel %vm475_vm6, %v411_v62, %v539_v21  ;;  %v272_v36 = vmul.f32 %v1591_v4, %v201_v25  ;;  %v669_v4 = vld [vmem:[%s2505_s1 + $0x148] sm:$0xff]  ;;  %v1374_v25 = vld [vmem:[%s2504_s0 + $0xb8] sm:$0xff]  }
  0x6a   :  { %v2117_v46 = vadd.f32 %v667_v28, %v603_v35  ;;  %vm474_vm7 = vcmp.gt.f32.partialorder %v410_v38, 0.0  ;;  %v538_v54 = vmul.f32 0.01, %v410_v38  ;;  %vm477_vm8 = vcmp.gt.f32.partialorder %v413_v33, 0.0 }
  0x6b   :  { %894 = vadd.xlane.f32.xlu1 %v793_v1  ;;  %892 = vadd.xlane.f32.xlu0 %v792_v34  ;;  %v541_v59 = vmul.f32 0.01, %v413_v33  ;;  %v412_v62 = vadd.f32 %v1616_v19, %v341_v29  ;;  %v344_v63 = vmul.f32 %v1604_v11, %v273_v30  ;;  %v343_v7 = vmul.f32 %v1604_v11, %v272_v36  ;;  %v668_v19 = vld [vmem:[%s2505_s1 + $0x140] sm:$0xff] }
  0x6c   :  { %2530 = vst [vmem:[#allocation6_spill] sm:$0xff] %v2117_v46  ;;  %v795_v0 = vmul.f32 %v2117_v46, %v2117_v46  ;;  %v602_v3 = vsel %vm474_vm7, %v410_v38, %v538_v54  ;;  %v1315_v14 = vunpack.c.h.bf16 %v1373_v42  ;;  %v1314_v18 = vunpack.c.l.bf16 %v1373_v42  ;;  %v2143_v38 = vld [vmem:[%s2509_s5] ss:$0 sm:$0xff] }
  0x6d   :  { %v2133_v21 = vadd.f32 %v666_v56, %v602_v3  ;;  %v605_v28 = vsel %vm477_vm8, %v413_v33, %v541_v59  ;;  %vm476_vm9 = vcmp.gt.f32.partialorder %v412_v62, 0.0  ;;  %v540_v1 = vmul.f32 0.01, %v412_v62  ;;  %v2150_v33 = vld [vmem:[%s2506_s2] ss:$0 sm:$0xff] }
  0x6e   :  { %v2138_v11 = vadd.f32 %v669_v4, %v605_v28  ;;  %v415_v29 = vadd.f32 %v2143_v38, %v344_v63  ;;  %v414_v30 = vadd.f32 %v2143_v38, %v343_v7  ;;  %v204_v34 = vsub.f32 %v1315_v14, %v2150_v33  ;;  %v671_v63 = vld [vmem:[%s2505_s1 + $0x158] sm:$0xff] }
  0x6f   :  { %2531 = vst [vmem:[#allocation7_spill] sm:$0xff] %v2133_v21  ;;  %898 = vadd.xlane.f32.xlu1 %v795_v0  ;;  %v794_v35 = vmul.f32 %v2133_v21, %v2133_v21  ;;  %v604_v36 = vsel %vm476_vm9, %v412_v62, %v540_v1  ;;  %v203_v42 = vsub.f32 %v1314_v18, %v2150_v33  ;;  %v1319_v54 = vunpack.c.h.bf16 %v1374_v25  ;;  %v670_v62 = vld [vmem:[%s2505_s1 + $0x150] sm:$0xff]  ;;  %v2169_v0 = vld [vmem:[%s2507_s3] ss:$0 sm:$0xff] }
  0x70   :  { %2532 = vst [vmem:[#allocation8_spill] sm:$0xff] %v2138_v11  ;;  %v797_v56 = vmul.f32 %v2138_v11, %v2138_v11  ;;  %v2158_v59 = vadd.f32 %v668_v19, %v604_v36  ;;  %vm479_vm10 = vcmp.gt.f32.partialorder %v415_v29, 0.0  ;;  %v543_v4 = vmul.f32 0.01, %v415_v29  ;;  %v1375_v18 = vld [vmem:[%s2504_s0 + $0xc0] sm:$0xff]  }
  0x71   :  { %896 = vadd.xlane.f32.xlu0 %v794_v35  ;;  %vm478_vm11 = vcmp.gt.f32.partialorder %v414_v30, 0.0  ;;  %v542_v7 = vmul.f32 0.01, %v414_v30  ;;  %v275_v3 = vmul.f32 %v2169_v0, %v204_v34  ;;  %v274_v14 = vmul.f32 %v2169_v0, %v203_v42  ;;  %v2184_v34 = vld [vmem:[%s2508_s4] ss:$0 sm:$0xff] }
  0x72   :  { %2533 = vst [vmem:[#allocation9_spill] sm:$0xff] %v2158_v59  ;;  %v796_v28 = vmul.f32 %v2158_v59, %v2158_v59  ;;  %v607_v1 = vsel %vm479_vm10, %v415_v29, %v543_v4  ;;  %v206_v19 = vsub.f32 %v1319_v54, %v2150_v33  ;;  %v1318_v35 = vunpack.c.l.bf16 %v1374_v25 }
  0x73   :  { %902 = vadd.xlane.f32.xlu1 %v797_v56  ;;  %v2179_v36 = vadd.f32 %v671_v63, %v607_v1  ;;  %v606_v11 = vsel %vm478_vm11, %v414_v30, %v542_v7  ;;  %v346_v42 = vmul.f32 %v2184_v34, %v275_v3  ;;  %v345_v21 = vmul.f32 %v2184_v34, %v274_v14 }
  0x74   :  { %v2188_v46 = vadd.f32 %v670_v62, %v606_v11  ;;  %v277_v29 = vmul.f32 %v2169_v0, %v206_v19  ;;  %v205_v54 = vsub.f32 %v1318_v35, %v2150_v33  ;;  %v1323_v25 = vunpack.c.h.bf16 %v1375_v18  ;;  %v673_v11 = vld [vmem:[%s2505_s1 + $0x168] sm:$0xff]  ;;  %v672_v62 = vld [vmem:[%s2505_s1 + $0x160] sm:$0xff] }
  0x75   :  { %2534 = vst [vmem:[#allocation10_spill] sm:$0xff] %v2179_v36  ;;  %900 = vadd.xlane.f32.xlu0 %v796_v28  ;;  %v799_v30 = vmul.f32 %v2179_v36, %v2179_v36  ;;  %v417_v56 = vadd.f32 %v2143_v38, %v346_v42  ;;  %v416_v4 = vadd.f32 %v2143_v38, %v345_v21  ;;  %v1322_v63 = vunpack.c.l.bf16 %v1375_v18  ;;  %v1376_v21 = vld [vmem:[%s2504_s0 + $0xc8] sm:$0xff]  }
  0x76   :  { %2535 = vst [vmem:[#allocation11_spill] sm:$0xff] %v2188_v46  ;;  %v798_v7 = vmul.f32 %v2188_v46, %v2188_v46  ;;  %v348_v3 = vmul.f32 %v2184_v34, %v277_v29  ;;  %v276_v14 = vmul.f32 %v2169_v0, %v205_v54  ;;  %v208_v28 = vsub.f32 %v1323_v25, %v2150_v33 }
  0x77   :  { %906 = vadd.xlane.f32.xlu1 %v799_v30  ;;  %vm481_vm12 = vcmp.gt.f32.partialorder %v417_v56, 0.0  ;;  %v545_v18 = vmul.f32 0.01, %v417_v56  ;;  %vm480_vm13 = vcmp.gt.f32.partialorder %v416_v4, 0.0  ;;  %v544_v1 = vmul.f32 0.01, %v416_v4 }
  0x78   :  { %v419_v19 = vadd.f32 %v2143_v38, %v348_v3  ;;  %v347_v35 = vmul.f32 %v2184_v34, %v276_v14  ;;  %v279_v42 = vmul.f32 %v2169_v0, %v208_v28  ;;  %v207_v29 = vsub.f32 %v1322_v63, %v2150_v33  ;;  %v675_v3 = vld [vmem:[%s2505_s1 + $0x178] sm:$0xff] }
  0x79   :  { %904 = vadd.xlane.f32.xlu0 %v798_v7  ;;  %v609_v54 = vsel %vm481_vm12, %v417_v56, %v545_v18  ;;  %v608_v25 = vsel %vm480_vm13, %v416_v4, %v544_v1  ;;  %v1327_v46 = vunpack.c.h.bf16 %v1376_v21  ;;  %v1326_v36 = vunpack.c.l.bf16 %v1376_v21  ;;  %v1377_v4 = vld [vmem:[%s2504_s0 + $0xd0] sm:$0xff]  }
  0x7a   :  { %v2214_v59 = vadd.f32 %v673_v11, %v609_v54  ;;  %v2216_v30 = vadd.f32 %v672_v62, %v608_v25  ;;  %vm483_vm14 = vcmp.gt.f32.partialorder %v419_v19, 0.0  ;;  %v547_v22 = vmul.f32 0.01, %v419_v19 }
  0x7b   :  { %v418_v14 = vadd.f32 %v2143_v38, %v347_v35  ;;  %v350_v28 = vmul.f32 %v2184_v34, %v279_v42  ;;  %v278_v63 = vmul.f32 %v2169_v0, %v207_v29  ;;  %v210_v56 = vsub.f32 %v1327_v46, %v2150_v33  ;;  %v674_v46 = vld [vmem:[%s2505_s1 + $0x170] sm:$0xff] }
  0x7c   :  { %2536 = vst [vmem:[#allocation12_spill] sm:$0xff] %v2214_v59  ;;  %2537 = vst [vmem:[#allocation13_spill] sm:$0xff] %v2216_v30  ;;  %v801_v7 = vmul.f32 %v2214_v59, %v2214_v59  ;;  %v800_v11 = vmul.f32 %v2216_v30, %v2216_v30  ;;  %v611_v62 = vsel %vm483_vm14, %v419_v19, %v547_v22  ;;  %v1331_v19 = vunpack.c.h.bf16 %v1377_v4 }
  0x7d   :  { %v209_v21 = vsub.f32 %v1326_v36, %v2150_v33  ;;  %v2233_v18 = vadd.f32 %v675_v3, %v611_v62  ;;  %vm482_vm15 = vcmp.gt.f32.partialorder %v418_v14, 0.0  ;;  %v546_v1 = vmul.f32 0.01, %v418_v14  ;;  %v1378_v36 = vld [vmem:[%s2504_s0 + $0xd8] sm:$0xff]  }
  0x7e   :  { %v421_v35 = vadd.f32 %v2143_v38, %v350_v28  ;;  %910 = vadd.xlane.f32.xlu1 %v801_v7  ;;  %908 = vadd.xlane.f32.xlu0 %v800_v11  ;;  %v349_v42 = vmul.f32 %v2184_v34, %v278_v63  ;;  %v281_v29 = vmul.f32 %v2169_v0, %v210_v56  ;;  %v677_v28 = vld [vmem:[%s2505_s1 + $0x188] sm:$0xff]  ;;  %v1330_v30 = vunpack.c.l.bf16 %v1377_v4 }
  0x7f   :  { %2538 = vst [vmem:[#allocation14_spill] sm:$0xff] %v2233_v18  ;;  %v280_v22 = vmul.f32 %v2169_v0, %v209_v21  ;;  %v803_v54 = vmul.f32 %v2233_v18, %v2233_v18  ;;  %v610_v25 = vsel %vm482_vm15, %v418_v14, %v546_v1  ;;  %v212_v21 = vsub.f32 %v1331_v19, %v2150_v33 }
  0x80   :  { %vm485_vm0 = vcmp.gt.f32.partialorder %v421_v35, 0.0  ;;  %v549_v3 = vmul.f32 0.01, %v421_v35  ;;  %v2250_v63 = vadd.f32 %v674_v46, %v610_v25  ;;  %v420_v56 = vadd.f32 %v2143_v38, %v349_v42  ;;  %v676_v42 = vld [vmem:[%s2505_s1 + $0x180] sm:$0xff] }
  0x81   :  { %v352_v7 = vmul.f32 %v2184_v34, %v281_v29  ;;  %v351_v11 = vmul.f32 %v2184_v34, %v280_v22  ;;  %v1335_v18 = vunpack.c.h.bf16 %v1378_v36  ;;  %v283_v22 = vmul.f32 %v2169_v0, %v212_v21 }
  0x82   :  { %2539 = vst [vmem:[#allocation15_spill] sm:$0xff] %v2250_v63  ;;  %v613_v62 = vsel %vm485_vm0, %v421_v35, %v549_v3  ;;  %914 = vadd.xlane.f32.xlu1 %v803_v54  ;;  %v802_v14 = vmul.f32 %v2250_v63, %v2250_v63  ;;  %vm484_vm1 = vcmp.gt.f32.partialorder %v420_v56, 0.0  ;;  %v548_v46 = vmul.f32 0.01, %v420_v56 }
  0x83   :  { %v2258_v1 = vadd.f32 %v677_v28, %v613_v62  ;;  %v423_v29 = vadd.f32 %v2143_v38, %v352_v7  ;;  %v422_v35 = vadd.f32 %v2143_v38, %v351_v11  ;;  %v211_v4 = vsub.f32 %v1330_v30, %v2150_v33  ;;  %v1379_v28 = vld [vmem:[%s2504_s0 + $0xe0] sm:$0xff]   ;;  %v679_v30 = vld [vmem:[%s2505_s1 + $0x198] sm:$0xff] }
  0x84   :  { %912 = vadd.xlane.f32.xlu0 %v802_v14  ;;  %v612_v54 = vsel %vm484_vm1, %v420_v56, %v548_v46  ;;  %v214_v25 = vsub.f32 %v1335_v18, %v2150_v33  ;;  %v1334_v3 = vunpack.c.l.bf16 %v1378_v36  ;;  %v678_v18 = vld [vmem:[%s2505_s1 + $0x190] sm:$0xff]  ;;  %v354_v36 = vmul.f32 %v2184_v34, %v283_v22 }
  0x85   :  { %2540 = vst [vmem:[#allocation16_spill] sm:$0xff] %v2258_v1  ;;  %v805_v19 = vmul.f32 %v2258_v1, %v2258_v1  ;;  %v2273_v62 = vadd.f32 %v676_v42, %v612_v54  ;;  %vm487_vm2 = vcmp.gt.f32.partialorder %v423_v29, 0.0  ;;  %v551_v7 = vmul.f32 0.01, %v423_v29 }
  0x86   :  { %vm486_vm3 = vcmp.gt.f32.partialorder %v422_v35, 0.0  ;;  %v550_v11 = vmul.f32 0.01, %v422_v35  ;;  %v282_v56 = vmul.f32 %v2169_v0, %v211_v4  ;;  %v285_v21 = vmul.f32 %v2169_v0, %v214_v25 }
  0x87   :  { %2541 = vst [vmem:[#allocation17_spill] sm:$0xff] %v2273_v62  ;;  %918 = vadd.xlane.f32.xlu1 %v805_v19  ;;  %v804_v14 = vmul.f32 %v2273_v62, %v2273_v62  ;;  %v615_v46 = vsel %vm487_vm2, %v423_v29, %v551_v7  ;;  %v213_v42 = vsub.f32 %v1334_v3, %v2150_v33  ;;  %v1339_v54 = vunpack.c.h.bf16 %v1379_v28 }
  0x88   :  { %v2287_v1 = vadd.f32 %v679_v30, %v615_v46  ;;  %v614_v19 = vsel %vm486_vm3, %v422_v35, %v550_v11  ;;  %v425_v63 = vadd.f32 %v2143_v38, %v354_v36  ;;  %v353_v59 = vmul.f32 %v2184_v34, %v282_v56  ;;  %v681_v35 = vld [vmem:[%s2505_s1 + $0x1a8] sm:$0xff] }
  0x89   :  { %916 = vadd.xlane.f32.xlu0 %v804_v14  ;;  %v2291_v22 = vadd.f32 %v678_v18, %v614_v19  ;;  %v356_v4 = vmul.f32 %v2184_v34, %v285_v21  ;;  %v284_v25 = vmul.f32 %v2169_v0, %v213_v42  ;;  %v216_v62 = vsub.f32 %v1339_v54, %v2150_v33  ;;  %v1380_v56 = vld [vmem:[%s2504_s0 + $0xe8] sm:$0xff]  }
  0x8a   :  { %2542 = vst [vmem:[#allocation18_spill] sm:$0xff] %v2287_v1  ;;  %v807_v29 = vmul.f32 %v2287_v1, %v2287_v1  ;;  %vm489_vm4 = vcmp.gt.f32.partialorder %v425_v63, 0.0  ;;  %v553_v3 = vmul.f32 0.01, %v425_v63  ;;  %v424_v7 = vadd.f32 %v2143_v38, %v353_v59  ;;  %v680_v59 = vld [vmem:[%s2505_s1 + $0x1a0] sm:$0xff] }
  0x8b   :  { %2543 = vst [vmem:[#allocation19_spill] sm:$0xff] %v2291_v22  ;;  %v806_v30 = vmul.f32 %v2291_v22, %v2291_v22  ;;  %v427_v11 = vadd.f32 %v2143_v38, %v356_v4  ;;  %v355_v18 = vmul.f32 %v2184_v34, %v284_v25  ;;  %v287_v36 = vmul.f32 %v2169_v0, %v216_v62  ;;  %v683_v62 = vld [vmem:[%s2505_s1 + $0x1b8] sm:$0xff] }
  0x8c   :  { %922 = vadd.xlane.f32.xlu1 %v807_v29  ;;  %v617_v21 = vsel %vm489_vm4, %v425_v63, %v553_v3  ;;  %vm488_vm5 = vcmp.gt.f32.partialorder %v424_v7, 0.0  ;;  %v552_v14 = vmul.f32 0.01, %v424_v7  ;;  %v1338_v46 = vunpack.c.l.bf16 %v1379_v28  ;;  %v1381_v28 = vld [vmem:[%s2504_s0 + $0xf0] sm:$0xff]  }
  0x8d   :  { %920 = vadd.xlane.f32.xlu0 %v806_v30  ;;  %v2313_v42 = vadd.f32 %v681_v35, %v617_v21  ;;  %vm491_vm6 = vcmp.gt.f32.partialorder %v427_v11, 0.0  ;;  %v555_v54 = vmul.f32 0.01, %v427_v11  ;;  %v426_v19 = vadd.f32 %v2143_v38, %v355_v18 }
  0x8e   :  { %v616_v4 = vsel %vm488_vm5, %v424_v7, %v552_v14  ;;  %v358_v63 = vmul.f32 %v2184_v34, %v287_v36  ;;  %v215_v25 = vsub.f32 %v1338_v46, %v2150_v33  ;;  %v1343_v29 = vunpack.c.h.bf16 %v1380_v56  ;;  %v682_v7 = vld [vmem:[%s2505_s1 + $0x1b0] sm:$0xff] }
  0x8f   :  { %2544 = vst [vmem:[#allocation20_spill] sm:$0xff] %v2313_v42  ;;  %v809_v3 = vmul.f32 %v2313_v42, %v2313_v42  ;;  %v2326_v35 = vadd.f32 %v680_v59, %v616_v4  ;;  %v619_v30 = vsel %vm491_vm6, %v427_v11, %v555_v54  ;;  %vm490_vm7 = vcmp.gt.f32.partialorder %v426_v19, 0.0  ;;  %v1382_v54 = vld [vmem:[%s2504_s0 + $0xf8] sm:$0xff]  }
  0x90   :  { %v2328_v21 = vadd.f32 %v683_v62, %v619_v30  ;;  %v554_v18 = vmul.f32 0.01, %v426_v19  ;;  %v429_v36 = vadd.f32 %v2143_v38, %v358_v63  ;;  %v286_v14 = vmul.f32 %v2169_v0, %v215_v25  ;;  %v685_v25 = vld [vmem:[%s2505_s1 + $0x1c8] sm:$0xff] }
  0x91   :  { %2545 = vst [vmem:[#allocation21_spill] sm:$0xff] %v2326_v35  ;;  %926 = vadd.xlane.f32.xlu1 %v809_v3  ;;  %v808_v46 = vmul.f32 %v2326_v35, %v2326_v35  ;;  %v218_v59 = vsub.f32 %v1343_v29, %v2150_v33  ;;  %v1342_v4 = vunpack.c.l.bf16 %v1380_v56  ;;  %v1347_v11 = vunpack.c.h.bf16 %v1381_v28 }
  0x92   :  { %2546 = vst [vmem:[#allocation22_spill] sm:$0xff] %v2328_v21  ;;  %v811_v62 = vmul.f32 %v2328_v21, %v2328_v21  ;;  %v618_v30 = vsel %vm490_vm7, %v426_v19, %v554_v18  ;;  %vm493_vm8 = vcmp.gt.f32.partialorder %v429_v36, 0.0  ;;  %v557_v63 = vmul.f32 0.01, %v429_v36 }
  0x93   :  { %924 = vadd.xlane.f32.xlu0 %v808_v46  ;;  %v2346_v3 = vadd.f32 %v682_v7, %v618_v30  ;;  %v357_v56 = vmul.f32 %v2184_v34, %v286_v14  ;;  %v289_v29 = vmul.f32 %v2169_v0, %v218_v59  ;;  %v217_v35 = vsub.f32 %v1342_v4, %v2150_v33 }
  0x94   :  { %v621_v42 = vsel %vm493_vm8, %v429_v36, %v557_v63  ;;  %v220_v22 = vsub.f32 %v1347_v11, %v2150_v33  ;;  %v1346_v21 = vunpack.c.l.bf16 %v1381_v28  ;;  %v1351_v19 = vunpack.c.h.bf16 %v1382_v54 }
  0x95   :  { %930 = vadd.xlane.f32.xlu1 %v811_v62  ;;  %v810_v18 = vmul.f32 %v2346_v3, %v2346_v3  ;;  %v2354_v1 = vadd.f32 %v685_v25, %v621_v42  ;;  %v428_v7 = vadd.f32 %v2143_v38, %v357_v56  ;;  %v360_v46 = vmul.f32 %v2184_v34, %v289_v29  ;;  %v684_v42 = vld [vmem:[%s2505_s1 + $0x1c0] sm:$0xff]  ;;  %v687_v56 = vld [vmem:[%s2505_s1 + $0x1d8] sm:$0xff] }
  0x96   :  { %v288_v14 = vmul.f32 %v2169_v0, %v217_v35  ;;  %v291_v59 = vmul.f32 %v2169_v0, %v220_v22  ;;  %v219_v36 = vsub.f32 %v1346_v21, %v2150_v33  ;;  %v222_v4 = vsub.f32 %v1351_v19, %v2150_v33 }
  0x97   :  { %928 = vadd.xlane.f32.xlu0 %v810_v18  ;;  %v813_v28 = vmul.f32 %v2354_v1, %v2354_v1  ;;  %vm492_vm9 = vcmp.gt.f32.partialorder %v428_v7, 0.0  ;;  %v556_v11 = vmul.f32 0.01, %v428_v7  ;;  %v431_v62 = vadd.f32 %v2143_v38, %v360_v46 }
  0x98   :  { %v359_v35 = vmul.f32 %v2184_v34, %v288_v14  ;;  %v362_v22 = vmul.f32 %v2184_v34, %v291_v59  ;;  %v290_v21 = vmul.f32 %v2169_v0, %v219_v36  ;;  %v293_v30 = vmul.f32 %v2169_v0, %v222_v4 }
  0x99   :  { %934 = vadd.xlane.f32.xlu1 %v813_v28  ;;  %v620_v63 = vsel %vm492_vm9, %v428_v7, %v556_v11  ;;  %vm495_vm10 = vcmp.gt.f32.partialorder %v431_v62, 0.0  ;;  %v559_v25 = vmul.f32 0.01, %v431_v62  ;;  %v1350_v29 = vunpack.c.l.bf16 %v1382_v54  ;;  %v686_v11 = vld [vmem:[%s2505_s1 + $0x1d0] sm:$0xff] }
  0x9a   :  { %v2375_v19 = vadd.f32 %v684_v42, %v620_v63  ;;  %v430_v18 = vadd.f32 %v2143_v38, %v359_v35  ;;  %v433_v46 = vadd.f32 %v2143_v38, %v362_v22  ;;  %v361_v14 = vmul.f32 %v2184_v34, %v290_v21 }
  0x9b   :  { %v623_v59 = vsel %vm495_vm10, %v431_v62, %v559_v25  ;;  %v364_v36 = vmul.f32 %v2184_v34, %v293_v30  ;;  %v221_v7 = vsub.f32 %v1350_v29, %v2150_v33  ;;  %v689_v62 = vld [vmem:[%s2505_s1 + $0x1e8] sm:$0xff]  ;;  %v688_v29 = vld [vmem:[%s2505_s1 + $0x1e0] sm:$0xff] }
  0x9c   :  { %v812_v4 = vmul.f32 %v2375_v19, %v2375_v19  ;;  %v2384_v28 = vadd.f32 %v687_v56, %v623_v59  ;;  %vm494_vm11 = vcmp.gt.f32.partialorder %v430_v18, 0.0  ;;  %v558_v54 = vmul.f32 0.01, %v430_v18 }
  0x9d   :  { %vm497_vm12 = vcmp.gt.f32.partialorder %v433_v46, 0.0  ;;  %v561_v42 = vmul.f32 0.01, %v433_v46  ;;  %v432_v35 = vadd.f32 %v2143_v38, %v361_v14  ;;  %v435_v33 = vadd.f32 %v2143_v38, %v364_v36 }
  0x9e   :  { %932 = vadd.xlane.f32.xlu0 %v812_v4  ;;  %v815_v22 = vmul.f32 %v2384_v28, %v2384_v28  ;;  %v622_v21 = vsel %vm494_vm11, %v430_v18, %v558_v54  ;;  %v292_v30 = vmul.f32 %v2169_v0, %v221_v7  ;;  %v691_v18 = vld [vmem:[%s2505_s1 + $0x1f8] sm:$0xff] }
  0x9f   :  { %v2397_v63 = vadd.f32 %v686_v11, %v622_v21  ;;  %v625_v25 = vsel %vm497_vm12, %v433_v46, %v561_v42  ;;  %vm496_vm13 = vcmp.gt.f32.partialorder %v432_v35, 0.0  ;;  %v560_v56 = vmul.f32 0.01, %v432_v35 }
  0xa0   :  { %938 = vadd.xlane.f32.xlu1 %v815_v22  ;;  %v2402_v14 = vadd.f32 %v689_v62, %v625_v25  ;;  %vm499_vm14 = vcmp.gt.f32.partialorder %v435_v33, 0.0  ;;  %v563_v59 = vmul.f32 0.01, %v435_v33  ;;  %v363_v0 = vmul.f32 %v2184_v34, %v292_v30  ;;  %v825_v36 = vpop.xlane.xlu1 %824  ;;  %v690_v25 = vld [vmem:[%s2505_s1 + $0x1f0] sm:$0xff]  ;;  %s1542_s1 = smov [#allocation2]  }
  0xa1   :  { %v814_v46 = vmul.f32 %v2397_v63, %v2397_v63  ;;  %v624_v7 = vsel %vm496_vm13, %v432_v35, %v560_v56  ;;  %v950_v4 = vmax.f32 %v825_v36, 1e-24  ;;  %s1209_s26 = sshll.u32 %s1542_s1, 4  ;;  %s1210_s26 = int_to_ptr.vmem [resolvable:$true] %s1209_s26 }
  0xa2   :  { %v817_v54 = vmul.f32 %v2402_v14, %v2402_v14  ;;  %v2412_v11 = vadd.f32 %v688_v29, %v624_v7  ;;  %v627_v42 = vsel %vm499_vm14, %v435_v33, %v563_v59  ;;  %v434_v62 = vadd.f32 %v2143_v38, %v363_v0  ;;  %v821_v22 = vpop.xlane.xlu0 %820  ;;  %s1518_s3 = scalar_lea.vmem %s1210_s26, 8192  ;;  %p1523_p1 = scmp.lt.s32.totalorder %s1210_s26, %s1210_s26 }
  0xa3   :  { %936 = vadd.xlane.f32.xlu0 %v814_v46  ;;  %v2415_v21 = vadd.f32 %v691_v18, %v627_v42  ;;  %1386 = vrsqrt.f32 %v950_v4  ;;  %v948_v34 = vmax.f32 %v821_v22, 1e-24  ;;  %p1519_p0 = scmp.ne.s32.totalorder %s1210_s26, %s1518_s3  ;;  %p1524_p2 = scmp.lt.s32.totalorder %s1518_s3, %s1518_s3 }
  0xa4   :  { %942 = vadd.xlane.f32.xlu1 %v817_v54  ;;  %v816_v30 = vmul.f32 %v2412_v11, %v2412_v11  ;;  %vm498_vm15 = vcmp.gt.f32.partialorder %v434_v62, 0.0  ;;  %v562_v35 = vmul.f32 0.01, %v434_v62  ;;  %v827_v56 = vpop.xlane.xlu1 %826 }
  0xa5   :  { %v819_v38 = vmul.f32 %v2415_v21, %v2415_v21  ;;  %1388 = vrsqrt.f32 %v948_v34  ;;  %v951_v33 = vmax.f32 %v827_v56, 1e-24  ;;  %p1525_p3 = por %p1524_p2, %p1523_p1 }
  0xa6   :  { %v626_v29 = vsel %vm498_vm15, %v434_v62, %v562_v35  ;;  %v823_v59 = vpop.xlane.xlu0 %822 }
  0xa7   :  { %940 = vadd.xlane.f32.xlu0 %v816_v30  ;;  %v2424_v18 = vadd.f32 %v690_v25, %v626_v29  ;;  %1390 = vrsqrt.f32 %v951_v33  ;;  %v949_v0 = vmax.f32 %v823_v59, 1e-24  ;;  %p1526_p4 = pnand %p1525_p3, %p1519_p0 }
  0xa8   :  { %946 = vadd.xlane.f32.xlu1 %v819_v38  ;;  %v831_v36 = vpop.xlane.xlu1 %830 }
  0xa9   :  { %v818_v46 = vmul.f32 %v2424_v18, %v2424_v18  ;;  %1392 = vrsqrt.f32 %v949_v0  ;;  %v953_v7 = vmax.f32 %v831_v36, 1e-24 }
  0xaa   :  { %v829_v4 = vpop.xlane.xlu0 %828 }
  0xab   :  { %944 = vadd.xlane.f32.xlu0 %v818_v46  ;;  %1394 = vrsqrt.f32 %v953_v7  ;;  %v952_v54 = vmax.f32 %v829_v4, 1e-24 }
  0xac   :  { %v835_v42 = vpop.xlane.xlu1 %834 }
  0xad   :  { %v1387_v22 = vpop.eup %1386  ;;  %1396 = vrsqrt.f32 %v952_v54  ;;  %v955_v62 = vmax.f32 %v835_v42, 1e-24 }
  0xae   :  { %v1078_v34 = vmul.f32 %v1387_v22, %v1650_v52  ;;  %v833_v30 = vpop.xlane.xlu0 %832 }
  0xaf   :  { %v1389_v35 = vpop.eup %1388  ;;  %1398 = vrsqrt.f32 %v955_v62  ;;  %v954_v25 = vmax.f32 %v833_v30, 1e-24 }
  0xb0   :  { %1142 = vst [vmem:[#allocation2 + $0x10] sm:$0xff] %v1078_v34  ;;  %v1076_v56 = vmul.f32 %v1389_v35, %v1662_v61 }
  0xb1   :  { %v1391_v38 = vpop.eup %1390  ;;  %1400 = vrsqrt.f32 %v954_v25  ;;  %v839_v29 = vpop.xlane.xlu1 %838 }
  0xb2   :  { %1140 = vst [vmem:[#allocation2] sm:$0xff] %v1076_v56  ;;  %v1079_v33 = vmul.f32 %v1391_v38, %v1655_v57  ;;  %v957_v0 = vmax.f32 %v839_v29, 1e-24 }
  0xb3   :  { %v1393_v59 = vpop.eup %1392  ;;  %v837_v36 = vpop.xlane.xlu0 %836 }
  0xb4   :  { %1143 = vst [vmem:[#allocation2 + $0x18] sm:$0xff] %v1079_v33  ;;  %v1077_v46 = vmul.f32 %v1393_v59, %v1669_v2  ;;  %v956_v52 = vmax.f32 %v837_v36, 1e-24  ;;  %1402 = vrsqrt.f32 %v957_v0 }
  0xb5   :  { %v1395_v7 = vpop.eup %1394  ;;  %v843_v61 = vpop.xlane.xlu1 %842 }
  0xb6   :  { %1141 = vst [vmem:[#allocation2 + $0x8] sm:$0xff] %v1077_v46  ;;  %v1081_v4 = vmul.f32 %v1395_v7, %v1676_v8  ;;  %1404 = vrsqrt.f32 %v956_v52  ;;  %v959_v42 = vmax.f32 %v843_v61, 1e-24 }
  0xb7   :  { %v1397_v54 = vpop.eup %1396  ;;  %v841_v22 = vpop.xlane.xlu0 %840 }
  0xb8   :  { %1145 = vst [vmem:[#allocation2 + $0x28] sm:$0xff] %v1081_v4  ;;  %v1080_v57 = vmul.f32 %v1397_v54, %v1690_v20  ;;  %v958_v62 = vmax.f32 %v841_v22, 1e-24  ;;  %1406 = vrsqrt.f32 %v959_v42 }
  0xb9   :  { %v1399_v34 = vpop.eup %1398  ;;  %v847_v30 = vpop.xlane.xlu1 %846 }
  0xba   :  { %1144 = vst [vmem:[#allocation2 + $0x20] sm:$0xff] %v1080_v57  ;;  %v1083_v2 = vmul.f32 %v1399_v34, %v1700_v31  ;;  %1408 = vrsqrt.f32 %v958_v62  ;;  %v961_v25 = vmax.f32 %v847_v30, 1e-24 }
  0xbb   :  { %v1401_v35 = vpop.eup %1400  ;;  %v845_v56 = vpop.xlane.xlu0 %844 }
  0xbc   :  { %1147 = vst [vmem:[#allocation2 + $0x38] sm:$0xff] %v1083_v2  ;;  %v1082_v8 = vmul.f32 %v1401_v35, %v1718_v44  ;;  %v960_v38 = vmax.f32 %v845_v56, 1e-24  ;;  %1410 = vrsqrt.f32 %v961_v25 }
  0xbe   :  { %1146 = vst [vmem:[#allocation2 + $0x30] sm:$0xff] %v1082_v8  ;;  %1412 = vrsqrt.f32 %v960_v38  ;;  %v851_v33 = vpop.xlane.xlu1 %850  ;;  %v1403_v20 = vpop.eup %1402 }
  0xbf   :  { %v963_v29 = vmax.f32 %v851_v33, 1e-24  ;;  %v1085_v0 = vmul.f32 %v1403_v20, %v1745_v12 }
  0xc0   :  { %v1405_v59 = vpop.eup %1404 }
  0xc1   :  { %v1084_v31 = vmul.f32 %v1405_v59, %v1750_v16  ;;  %1414 = vrsqrt.f32 %v963_v29  ;;  %1149 = vst [vmem:[#allocation2 + $0x48] sm:$0xff] %v1085_v0 }
  0xc2   :  { %v1407_v36 = vpop.eup %1406 }
  0xc3   :  { %1148 = vst [vmem:[#allocation2 + $0x40] sm:$0xff] %v1084_v31  ;;  %v1087_v52 = vmul.f32 %v1407_v36, %v1763_v27 }
  0xc4   :  { %v1409_v46 = vpop.eup %1408  ;;  %v849_v44 = vpop.xlane.xlu0 %848 }
  0xc5   :  { %v1086_v7 = vmul.f32 %v1409_v46, %v1769_v32  ;;  %v962_v4 = vmax.f32 %v849_v44, 1e-24  ;;  %v855_v61 = vpop.xlane.xlu1 %854  ;;  %1151 = vst [vmem:[#allocation2 + $0x58] sm:$0xff] %v1087_v52 }
  0xc6   :  { %v965_v54 = vmax.f32 %v855_v61, 1e-24  ;;  %v1411_v42 = vpop.eup %1410 }
  0xc7   :  { %1150 = vst [vmem:[#allocation2 + $0x50] sm:$0xff] %v1086_v7  ;;  %1416 = vrsqrt.f32 %v962_v4  ;;  %v1089_v16 = vmul.f32 %v1411_v42, %v1776_v37 }
  0xc8   :  { %v1413_v12 = vpop.eup %1412  ;;  %1418 = vrsqrt.f32 %v965_v54  ;;  %v853_v22 = vpop.xlane.xlu0 %852 }
  0xc9   :  { %v1088_v57 = vmul.f32 %v1413_v12, %v1787_v48  ;;  %v964_v62 = vmax.f32 %v853_v22, 1e-24  ;;  %v859_v34 = vpop.xlane.xlu1 %858  ;;  %1153 = vst [vmem:[#allocation2 + $0x68] sm:$0xff] %v1089_v16 }
  0xca   :  { %v967_v27 = vmax.f32 %v859_v34, 1e-24 }
  0xcb   :  { %v1415_v2 = vpop.eup %1414  ;;  %1152 = vst [vmem:[#allocation2 + $0x60] sm:$0xff] %v1088_v57  ;;  %1420 = vrsqrt.f32 %v964_v62 }
  0xcc   :  { %v1091_v32 = vmul.f32 %v1415_v2, %v1807_v10  ;;  %1422 = vrsqrt.f32 %v967_v27  ;;  %v857_v30 = vpop.xlane.xlu0 %856 }
  0xcd   :  { %v966_v35 = vmax.f32 %v857_v30, 1e-24  ;;  %v863_v25 = vpop.xlane.xlu1 %862 }
  0xce   :  { %1155 = vst [vmem:[#allocation2 + $0x78] sm:$0xff] %v1091_v32  ;;  %v969_v56 = vmax.f32 %v863_v25, 1e-24 }
  0xcf   :  { %1424 = vrsqrt.f32 %v966_v35 }
  0xd0   :  { %1426 = vrsqrt.f32 %v969_v56  ;;  %v861_v37 = vpop.xlane.xlu0 %860 }
  0xd1   :  { %v1417_v8 = vpop.eup %1416  ;;  %v968_v48 = vmax.f32 %v861_v37, 1e-24 }
  0xd2   :  { %v1419_v38 = vpop.eup %1418  ;;  %v1090_v33 = vmul.f32 %v1417_v8, %v1835_v45 }
  0xd3   :  { %v1093_v20 = vmul.f32 %v1419_v38, %v1838_v50  ;;  %1428 = vrsqrt.f32 %v968_v48 }
  0xd4   :  { %1154 = vst [vmem:[#allocation2 + $0x70] sm:$0xff] %v1090_v33 }
  0xd5   :  { %v1421_v29 = vpop.eup %1420  ;;  %1157 = vst [vmem:[#allocation2 + $0x88] sm:$0xff] %v1093_v20 }
  0xd6   :  { %v1423_v10 = vpop.eup %1422  ;;  %v1092_v59 = vmul.f32 %v1421_v29, %v1840_v39 }
  0xd7   :  { %v1095_v0 = vmul.f32 %v1423_v10, %v1862_v5  ;;  %v867_v31 = vpop.xlane.xlu1 %866  ;;  %v865_v36 = vpop.xlane.xlu0 %864 }
  0xd8   :  { %1156 = vst [vmem:[#allocation2 + $0x80] sm:$0xff] %v1092_v59  ;;  %v971_v46 = vmax.f32 %v867_v31, 1e-24  ;;  %v970_v52 = vmax.f32 %v865_v36, 1e-24 }
  0xd9   :  { %v1425_v44 = vpop.eup %1424  ;;  %1159 = vst [vmem:[#allocation2 + $0x98] sm:$0xff] %v1095_v0 }
  0xda   :  { %v1427_v7 = vpop.eup %1426  ;;  %v1094_v45 = vmul.f32 %v1425_v44, %v1867_v13  ;;  %1430 = vrsqrt.f32 %v971_v46 }
  0xdb   :  { %v1097_v50 = vmul.f32 %v1427_v7, %v1877_v26  ;;  %1432 = vrsqrt.f32 %v970_v52  ;;  %v871_v4 = vpop.xlane.xlu1 %870  ;;  %v869_v61 = vpop.xlane.xlu0 %868 }
  0xdc   :  { %1158 = vst [vmem:[#allocation2 + $0x90] sm:$0xff] %v1094_v45  ;;  %v973_v39 = vmax.f32 %v871_v4, 1e-24  ;;  %v972_v54 = vmax.f32 %v869_v61, 1e-24 }
  0xdd   :  { %v1429_v5 = vpop.eup %1428  ;;  %1161 = vst [vmem:[#allocation2 + $0xa8] sm:$0xff] %v1097_v50 }
  0xde   :  { %v1096_v42 = vmul.f32 %v1429_v5, %v1893_v43  ;;  %1434 = vrsqrt.f32 %v973_v39 }
  0xdf   :  { %1436 = vrsqrt.f32 %v972_v54  ;;  %v875_v12 = vpop.xlane.xlu1 %874  ;;  %v873_v16 = vpop.xlane.xlu0 %872 }
  0xe0   :  { %1160 = vst [vmem:[#allocation2 + $0xa0] sm:$0xff] %v1096_v42  ;;  %v975_v22 = vmax.f32 %v875_v12, 1e-24  ;;  %v974_v13 = vmax.f32 %v873_v16, 1e-24 }
  0xe2   :  { %1438 = vrsqrt.f32 %v975_v22 }
  0xe3   :  { %1440 = vrsqrt.f32 %v974_v13  ;;  %v879_v26 = vpop.xlane.xlu1 %878 }
  0xe4   :  { %v1431_v57 = vpop.eup %1430  ;;  %v977_v62 = vmax.f32 %v879_v26, 1e-24 }
  0xe5   :  { %v1433_v34 = vpop.eup %1432  ;;  %v1099_v27 = vmul.f32 %v1431_v57, %v1933_v40 }
  0xe6   :  { %v1098_v2 = vmul.f32 %v1433_v34, %v1935_v41  ;;  %1442 = vrsqrt.f32 %v977_v62  ;;  %v877_v32 = vpop.xlane.xlu0 %876 }
  0xe7   :  { %1163 = vst [vmem:[#allocation2 + $0xb8] sm:$0xff] %v1099_v27  ;;  %v976_v43 = vmax.f32 %v877_v32, 1e-24 }
  0xe8   :  { %v1435_v30 = vpop.eup %1434  ;;  %1162 = vst [vmem:[#allocation2 + $0xb0] sm:$0xff] %v1098_v2  ;;  %v883_v35 = vpop.xlane.xlu1 %882 }
  0xe9   :  { %v1437_v25 = vpop.eup %1436  ;;  %v1101_v56 = vmul.f32 %v1435_v30, %v1937_v47  ;;  %1444 = vrsqrt.f32 %v976_v43  ;;  %v979_v37 = vmax.f32 %v883_v35, 1e-24  ;;  %v2547_v35 = vld [vmem:[#allocation5_spill] sm:$0xff] }
  0xea   :  { %v1100_v8 = vmul.f32 %v1437_v25, %v1939_v49  ;;  %v881_v48 = vpop.xlane.xlu0 %880 }
  0xeb   :  { %1165 = vst [vmem:[#allocation2 + $0xc8] sm:$0xff] %v1101_v56  ;;  %1446 = vrsqrt.f32 %v979_v37  ;;  %v978_v40 = vmax.f32 %v881_v48, 1e-24  ;;  %v2548_v37 = vld [vmem:[#allocation6_spill] sm:$0xff] }
  0xec   :  { %v1439_v38 = vpop.eup %1438  ;;  %1164 = vst [vmem:[#allocation2 + $0xc0] sm:$0xff] %v1100_v8  ;;  %v887_v41 = vpop.xlane.xlu1 %886 }
  0xed   :  { %v1441_v33 = vpop.eup %1440  ;;  %v1103_v20 = vmul.f32 %v1439_v38, %v1962_v6  ;;  %1448 = vrsqrt.f32 %v978_v40  ;;  %v981_v29 = vmax.f32 %v887_v41, 1e-24  ;;  %v2549_v41 = vld [vmem:[#allocation7_spill] sm:$0xff] }
  0xee   :  { %v1102_v10 = vmul.f32 %v1441_v33, %v1965_v17  ;;  %v885_v59 = vpop.xlane.xlu0 %884 }
  0xef   :  { %1167 = vst [vmem:[#allocation2 + $0xd8] sm:$0xff] %v1103_v20  ;;  %1450 = vrsqrt.f32 %v981_v29  ;;  %v980_v47 = vmax.f32 %v885_v59, 1e-24 }
  0xf0   :  { %v1443_v0 = vpop.eup %1442  ;;  %1166 = vst [vmem:[#allocation2 + $0xd0] sm:$0xff] %v1102_v10  ;;  %v891_v49 = vpop.xlane.xlu1 %890  ;;  %v2550_v10 = vld [vmem:[#allocation8_spill] sm:$0xff] }
  0xf1   :  { %v1105_v31 = vmul.f32 %v1443_v0, %v1986_v55  ;;  %1452 = vrsqrt.f32 %v980_v47  ;;  %v983_v36 = vmax.f32 %v891_v49, 1e-24  ;;  %v2551_v49 = vld [vmem:[#allocation9_spill] sm:$0xff] }
  0xf2   :  { %v889_v46 = vpop.xlane.xlu0 %888 }
  0xf3   :  { %v1445_v52 = vpop.eup %1444  ;;  %1169 = vst [vmem:[#allocation2 + $0xe8] sm:$0xff] %v1105_v31  ;;  %1454 = vrsqrt.f32 %v983_v36  ;;  %v982_v6 = vmax.f32 %v889_v46, 1e-24 }
  0xf4   :  { %v1104_v44 = vmul.f32 %v1445_v52, %v2009_v15 }
  0xf5   :  { %v1447_v7 = vpop.eup %1446  ;;  %1456 = vrsqrt.f32 %v982_v6  ;;  %v2552_v6 = vld [vmem:[#allocation10_spill] sm:$0xff] }
  0xf6   :  { %1168 = vst [vmem:[#allocation2 + $0xe0] sm:$0xff] %v1104_v44  ;;  %v1107_v17 = vmul.f32 %v1447_v7, %v2023_v53 }
  0xf7   :  { %v1449_v45 = vpop.eup %1448 }
  0xf8   :  { %1171 = vst [vmem:[#allocation2 + $0xf8] sm:$0xff] %v1107_v17  ;;  %v1106_v50 = vmul.f32 %v1449_v45, %v2028_v58  ;;  %v895_v4 = vpop.xlane.xlu1 %894  ;;  %v893_v55 = vpop.xlane.xlu0 %892 }
  0xf9   :  { %v1451_v61 = vpop.eup %1450  ;;  %v985_v39 = vmax.f32 %v895_v4, 1e-24  ;;  %v984_v54 = vmax.f32 %v893_v55, 1e-24 }
  0xfa   :  { %1170 = vst [vmem:[#allocation2 + $0xf0] sm:$0xff] %v1106_v50  ;;  %v1109_v5 = vmul.f32 %v1451_v61, %v2042_v23  ;;  %v2553_v50 = vld [vmem:[#allocation11_spill] sm:$0xff] }
  0xfb   :  { %v1453_v42 = vpop.eup %1452  ;;  %1458 = vrsqrt.f32 %v985_v39 }
  0xfc   :  { %1173 = vst [vmem:[#allocation2 + $0x108] sm:$0xff] %v1109_v5  ;;  %v1108_v15 = vmul.f32 %v1453_v42, %v2044_v24  ;;  %1460 = vrsqrt.f32 %v984_v54  ;;  %v899_v12 = vpop.xlane.xlu1 %898  ;;  %v2554_v42 = vld [vmem:[#allocation12_spill] sm:$0xff] }
  0xfd   :  { %v1455_v53 = vpop.eup %1454  ;;  %v987_v16 = vmax.f32 %v899_v12, 1e-24 }
  0xfe   :  { %1172 = vst [vmem:[#allocation2 + $0x100] sm:$0xff] %v1108_v15  ;;  %v1111_v58 = vmul.f32 %v1455_v53, %v2061_v51  ;;  %v897_v22 = vpop.xlane.xlu0 %896  ;;  %v2555_v53 = vld [vmem:[#allocation13_spill] sm:$0xff] }
  0xff   :  { %v1457_v13 = vpop.eup %1456  ;;  %1462 = vrsqrt.f32 %v987_v16  ;;  %v986_v26 = vmax.f32 %v897_v22, 1e-24 }
 0x100   :  { %1175 = vst [vmem:[#allocation2 + $0x118] sm:$0xff] %v1111_v58  ;;  %v1110_v57 = vmul.f32 %v1457_v13, %v2065_v60  ;;  %v903_v23 = vpop.xlane.xlu1 %902 }
 0x101   :  { %1464 = vrsqrt.f32 %v986_v26  ;;  %v989_v62 = vmax.f32 %v903_v23, 1e-24 }
 0x102   :  { %1174 = vst [vmem:[#allocation2 + $0x110] sm:$0xff] %v1110_v57  ;;  %v901_v34 = vpop.xlane.xlu0 %900  ;;  %v2556_v57 = vld [vmem:[#allocation14_spill] sm:$0xff] }
 0x103   :  { %1466 = vrsqrt.f32 %v989_v62  ;;  %v988_v24 = vmax.f32 %v901_v34, 1e-24 }
 0x104   :  { %v907_v27 = vpop.xlane.xlu1 %906 }
 0x105   :  { %v1459_v2 = vpop.eup %1458  ;;  %1468 = vrsqrt.f32 %v988_v24  ;;  %v991_v32 = vmax.f32 %v907_v27, 1e-24  ;;  %v2557_v24 = vld [vmem:[#allocation15_spill] sm:$0xff] }
 0x106   :  { %v1461_v43 = vpop.eup %1460  ;;  %v1113_v51 = vmul.f32 %v1459_v2, %v2098_v9  ;;  %v905_v30 = vpop.xlane.xlu0 %904 }
 0x107   :  { %v1112_v25 = vmul.f32 %v1461_v43, %v2547_v35  ;;  %1470 = vrsqrt.f32 %v991_v32  ;;  %v990_v56 = vmax.f32 %v905_v30, 1e-24 }
 0x108   :  { %1177 = vst [vmem:[#allocation2 + $0x128] sm:$0xff] %v1113_v51  ;;  %v2558_v51 = vld [vmem:[#allocation16_spill] sm:$0xff] }
 0x109   :  { %v1463_v60 = vpop.eup %1462  ;;  %1176 = vst [vmem:[#allocation2 + $0x120] sm:$0xff] %v1112_v25  ;;  %1472 = vrsqrt.f32 %v990_v56 }
 0x10a   :  { %v1115_v8 = vmul.f32 %v1463_v60, %v2548_v37  ;;  %v2559_v37 = vld [vmem:[#allocation17_spill] sm:$0xff] }
 0x10b   :  { %v1465_v48 = vpop.eup %1464  ;;  %v911_v40 = vpop.xlane.xlu1 %910 }
 0x10c   :  { %v909_v38 = vpop.xlane.xlu0 %908  ;;  %1179 = vst [vmem:[#allocation2 + $0x138] sm:$0xff] %v1115_v8  ;;  %v1114_v33 = vmul.f32 %v1465_v48, %v2549_v41  ;;  %v993_v20 = vmax.f32 %v911_v40, 1e-24 }
 0x10d   :  { %v992_v29 = vmax.f32 %v909_v38, 1e-24  ;;  %v1467_v9 = vpop.eup %1466 }
 0x10e   :  { %1178 = vst [vmem:[#allocation2 + $0x130] sm:$0xff] %v1114_v33  ;;  %v1117_v59 = vmul.f32 %v1467_v9, %v2550_v10  ;;  %1474 = vrsqrt.f32 %v993_v20  ;;  %v2560_v20 = vld [vmem:[#allocation18_spill] sm:$0xff]  ;;  %v2561_v10 = vld [vmem:[#allocation19_spill] sm:$0xff] }
 0x10f   :  { %v1469_v47 = vpop.eup %1468  ;;  %1476 = vrsqrt.f32 %v992_v29  ;;  %v915_v0 = vpop.xlane.xlu1 %914 }
 0x110   :  { %1181 = vst [vmem:[#allocation2 + $0x148] sm:$0xff] %v1117_v59  ;;  %v1116_v31 = vmul.f32 %v1469_v47, %v2551_v49  ;;  %v995_v36 = vmax.f32 %v915_v0, 1e-24  ;;  %v2562_v49 = vld [vmem:[#allocation20_spill] sm:$0xff] }
 0x111   :  { %v1471_v46 = vpop.eup %1470  ;;  %v913_v52 = vpop.xlane.xlu0 %912 }
 0x112   :  { %1180 = vst [vmem:[#allocation2 + $0x140] sm:$0xff] %v1116_v31  ;;  %v1119_v44 = vmul.f32 %v1471_v46, %v2552_v6  ;;  %1478 = vrsqrt.f32 %v995_v36  ;;  %v994_v7 = vmax.f32 %v913_v52, 1e-24  ;;  %v2563_v6 = vld [vmem:[#allocation21_spill] sm:$0xff] }
 0x113   :  { %v1473_v17 = vpop.eup %1472 }
 0x114   :  { %v919_v45 = vpop.xlane.xlu1 %918  ;;  %1183 = vst [vmem:[#allocation2 + $0x158] sm:$0xff] %v1119_v44  ;;  %v1118_v4 = vmul.f32 %v1473_v17, %v2553_v50  ;;  %1480 = vrsqrt.f32 %v994_v7 }
 0x115   :  { %v997_v55 = vmax.f32 %v919_v45, 1e-24  ;;  %v2564_v45 = vld [vmem:[#allocation22_spill] sm:$0xff] }
 0x116   :  { %1182 = vst [vmem:[#allocation2 + $0x150] sm:$0xff] %v1118_v4  ;;  %v917_v61 = vpop.xlane.xlu0 %916 }
 0x117   :  { %1482 = vrsqrt.f32 %v997_v55  ;;  %v996_v39 = vmax.f32 %v917_v61, 1e-24 }
 0x118   :  { %v1475_v54 = vpop.eup %1474 }
 0x119   :  { %v1477_v5 = vpop.eup %1476  ;;  %v1121_v15 = vmul.f32 %v1475_v54, %v2554_v42  ;;  %1484 = vrsqrt.f32 %v996_v39  ;;  %v923_v12 = vpop.xlane.xlu1 %922 }
 0x11a   :  { %v1120_v16 = vmul.f32 %v1477_v5, %v2555_v53  ;;  %v999_v58 = vmax.f32 %v923_v12, 1e-24  ;;  %v921_v22 = vpop.xlane.xlu0 %920 }
 0x11b   :  { %1185 = vst [vmem:[#allocation2 + $0x168] sm:$0xff] %v1121_v15  ;;  %v998_v13 = vmax.f32 %v921_v22, 1e-24 }
 0x11c   :  { %v1479_v26 = vpop.eup %1478  ;;  %1184 = vst [vmem:[#allocation2 + $0x160] sm:$0xff] %v1120_v16  ;;  %1486 = vrsqrt.f32 %v999_v58 }
 0x11d   :  { %v1123_v23 = vmul.f32 %v1479_v26, %v2556_v57  ;;  %1488 = vrsqrt.f32 %v998_v13 }
 0x11e   :  { %v1481_v62 = vpop.eup %1480  ;;  %v927_v34 = vpop.xlane.xlu1 %926 }
 0x11f   :  { %1187 = vst [vmem:[#allocation2 + $0x178] sm:$0xff] %v1123_v23  ;;  %v1122_v27 = vmul.f32 %v1481_v62, %v2557_v24  ;;  %v1001_v2 = vmax.f32 %v927_v34, 1e-24 }
 0x120   :  { %v925_v43 = vpop.xlane.xlu0 %924 }
 0x121   :  { %v1483_v32 = vpop.eup %1482  ;;  %1186 = vst [vmem:[#allocation2 + $0x170] sm:$0xff] %v1122_v27  ;;  %1490 = vrsqrt.f32 %v1001_v2  ;;  %v1000_v35 = vmax.f32 %v925_v43, 1e-24 }
 0x122   :  { %v1125_v30 = vmul.f32 %v1483_v32, %v2558_v51  ;;  %v931_v25 = vpop.xlane.xlu1 %930 }
 0x123   :  { %v1485_v56 = vpop.eup %1484  ;;  %1492 = vrsqrt.f32 %v1000_v35  ;;  %v1003_v60 = vmax.f32 %v931_v25, 1e-24 }
 0x124   :  { %1189 = vst [vmem:[#allocation2 + $0x188] sm:$0xff] %v1125_v30  ;;  %v1124_v8 = vmul.f32 %v1485_v56, %v2559_v37  ;;  %v929_v48 = vpop.xlane.xlu0 %928 }
 0x125   :  { %1494 = vrsqrt.f32 %v1003_v60  ;;  %v1002_v40 = vmax.f32 %v929_v48, 1e-24 }
 0x126   :  { %v1487_v38 = vpop.eup %1486  ;;  %1188 = vst [vmem:[#allocation2 + $0x180] sm:$0xff] %v1124_v8  ;;  %v935_v41 = vpop.xlane.xlu1 %934 }
 0x127   :  { %v1489_v33 = vpop.eup %1488  ;;  %v1127_v29 = vmul.f32 %v1487_v38, %v2560_v20  ;;  %1496 = vrsqrt.f32 %v1002_v40  ;;  %v1005_v9 = vmax.f32 %v935_v41, 1e-24 }
 0x128   :  { %v1126_v59 = vmul.f32 %v1489_v33, %v2561_v10 }
 0x129   :  { %1191 = vst [vmem:[#allocation2 + $0x198] sm:$0xff] %v1127_v29  ;;  %1498 = vrsqrt.f32 %v1005_v9 }
 0x12a   :  { %1190 = vst [vmem:[#allocation2 + $0x190] sm:$0xff] %v1126_v59 }
 0x12b   :  { %v1491_v47 = vpop.eup %1490  ;;  %v933_v0 = vpop.xlane.xlu0 %932 }
 0x12c   :  { %v1129_v31 = vmul.f32 %v1491_v47, %v2562_v49  ;;  %v1004_v36 = vmax.f32 %v933_v0, 1e-24 }
 0x12d   :  { %v1493_v46 = vpop.eup %1492  ;;  %v939_v52 = vpop.xlane.xlu1 %938 }
 0x12e   :  { %1193 = vst [vmem:[#allocation2 + $0x1a8] sm:$0xff] %v1129_v31  ;;  %v1128_v44 = vmul.f32 %v1493_v46, %v2563_v6  ;;  %1500 = vrsqrt.f32 %v1004_v36  ;;  %v1007_v7 = vmax.f32 %v939_v52, 1e-24 }
 0x12f   :  { %v1495_v17 = vpop.eup %1494 }
 0x130   :  { %1192 = vst [vmem:[#allocation2 + $0x1a0] sm:$0xff] %v1128_v44  ;;  %v1131_v50 = vmul.f32 %v1495_v17, %v2564_v45  ;;  %1502 = vrsqrt.f32 %v1007_v7  ;;  %v937_v4 = vpop.xlane.xlu0 %936 }
 0x131   :  { %v1497_v55 = vpop.eup %1496  ;;  %v1006_v61 = vmax.f32 %v937_v4, 1e-24  ;;  %v943_v39 = vpop.xlane.xlu1 %942 }
 0x132   :  { %1195 = vst [vmem:[#allocation2 + $0x1b8] sm:$0xff] %v1131_v50  ;;  %v1130_v54 = vmul.f32 %v1497_v55, %v2346_v3  ;;  %v1009_v5 = vmax.f32 %v943_v39, 1e-24 }
 0x133   :  { %v1499_v42 = vpop.eup %1498  ;;  %1504 = vrsqrt.f32 %v1006_v61 }
 0x134   :  { %1194 = vst [vmem:[#allocation2 + $0x1b0] sm:$0xff] %v1130_v54  ;;  %v1133_v15 = vmul.f32 %v1499_v42, %v2354_v1  ;;  %1506 = vrsqrt.f32 %v1009_v5  ;;  %v941_v12 = vpop.xlane.xlu0 %940 }
 0x135   :  { %v1008_v53 = vmax.f32 %v941_v12, 1e-24  ;;  %v947_v16 = vpop.xlane.xlu1 %946 }
 0x136   :  { %1197 = vst [vmem:[#allocation2 + $0x1c8] sm:$0xff] %v1133_v15  ;;  %v1011_v58 = vmax.f32 %v947_v16, 1e-24 }
 0x137   :  { %1508 = vrsqrt.f32 %v1008_v53 }
 0x138   :  { %v1501_v22 = vpop.eup %1500  ;;  %1510 = vrsqrt.f32 %v1011_v58  ;;  %v945_v13 = vpop.xlane.xlu0 %944 }
 0x139   :  { %v1132_v26 = vmul.f32 %v1501_v22, %v2375_v19  ;;  %v1010_v57 = vmax.f32 %v945_v13, 1e-24 }
 0x13a   :  { %v1503_v3 = vpop.eup %1502 }
 0x13b   :  { %1196 = vst [vmem:[#allocation2 + $0x1c0] sm:$0xff] %v1132_v26  ;;  %v1135_v23 = vmul.f32 %v1503_v3, %v2384_v28  ;;  %1512 = vrsqrt.f32 %v1010_v57 }
 0x13d   :  { %v1505_v62 = vpop.eup %1504  ;;  %1199 = vst [vmem:[#allocation2 + $0x1d8] sm:$0xff] %v1135_v23 }
 0x13e   :  { %v1507_v1 = vpop.eup %1506  ;;  %v1134_v34 = vmul.f32 %v1505_v62, %v2397_v63 }
 0x13f   :  { %v1137_v24 = vmul.f32 %v1507_v1, %v2402_v14 }
 0x140   :  { %1198 = vst [vmem:[#allocation2 + $0x1d0] sm:$0xff] %v1134_v34 }
 0x141   :  { %v1509_v27 = vpop.eup %1508  ;;  %1201 = vst [vmem:[#allocation2 + $0x1e8] sm:$0xff] %v1137_v24 }
 0x142   :  { %v1511_v2 = vpop.eup %1510  ;;  %v1136_v32 = vmul.f32 %v1509_v27, %v2412_v11 }
 0x143   :  { %v1139_v19 = vmul.f32 %v1511_v2, %v2415_v21 }
 0x144   :  { %1200 = vst [vmem:[#allocation2 + $0x1e0] sm:$0xff] %v1136_v32 }
 0x145   :  { %v1513_v28 = vpop.eup %1512  ;;  %1203 = vst [vmem:[#allocation2 + $0x1f8] sm:$0xff] %v1139_v19 }
 0x146   :  { %v1138_v43 = vmul.f32 %v1513_v28, %v2424_v18 }
 0x148   :  { %1202 = vst [vmem:[#allocation2 + $0x1f0] sm:$0xff] %v1138_v43 }
 0x149   :  { %1529 = shalt.err (!%p1526_p4)
}
 0x14a   :  { %s1530_s28 = scalar_lea.hbm %s2510_s6, 8192 }
 0x14b   :  { %p1531_p5 = scmp.ne.s32.totalorder %s2510_s6, %s1530_s28  ;;  %p1534_p6 = scmp.lt.u32.totalorder %s1530_s28, %s2510_s6 }
 0x14d   :  { %p1536_p7 = pnand %p1534_p6, %p1531_p5 }
 0x14f   :  { %1539 = shalt.err (!%p1536_p7)
}
 0x150   :  { %s1543_s9 = smov 128   ;;  %s1544_s10 = smov 8  }
 0x151   :  { %1215 = dma.vmem_to_hbm [thread:$0]  %s1210_s26, 8192, %s2510_s6, [#allocation3], %s1543_s9, %s1543_s9, %s1544_s10  }
 0x152   :  { %1540 = dma.done.wait [#allocation3], 8192  }
 0x153   :  { %1541 = vsyncadd [#allocation3], 4294959104 }
 0x154   :  { %1219 = vsyncpa [#allocation3], 1 }

// kernel: conv_layer_forward.2
= control target key start
LH: loop header
LB: loop body
LE: loop exit
PB: predicated region body
PF: predicated region fallthrough
CT: control target
= control target key end

     0   :  { %s3268_s0 = inlined_call_operand.hbm [shape: bf16[512,512], index: 0, kind: input, shape index: {}]   ;;  %s3269_s1 = inlined_call_operand.vmem [shape: bf16[512,128], index: 1, kind: input, shape index: {}, may-alias: {1,2}]   ;;  %s3270_s2 = inlined_call_operand.vmem [shape: bf16[512,128], index: 2, kind: input, shape index: {}, may-alias: {1,2}]   ;;  %s3271_s3 = inlined_call_operand.vmem [shape: bf16[256,128], index: 3, kind: input, shape index: {}]   ;;  %s3272_s4 = inlined_call_operand.vmem [shape: f32[1,128], index: 4, kind: input, shape index: {}]   ;;  %s3273_s5 = inlined_call_operand.vmem [shape: bf16[512,128], index: 5, kind: output, shape index: {0}]   ;;  %s3274_s6 = inlined_call_operand.vmem [shape: f32[2,1,128], index: 6, kind: output, shape index: {1}]   ;;  %s3275_s7 = inlined_call_operand.vmem [shape: f32[2,1,128], index: 7, kind: output, shape index: {2}]  }
   0x1   :  { %3278 = sst [smem:[#allocation8_spill]] %s3271_s3 }
   0x2   :  { %3279 = sst [smem:[#allocation9_spill]] %s3272_s4 }
   0x3   :  { %3280 = sst [smem:[#allocation10_spill]] %s3275_s7 }
   0x4   :  { %13 = vsyncpa [#allocation5], 0 }
   0x5   :  { %15 = vsyncpa [#allocation5 + $0x1], 0  ;;  %s2790_s24 = smov 0   ;;  %s2792_s25 = smov 0  }
   0x6   :  { %s2794_s26 = smov 0   ;;  %s2796_s27 = smov 0  }
   0x7   :  { %s2798_s28 = smov 0   ;;  %s2800_s29 = smov 0  }
   0x8   :  { %s2802_s30 = smov 0   ;;  %s2804_s8 = smov 0  }
   0x9 LB: > { %s1958_s9 = sadd.s32 4294967295, %s2743_s8   ;;  %s30_s10 = sadd.s32 1, %s2735_s29  ;;  %s2743_s8 = sphi %s2804_s8, %s21_s8   ;;  %s2739_s30 = sphi %s2802_s30, %s3296_s30   ;;  %s2735_s29 = sphi %s2800_s29, %s3295_s29   ;;  %s2731_s28 = sphi %s2798_s28, %s3294_s28   ;;  %s2727_s27 = sphi %s2796_s27, %s3293_s27   ;;  %s2723_s26 = sphi %s2794_s26, %s3292_s26   ;;  %s2719_s25 = sphi %s2792_s25, %s3291_s25   ;;  %s2715_s24 = sphi %s2790_s24, %s3290_s24  }
   0xa   : > { %p31_p0 = scmp.ge.s32.totalorder %s30_s10, 2  ;;  %s33_s11 = sadd.s32 1, %s2739_s30 }
   0xb   : > { %s42_s12 = sadd.s32 1, %s2723_s26  ;;  %p49_p1 = scmp.ne.s32.totalorder %s2723_s26, %s2719_s25 }
   0xc   : > { %s3298_s10 = smov (%p31_p0, %s30_s10), 0  ;;  %s3300_s11 = smov (!%p31_p0, %s33_s11), %s2739_s30 }
   0xd   : > { %3281 = sst [smem:[#allocation7_spill]] %s3298_s10  ;;  %s38_s13 = ssub.s32 %s2735_s29, %s3298_s10 }
   0xe   : > { %p50_p2 = scmp.eq.s32.totalorder %s2743_s8, 0  ;;  %p35_p3 = scmp.ge.s32.totalorder %s3300_s11, 2 }
   0xf   : > { %p55_p4 = scmp.ne.s32.totalorder %s2719_s25, %s2715_s24  ;;  %p56_p6 = scmp.eq.s32.totalorder %s1958_s9, 0 }
  0x10   : > { %p2841_p5 = por %p50_p2, %p49_p1  ;;  %s3302_s11 = smov (%p35_p3, %s3300_s11), 0 }
  0x11   : > { %p2847_p7 = por %p56_p6, %p55_p4  ;;  %s37_s16 = ssub.s32 %s2739_s30, %s3302_s11 }
  0x12   : > { %p2482_p8 = scmp.lt.s32.totalorder %s2743_s8, 4  ;;  %s39_s17 = sor.u32 %s38_s13, %s37_s16 }
  0x13   : > { %s257_s18 = sand.u32 1, %s2723_s26   ;;  %p40_p9 = scmp.eq.s32.totalorder %s39_s17, 0 }
  0x14   : > { %s1962_s19 = sshll.u32 %s257_s18, 8  ;;  %s1964_s20 = sshll.u32 %s2735_s29, 1 }
  0x15   : > { %s2857_s21 = scalar_select %p40_p9, %s2723_s26, %s42_s12  }
  0x16   : > { %s2092_s22 = sshll.u32 %s2739_s30, 7  ;;  %s261_s24 = scalar_lea.vmem [#allocation4], %s1962_s19 }
  0x17   : > { %s268_s23 = sadd.s32 %s2092_s22, %s1964_s20  ;;  %s271_s9 = sshll.u32 %s261_s24, 4  ;;  %s2860_s9 = int_to_ptr.vmem [resolvable:$true] %s271_s9 }
  0x18   : > { %s1966_s10 = sshll.u32 %s268_s23, 6  ;;  %p2871_p10 = pnand %p2482_p8, %p2841_p5 }
  0x19   : > { %s2865_s7 = scalar_lea.hbm %s3268_s0, %s1966_s10  ;;  %s2875_s13 = scalar_lea.sflag [#allocation5], %s257_s18 }
  0x1a   : > { %s2647_s16 = scalar_lea.hbm %s2865_s7, 4096  ;;  %p2649_p12 = pneg %p2871_p10 }
  0x1b   : > { %p2648_p11 = scmp.ne.s32.totalorder %s2865_s7, %s2647_s16  ;;  %s2652_s10 = scalar_lea.hbm %s3268_s0, 16384 }
  0x1c   : > { %p2653_p1 = scmp.lt.u32.totalorder %s2865_s7, %s3268_s0  ;;  %p2654_p2 = scmp.lt.u32.totalorder %s2652_s10, %s2647_s16 }
  0x1d   : > { %p2650_p13 = pnand %p2649_p12, %p2648_p11  ;;  %p2656_p4 = scmp.lt.u32.totalorder %s2647_s16, %s2865_s7 }
  0x1e   : > { %p2655_p3 = por %p2654_p2, %p2653_p1 }
  0x1f   : > { %p2651_p0 = pneg %p2650_p13 }
  0x20   : > { %p2657_p5 = por %p2656_p4, %p2655_p3 }
  0x22   : > { %p2658_p6 = pnand %p2657_p5, %p2651_p0 }
  0x24   : > { %2661 = shalt.err (!%p2658_p6)
}
  0x25   : > { %s2662_s18 = scalar_lea.vmem %s2860_s9, 4096  ;;  %s2745_s19 = smov [#allocation4]  }
  0x26   : > { %p2663_p8 = scmp.ne.s32.totalorder %s2860_s9, %s2662_s18  ;;  %s2667_s20 = sshll.u32 %s2745_s19, 4  ;;  %s2668_s20 = int_to_ptr.vmem [resolvable:$false] %s2667_s20 }
  0x27   : > { %s2669_s22 = scalar_lea.vmem %s2668_s20, 8192  ;;  %p2670_p13 = scmp.lt.s32.totalorder %s2860_s9, %s2668_s20 }
  0x28   : > { %p2665_p9 = pnand %p2663_p8, %p2649_p12  ;;  %p2671_p1 = scmp.lt.s32.totalorder %s2669_s22, %s2662_s18 }
  0x2a   : > { %p2666_p11 = pneg %p2665_p9  ;;  %p2672_p2 = por %p2671_p1, %p2670_p13 }
  0x2c   : > { %p2673_p3 = pnand %p2672_p2, %p2666_p11 }
  0x2e   : > { %2676 = shalt.err (!%p2673_p3)
}
  0x2f   : > { %s2746_s23 = smov 256   ;;  %s2747_s24 = smov 128  }
  0x30   : > { %s2748_s16 = smov 8   ;;  %p1967_p12 = scmp.ge.s32.totalorder %s2743_s8, 1 }
  0x31   : > { %2481 = dma.hbm_to_vmem [thread:$0]  (!%p2871_p10), %s2865_s7, 4096, %s2860_s9, %s2875_s13, %s2746_s23, %s2747_s24, %s2748_s16  }
  0x32   : > { %p297_p0 = scmp.lt.s32.totalorder %s2743_s8, 5 }
  0x34   : > { %p298_p4 = pnand %p1967_p12, %p297_p0 }
  0x35   : > { %s303_s3 = sand.u32 (!%p298_p4), 1, %s2719_s25  }
  0x36   : > { %301 = sbr.rel (%p298_p4) target bundleno = 730 (0x2da), region = 40  ;;  %s1968_s4 = sshll.u32 (!%p298_p4), %s303_s3, 8 }
  0x37   : > { %s304_s10 = scalar_lea.sflag (!%p298_p4), [#allocation5], %s303_s3  ;;  %s2906_s14 = scalar_lea.vmem (!%p298_p4), [#allocation4], %s1968_s4 }
  0x3d   : > { %2710 = dma.done.wait (%p2847_p7), %s304_s10, 4096  }
  0x3e   : > { %2712 = vsyncadd (%p2847_p7), %s304_s10, 4294963200  ;;  %s1969_s7 = sshll.u32 %s2727_s27, 5  ;;  %s1971_s9 = sshll.u32 %s2731_s28, 5 }
  0x3f   : > { %p357_p10 = scmp.lt.s32.totalorder %s1969_s7, 63  ;;  %p363_p5 = scmp.lt.s32.totalorder %s1971_s9, 63 }
  0x40   : > { %p374_p6 = scmp.lt.s32.totalorder %s2731_s28, 1  ;;  %p1975_p7 = scmp.ne.s32.totalorder %s2727_s27, 0 }
  0x41   : > { %s3304_s7 = smov (!%p357_p10, %s1969_s7), 63  ;;  %s3306_s9 = smov (!%p363_p5, %s1971_s9), 63 }
  0x42   : > { %s1970_s12 = sshll.u32 %s3304_s7, 2  ;;  %s1972_s19 = sshll.u32 %s3306_s9, 2  ;;  %v2749_v1 = vmov (!%p1975_p7), 0.0  }
  0x43   : > { %s2918_s18 = scalar_lea.vmem %s3269_s1, %s1970_s12  ;;  %s2923_s22 = scalar_lea.vmem %s3270_s2, %s1972_s19  ;;  %385 = vst [vmem:[#allocation2] sm:$0xff] (!%p1975_p7), %v2749_v1  ;;  %386 = vst [vmem:[#allocation2 + $0x8] sm:$0xff] (!%p1975_p7), %v2749_v1 }
  0x44   : > { %s2928_s16 = scalar_lea.vmem %s3273_s5, %s1972_s19  ;;  %s3308_s28 = smov (!%p374_p6, %s2731_s28), 1  ;;  %v2551_v0 = vld [vmem:[%s2923_s22] sm:$0xff] (!%p1975_p7)   ;;  %387 = vst [vmem:[#allocation2 + $0x10] sm:$0xff] (!%p1975_p7), %v2749_v1  ;;  %388 = vst [vmem:[#allocation2 + $0x18] sm:$0xff] (!%p1975_p7), %v2749_v1  ;;  %v2552_v2 = vld [vmem:[%s2923_s22 + $0x8] sm:$0xff] (!%p1975_p7)  }
  0x45   : > { %s376_s10 = scalar_lea.vmem %s3274_s6, %s3308_s28  ;;  %s3285_s12 = sld [smem:[#allocation10_spill]]  ;;  %389 = vst [vmem:[#allocation2 + $0x20] sm:$0xff] (!%p1975_p7), %v2749_v1  ;;  %390 = vst [vmem:[#allocation2 + $0x28] sm:$0xff] (!%p1975_p7), %v2749_v1  ;;  %v2553_v3 = vld [vmem:[%s2923_s22 + $0x10] sm:$0xff] (!%p1975_p7)   ;;  %v2554_v4 = vld [vmem:[%s2923_s22 + $0x18] sm:$0xff] (!%p1975_p7)  }
  0x46   : > { %384 = sbr.rel (%p1975_p7) target bundleno = 91 (0x5b), region = 48  ;;  %391 = vst [vmem:[#allocation2 + $0x30] sm:$0xff] (!%p1975_p7), %v2749_v1  ;;  %392 = vst [vmem:[#allocation2 + $0x38] sm:$0xff] (!%p1975_p7), %v2749_v1  ;;  %v2555_v5 = vld [vmem:[%s2923_s22 + $0x20] sm:$0xff] (!%p1975_p7)   ;;  %v2556_v6 = vld [vmem:[%s2923_s22 + $0x28] sm:$0xff] (!%p1975_p7)  }
  0x47   : > { %393 = vst [vmem:[#allocation2 + $0x40] sm:$0xff] (!%p1975_p7), %v2749_v1  ;;  %394 = vst [vmem:[#allocation2 + $0x48] sm:$0xff] (!%p1975_p7), %v2749_v1  ;;  %v2557_v7 = vld [vmem:[%s2923_s22 + $0x30] sm:$0xff] (!%p1975_p7)   ;;  %v2558_v8 = vld [vmem:[%s2923_s22 + $0x38] sm:$0xff] (!%p1975_p7)  }
  0x48   : > { %395 = vst [vmem:[#allocation2 + $0x50] sm:$0xff] (!%p1975_p7), %v2749_v1  ;;  %396 = vst [vmem:[#allocation2 + $0x58] sm:$0xff] (!%p1975_p7), %v2749_v1  ;;  %v2559_v9 = vld [vmem:[%s2923_s22 + $0x40] sm:$0xff] (!%p1975_p7)   ;;  %v2560_v10 = vld [vmem:[%s2923_s22 + $0x48] sm:$0xff] (!%p1975_p7)  }
  0x49   : > { %397 = vst [vmem:[#allocation2 + $0x60] sm:$0xff] (!%p1975_p7), %v2749_v1  ;;  %398 = vst [vmem:[#allocation2 + $0x68] sm:$0xff] (!%p1975_p7), %v2749_v1  ;;  %v2561_v11 = vld [vmem:[%s2923_s22 + $0x50] sm:$0xff] (!%p1975_p7)   ;;  %v2562_v12 = vld [vmem:[%s2923_s22 + $0x58] sm:$0xff] (!%p1975_p7)  }
  0x4a   : > { %399 = vst [vmem:[#allocation2 + $0x70] sm:$0xff] (!%p1975_p7), %v2749_v1  ;;  %400 = vst [vmem:[#allocation2 + $0x78] sm:$0xff] (!%p1975_p7), %v2749_v1  ;;  %v2563_v13 = vld [vmem:[%s2923_s22 + $0x60] sm:$0xff] (!%p1975_p7)   ;;  %v2564_v14 = vld [vmem:[%s2923_s22 + $0x68] sm:$0xff] (!%p1975_p7)  }
  0x4b   : > { %s379_s13 = scalar_lea.vmem %s3285_s12, %s3308_s28  ;;  %401 = vst [vmem:[#allocation2 + $0x80] sm:$0xff] (!%p1975_p7), %v2749_v1  ;;  %402 = vst [vmem:[#allocation2 + $0x88] sm:$0xff] (!%p1975_p7), %v2749_v1  ;;  %v2565_v15 = vld [vmem:[%s2923_s22 + $0x70] sm:$0xff] (!%p1975_p7)   ;;  %v2566_v16 = vld [vmem:[%s2923_s22 + $0x78] sm:$0xff] (!%p1975_p7)  }
  0x4c   : > { %403 = vst [vmem:[#allocation2 + $0x90] sm:$0xff] (!%p1975_p7), %v2749_v1  ;;  %404 = vst [vmem:[#allocation2 + $0x98] sm:$0xff] (!%p1975_p7), %v2749_v1 }
  0x4d   : > { %405 = vst [vmem:[#allocation2 + $0xa0] sm:$0xff] %v2749_v1  ;;  %406 = vst [vmem:[#allocation2 + $0xa8] sm:$0xff] %v2749_v1 }
  0x4e   : > { %407 = vst [vmem:[#allocation2 + $0xb0] sm:$0xff] %v2749_v1  ;;  %408 = vst [vmem:[#allocation2 + $0xb8] sm:$0xff] %v2749_v1 }
  0x4f   : > { %409 = vst [vmem:[#allocation2 + $0xc0] sm:$0xff] %v2749_v1  ;;  %410 = vst [vmem:[#allocation2 + $0xc8] sm:$0xff] %v2749_v1 }
  0x50   : > { %411 = vst [vmem:[#allocation2 + $0xd0] sm:$0xff] %v2749_v1  ;;  %412 = vst [vmem:[#allocation2 + $0xd8] sm:$0xff] %v2749_v1 }
  0x51   : > { %413 = vst [vmem:[#allocation2 + $0xe0] sm:$0xff] %v2749_v1  ;;  %414 = vst [vmem:[#allocation2 + $0xe8] sm:$0xff] %v2749_v1 }
  0x52   : > { %415 = vst [vmem:[#allocation2 + $0xf0] sm:$0xff] %v2749_v1  ;;  %416 = vst [vmem:[#allocation2 + $0xf8] sm:$0xff] %v2749_v1 }
  0x53   : > { %545 = vst [vmem:[#allocation3] sm:$0xff] %v2551_v0  ;;  %546 = vst [vmem:[#allocation3 + $0x10] sm:$0xff] %v2552_v2 }
  0x54   : > { %547 = vst [vmem:[#allocation3 + $0x20] sm:$0xff] %v2553_v3  ;;  %548 = vst [vmem:[#allocation3 + $0x30] sm:$0xff] %v2554_v4 }
  0x55   : > { %549 = vst [vmem:[#allocation3 + $0x40] sm:$0xff] %v2555_v5  ;;  %550 = vst [vmem:[#allocation3 + $0x50] sm:$0xff] %v2556_v6 }
  0x56   : > { %551 = vst [vmem:[#allocation3 + $0x60] sm:$0xff] %v2557_v7  ;;  %552 = vst [vmem:[#allocation3 + $0x70] sm:$0xff] %v2558_v8 }
  0x57   : > { %553 = vst [vmem:[#allocation3 + $0x80] sm:$0xff] %v2559_v9  ;;  %554 = vst [vmem:[#allocation3 + $0x90] sm:$0xff] %v2560_v10 }
  0x58   : > { %555 = vst [vmem:[#allocation3 + $0xa0] sm:$0xff] %v2561_v11  ;;  %556 = vst [vmem:[#allocation3 + $0xb0] sm:$0xff] %v2562_v12 }
  0x59   : > { %557 = vst [vmem:[#allocation3 + $0xc0] sm:$0xff] %v2563_v13  ;;  %558 = vst [vmem:[#allocation3 + $0xd0] sm:$0xff] %v2564_v14 }
  0x5a   : > { %559 = vst [vmem:[#allocation3 + $0xe0] sm:$0xff] %v2565_v15  ;;  %560 = vst [vmem:[#allocation3 + $0xf0] sm:$0xff] %v2566_v16 }
  0x5b PF: > { %v2567_v17 = vld [vmem:[%s2918_s18 + $0x40] sm:$0xff]   ;;  %v2569_v19 = vld [vmem:[%s2918_s18 + $0x48] sm:$0xff]   ;;  %v2571_v21 = vld [vmem:[%s2918_s18 + $0x50] sm:$0xff]   ;;  %p2040_p8 = scmp.ne.s32.totalorder %s2727_s27, 1 }
  0x5c   : > { %v2568_v18 = vld [vmem:[%s2918_s18] sm:$0xff]   ;;  %2220 = vmatprep.subr.bf16.mxu0 %v2567_v17  ;;  %2444 = vmatprep.subr.bf16.mxu1 %v2567_v17  ;;  %v2570_v20 = vld [vmem:[%s2918_s18 + $0x8] sm:$0xff]   ;;  %v2572_v22 = vld [vmem:[%s2918_s18 + $0x10] sm:$0xff]   ;;  %s3287_s23 = sld [smem:[#allocation9_spill]] (!%p2040_p8) }
  0x5d   : > { %2221 = vmatpush3.bf16.msra.mxu0 %v2568_v18  ;;  %2452 = vmatpush3.bf16.msra.mxu1 %v2568_v18  ;;  %v2573_v23 = vld [vmem:[%s2918_s18 + $0x58] sm:$0xff]   ;;  %v2575_v25 = vld [vmem:[%s2918_s18 + $0x60] sm:$0xff]   ;;  %v2577_v27 = vld [vmem:[%s2918_s18 + $0x68] sm:$0xff]  }
  0x5e   : > { %2222 = vmatprep.subr.bf16.mxu0 %v2569_v19  ;;  %2445 = vmatprep.subr.bf16.mxu1 %v2569_v19  ;;  %v2574_v24 = vld [vmem:[%s2918_s18 + $0x18] sm:$0xff]   ;;  %v2576_v26 = vld [vmem:[%s2918_s18 + $0x20] sm:$0xff]   ;;  %v2578_v30 = vld [vmem:[%s2918_s18 + $0x28] sm:$0xff]  }
  0x5f   : > { %v2585_v28 = vld [vmem:[%s2906_s14 + $0x4] ss:$8 sps:$4 sm:$0xff]   ;;  %v2579_v31 = vld [vmem:[%s2918_s18 + $0x70] sm:$0xff]   ;;  %v2581_v33 = vld [vmem:[%s2918_s18 + $0x78] sm:$0xff]  }
  0x60   : > { %v2588_v29 = vld [vmem:[%s2906_s14 + $0x84] ss:$8 sps:$4 sm:$0xff]   ;;  %945 = vmatprep.mubr.bf16.mxu0 %v2585_v28  ;;  %v2580_v32 = vld [vmem:[%s2918_s18 + $0x30] sm:$0xff]   ;;  %v2582_v34 = vld [vmem:[%s2918_s18 + $0x38] sm:$0xff]   ;;  %s3286_s18 = sld [smem:[#allocation8_spill]] (!%p2040_p8) }
  0x61   : > { %2223 = vmatpush3.bf16.msra.mxu0 %v2570_v20  ;;  %2453 = vmatpush3.bf16.msra.mxu1 %v2570_v20  ;;  %v2583_v35 = vld [vmem:[%s2906_s14] ss:$8 sps:$4 sm:$0xff]   ;;  %v2589_v37 = vld [vmem:[%s2906_s14 + $0x14] ss:$8 sps:$4 sm:$0xff]   ;;  %v2593_v39 = vld [vmem:[%s2906_s14 + $0x10] ss:$8 sps:$4 sm:$0xff]  }
  0x62   : > { %2224 = vmatprep.subr.bf16.mxu0 %v2571_v21  ;;  %2446 = vmatprep.subr.bf16.mxu1 %v2571_v21  ;;  %v2586_v36 = vld [vmem:[%s2906_s14 + $0x80] ss:$8 sps:$4 sm:$0xff]   ;;  %v2591_v38 = vld [vmem:[%s2906_s14 + $0x94] ss:$8 sps:$4 sm:$0xff]   ;;  %v2594_v40 = vld [vmem:[%s2906_s14 + $0x90] ss:$8 sps:$4 sm:$0xff]  }
  0x63   : > { %1009 = vmatprep.mubr.bf16.mxu1 %v2588_v29  ;;  %v2595_v41 = vld [vmem:[%s2906_s14 + $0x24] ss:$8 sps:$4 sm:$0xff]   ;;  %v2599_v43 = vld [vmem:[%s2906_s14 + $0x20] ss:$8 sps:$4 sm:$0xff]   ;;  %v2601_v45 = vld [vmem:[%s2906_s14 + $0x34] ss:$8 sps:$4 sm:$0xff]  }
  0x64   : > { %v2597_v42 = vld [vmem:[%s2906_s14 + $0xa4] ss:$8 sps:$4 sm:$0xff]   ;;  %v2600_v44 = vld [vmem:[%s2906_s14 + $0xa0] ss:$8 sps:$4 sm:$0xff]   ;;  %v2603_v46 = vld [vmem:[%s2906_s14 + $0xb4] ss:$8 sps:$4 sm:$0xff]  }
  0x65   : > { %2225 = vmatpush3.bf16.msra.mxu0 %v2572_v22  ;;  %2454 = vmatpush3.bf16.msra.mxu1 %v2572_v22  ;;  %v2605_v47 = vld [vmem:[%s2906_s14 + $0x30] ss:$8 sps:$4 sm:$0xff]   ;;  %v2607_v49 = vld [vmem:[%s2906_s14 + $0x44] ss:$8 sps:$4 sm:$0xff]   ;;  %v2611_v51 = vld [vmem:[%s2906_s14 + $0x40] ss:$8 sps:$4 sm:$0xff]  }
  0x66   : > { %2226 = vmatprep.subr.bf16.mxu0 %v2573_v23  ;;  %2447 = vmatprep.subr.bf16.mxu1 %v2573_v23  ;;  %v2606_v48 = vld [vmem:[%s2906_s14 + $0xb0] ss:$8 sps:$4 sm:$0xff]   ;;  %v2609_v50 = vld [vmem:[%s2906_s14 + $0xc4] ss:$8 sps:$4 sm:$0xff]   ;;  %v2612_v52 = vld [vmem:[%s2906_s14 + $0xc0] ss:$8 sps:$4 sm:$0xff]  }
  0x67   : > { %v2613_v53 = vld [vmem:[%s2906_s14 + $0x54] ss:$8 sps:$4 sm:$0xff]   ;;  %v2617_v55 = vld [vmem:[%s2906_s14 + $0x50] ss:$8 sps:$4 sm:$0xff]   ;;  %v2619_v57 = vld [vmem:[%s2906_s14 + $0x64] ss:$8 sps:$4 sm:$0xff]  }
  0x68   : > { %v2615_v54 = vld [vmem:[%s2906_s14 + $0xd4] ss:$8 sps:$4 sm:$0xff]   ;;  %v2618_v56 = vld [vmem:[%s2906_s14 + $0xd0] ss:$8 sps:$4 sm:$0xff]   ;;  %v2621_v58 = vld [vmem:[%s2906_s14 + $0xe4] ss:$8 sps:$4 sm:$0xff]  }
  0x69   : > { %2227 = vmatpush3.bf16.msra.mxu0 %v2574_v24  ;;  %2455 = vmatpush3.bf16.msra.mxu1 %v2574_v24  ;;  %v2623_v59 = vld [vmem:[%s2906_s14 + $0x60] ss:$8 sps:$4 sm:$0xff]   ;;  %v2625_v61 = vld [vmem:[%s2906_s14 + $0x74] ss:$8 sps:$4 sm:$0xff]   ;;  %v2629_v63 = vld [vmem:[%s2906_s14 + $0x70] ss:$8 sps:$4 sm:$0xff]  }
  0x6a   : > { %2228 = vmatprep.subr.bf16.mxu0 %v2575_v25  ;;  %2448 = vmatprep.subr.bf16.mxu1 %v2575_v25  ;;  %v2624_v60 = vld [vmem:[%s2906_s14 + $0xe0] ss:$8 sps:$4 sm:$0xff]   ;;  %v2627_v62 = vld [vmem:[%s2906_s14 + $0xf4] ss:$8 sps:$4 sm:$0xff]   ;;  %v2630_v0 = vld [vmem:[%s2906_s14 + $0xf0] ss:$8 sps:$4 sm:$0xff]  }
  0x6b   : > { %v561_v3 = vld [vmem:[#allocation2] sm:$0xff]  ;;  %v562_v11 = vld [vmem:[#allocation2 + $0x8] sm:$0xff]  ;;  %v563_v23 = vld [vmem:[#allocation2 + $0x10] sm:$0xff] }
  0x6c   : > { %v577_v5 = vld [vmem:[#allocation2 + $0x80] sm:$0xff]  ;;  %v578_v13 = vld [vmem:[#allocation2 + $0x88] sm:$0xff]  ;;  %v579_v25 = vld [vmem:[#allocation2 + $0x90] sm:$0xff] }
  0x6d   : > { %2229 = vmatpush3.bf16.msra.mxu0 %v2576_v26  ;;  %2456 = vmatpush3.bf16.msra.mxu1 %v2576_v26 }
  0x6e   : > { %2230 = vmatprep.subr.bf16.mxu0 %v2577_v27  ;;  %2449 = vmatprep.subr.bf16.mxu1 %v2577_v27 }
  0x71   : > { %2231 = vmatpush3.bf16.msra.mxu0 %v2578_v30  ;;  %2457 = vmatpush3.bf16.msra.mxu1 %v2578_v30 }
  0x72   : > { %2232 = vmatprep.subr.bf16.mxu0 %v2579_v31  ;;  %2450 = vmatprep.subr.bf16.mxu1 %v2579_v31  ;;  %v564_v31 = vld [vmem:[#allocation2 + $0x18] sm:$0xff] }
  0x75   : > { %2233 = vmatpush3.bf16.msra.mxu0 %v2580_v32  ;;  %2458 = vmatpush3.bf16.msra.mxu1 %v2580_v32 }
  0x76   : > { %2234 = vmatprep.subr.bf16.mxu0 %v2581_v33  ;;  %2451 = vmatprep.subr.bf16.mxu1 %v2581_v33  ;;  %v580_v33 = vld [vmem:[#allocation2 + $0x98] sm:$0xff] }
  0x79   : > { %2235 = vmatpush3.bf16.msra.mxu0 %v2582_v34  ;;  %2459 = vmatpush3.bf16.msra.mxu1 %v2582_v34 }
  0x7c   : > { %946 = vmatmul.mubr.bf16.vlgmr.msra.gmra.mrb[0].mxu0 %v2583_v35  ;;  %1010 = vmatmul.mubr.bf16.vlgmr.msra.gmra.mrb[0].mxu1 %v2586_v36 }
  0x7d   : > { %953 = vmatprep.mubr.bf16.mxu0 %v2589_v37  ;;  %1017 = vmatprep.mubr.bf16.mxu1 %v2591_v38 }
  0x84   : > { %954 = vmatmul.mubr.bf16.gmra.mrb[4].mxu0 %v2593_v39  ;;  %1018 = vmatmul.mubr.bf16.gmra.mrb[4].mxu1 %v2594_v40 }
  0x85   : > { %961 = vmatprep.mubr.bf16.mxu0 %v2595_v41  ;;  %1025 = vmatprep.mubr.bf16.mxu1 %v2597_v42 }
  0x8c   : > { %962 = vmatmul.mubr.bf16.gmra.mrb[8].mxu0 %v2599_v43  ;;  %1026 = vmatmul.mubr.bf16.gmra.mrb[8].mxu1 %v2600_v44  ;;  %v565_v43 = vld [vmem:[#allocation2 + $0x20] sm:$0xff] }
  0x8d   : > { %969 = vmatprep.mubr.bf16.mxu0 %v2601_v45  ;;  %1033 = vmatprep.mubr.bf16.mxu1 %v2603_v46  ;;  %v581_v45 = vld [vmem:[#allocation2 + $0xa0] sm:$0xff] }
  0x94   : > { %970 = vmatmul.mubr.bf16.gmra.mrb[12].mxu0 %v2605_v47  ;;  %1034 = vmatmul.mubr.bf16.gmra.mrb[12].mxu1 %v2606_v48 }
  0x95   : > { %977 = vmatprep.mubr.bf16.mxu0 %v2607_v49  ;;  %1041 = vmatprep.mubr.bf16.mxu1 %v2609_v50 }
  0x9c   : > { %978 = vmatmul.mubr.bf16.gmra.mrb[16].mxu0 %v2611_v51  ;;  %1042 = vmatmul.mubr.bf16.gmra.mrb[16].mxu1 %v2612_v52  ;;  %v566_v51 = vld [vmem:[#allocation2 + $0x28] sm:$0xff] }
  0x9d   : > { %985 = vmatprep.mubr.bf16.mxu0 %v2613_v53  ;;  %1049 = vmatprep.mubr.bf16.mxu1 %v2615_v54  ;;  %v582_v53 = vld [vmem:[#allocation2 + $0xa8] sm:$0xff] }
  0xa4   : > { %986 = vmatmul.mubr.bf16.gmra.mrb[20].mxu0 %v2617_v55  ;;  %1050 = vmatmul.mubr.bf16.gmra.mrb[20].mxu1 %v2618_v56 }
  0xa5   : > { %993 = vmatprep.mubr.bf16.mxu0 %v2619_v57  ;;  %1057 = vmatprep.mubr.bf16.mxu1 %v2621_v58 }
  0xac   : > { %994 = vmatmul.mubr.bf16.gmra.mrb[24].mxu0 %v2623_v59  ;;  %1058 = vmatmul.mubr.bf16.gmra.mrb[24].mxu1 %v2624_v60 }
  0xad   : > { %1001 = vmatprep.mubr.bf16.mxu0 %v2625_v61  ;;  %1065 = vmatprep.mubr.bf16.mxu1 %v2627_v62 }
  0xb4   : > { %1002 = vmatmul.mubr.bf16.gmra.mrb[28].mxu0 %v2629_v63  ;;  %1066 = vmatmul.mubr.bf16.gmra.mrb[28].mxu1 %v2630_v0  ;;  %v567_v63 = vld [vmem:[#allocation2 + $0x30] sm:$0xff] }
 0x14f   : > { %v2236_v1 = vpop.f32.mrb[0].mxu0  ;;  %v2284_v2 = vpop.f32.mrb[0].mxu1 }
 0x150   : > { %v2237_v4 = vpop.f32.mrb[1].mxu0  ;;  %v2285_v6 = vpop.f32.mrb[1].mxu1 }
 0x151   : > { %v2238_v7 = vadd.f32 %v2237_v4, %v2236_v1  ;;  %v2286_v8 = vadd.f32 %v2285_v6, %v2284_v2  ;;  %v2239_v9 = vpop.f32.mrb[2].mxu0  ;;  %v2287_v10 = vpop.f32.mrb[2].mxu1  ;;  %v583_v1 = vld [vmem:[#allocation2 + $0xb0] sm:$0xff] }
 0x152   : > { %v2240_v12 = vpop.f32.mrb[3].mxu0  ;;  %v2288_v14 = vpop.f32.mrb[3].mxu1 }
 0x153   : > { %v1074_v15 = vadd.f32 %v2238_v7, %v561_v3  ;;  %v1090_v16 = vadd.f32 %v2286_v8, %v577_v5  ;;  %v2241_v17 = vadd.f32 %v2240_v12, %v2239_v9  ;;  %v2289_v18 = vadd.f32 %v2288_v14, %v2287_v10  ;;  %v568_v7 = vld [vmem:[#allocation2 + $0x38] sm:$0xff] }
 0x154   : > { %v584_v9 = vld [vmem:[#allocation2 + $0xb8] sm:$0xff] }
 0x155   : > { %1106 = vst [vmem:[#allocation2] sm:$0xff] %v1074_v15  ;;  %1122 = vst [vmem:[#allocation2 + $0x80] sm:$0xff] %v1090_v16  ;;  %v1075_v19 = vadd.f32 %v2241_v17, %v562_v11  ;;  %v1091_v20 = vadd.f32 %v2289_v18, %v578_v13 }
 0x157   : > { %1107 = vst [vmem:[#allocation2 + $0x8] sm:$0xff] %v1075_v19  ;;  %1123 = vst [vmem:[#allocation2 + $0x88] sm:$0xff] %v1091_v20  ;;  %v2242_v21 = vpop.f32.mrb[4].mxu0  ;;  %v2290_v22 = vpop.f32.mrb[4].mxu1  ;;  %v569_v19 = vld [vmem:[#allocation2 + $0x40] sm:$0xff] }
 0x158   : > { %v2243_v24 = vpop.f32.mrb[5].mxu0  ;;  %v2291_v26 = vpop.f32.mrb[5].mxu1 }
 0x159   : > { %v2244_v27 = vadd.f32 %v2243_v24, %v2242_v21  ;;  %v2292_v28 = vadd.f32 %v2291_v26, %v2290_v22  ;;  %v2245_v29 = vpop.f32.mrb[6].mxu0  ;;  %v2293_v30 = vpop.f32.mrb[6].mxu1  ;;  %v585_v21 = vld [vmem:[#allocation2 + $0xc0] sm:$0xff] }
 0x15a   : > { %v2246_v32 = vpop.f32.mrb[7].mxu0  ;;  %v2294_v34 = vpop.f32.mrb[7].mxu1 }
 0x15b   : > { %v1076_v35 = vadd.f32 %v2244_v27, %v563_v23  ;;  %v1092_v36 = vadd.f32 %v2292_v28, %v579_v25  ;;  %v2247_v37 = vadd.f32 %v2246_v32, %v2245_v29  ;;  %v2295_v38 = vadd.f32 %v2294_v34, %v2293_v30  ;;  %v570_v27 = vld [vmem:[#allocation2 + $0x48] sm:$0xff] }
 0x15c   : > { %v586_v29 = vld [vmem:[#allocation2 + $0xc8] sm:$0xff] }
 0x15d   : > { %1108 = vst [vmem:[#allocation2 + $0x10] sm:$0xff] %v1076_v35  ;;  %1124 = vst [vmem:[#allocation2 + $0x90] sm:$0xff] %v1092_v36  ;;  %v1077_v39 = vadd.f32 %v2247_v37, %v564_v31  ;;  %v1093_v40 = vadd.f32 %v2295_v38, %v580_v33 }
 0x15f   : > { %1109 = vst [vmem:[#allocation2 + $0x18] sm:$0xff] %v1077_v39  ;;  %1125 = vst [vmem:[#allocation2 + $0x98] sm:$0xff] %v1093_v40  ;;  %v2248_v41 = vpop.f32.mrb[8].mxu0  ;;  %v2296_v42 = vpop.f32.mrb[8].mxu1  ;;  %v571_v39 = vld [vmem:[#allocation2 + $0x50] sm:$0xff] }
 0x160   : > { %v2249_v44 = vpop.f32.mrb[9].mxu0  ;;  %v2297_v46 = vpop.f32.mrb[9].mxu1 }
 0x161   : > { %v2250_v47 = vadd.f32 %v2249_v44, %v2248_v41  ;;  %v2298_v48 = vadd.f32 %v2297_v46, %v2296_v42  ;;  %v2251_v49 = vpop.f32.mrb[10].mxu0  ;;  %v2299_v50 = vpop.f32.mrb[10].mxu1  ;;  %v587_v41 = vld [vmem:[#allocation2 + $0xd0] sm:$0xff] }
 0x162   : > { %v2252_v52 = vpop.f32.mrb[11].mxu0  ;;  %v2300_v54 = vpop.f32.mrb[11].mxu1 }
 0x163   : > { %v1078_v55 = vadd.f32 %v2250_v47, %v565_v43  ;;  %v1094_v56 = vadd.f32 %v2298_v48, %v581_v45  ;;  %v2253_v57 = vadd.f32 %v2252_v52, %v2251_v49  ;;  %v2301_v58 = vadd.f32 %v2300_v54, %v2299_v50  ;;  %v572_v47 = vld [vmem:[#allocation2 + $0x58] sm:$0xff] }
 0x164   : > { %v588_v49 = vld [vmem:[#allocation2 + $0xd8] sm:$0xff] }
 0x165   : > { %1110 = vst [vmem:[#allocation2 + $0x20] sm:$0xff] %v1078_v55  ;;  %1126 = vst [vmem:[#allocation2 + $0xa0] sm:$0xff] %v1094_v56  ;;  %v1079_v59 = vadd.f32 %v2253_v57, %v566_v51  ;;  %v1095_v60 = vadd.f32 %v2301_v58, %v582_v53 }
 0x167   : > { %1111 = vst [vmem:[#allocation2 + $0x28] sm:$0xff] %v1079_v59  ;;  %1127 = vst [vmem:[#allocation2 + $0xa8] sm:$0xff] %v1095_v60  ;;  %v2254_v61 = vpop.f32.mrb[12].mxu0  ;;  %v2302_v62 = vpop.f32.mrb[12].mxu1  ;;  %v573_v59 = vld [vmem:[#allocation2 + $0x60] sm:$0xff] }
 0x168   : > { %v2255_v0 = vpop.f32.mrb[13].mxu0  ;;  %v2303_v2 = vpop.f32.mrb[13].mxu1 }
 0x169   : > { %v2256_v3 = vadd.f32 %v2255_v0, %v2254_v61  ;;  %v2304_v4 = vadd.f32 %v2303_v2, %v2302_v62  ;;  %v2257_v5 = vpop.f32.mrb[14].mxu0  ;;  %v2305_v6 = vpop.f32.mrb[14].mxu1  ;;  %v589_v61 = vld [vmem:[#allocation2 + $0xe0] sm:$0xff] }
 0x16a   : > { %v2258_v8 = vpop.f32.mrb[15].mxu0  ;;  %v2306_v10 = vpop.f32.mrb[15].mxu1 }
 0x16b   : > { %v1080_v11 = vadd.f32 %v2256_v3, %v567_v63  ;;  %v1096_v12 = vadd.f32 %v2304_v4, %v583_v1  ;;  %v2259_v13 = vadd.f32 %v2258_v8, %v2257_v5  ;;  %v2307_v14 = vadd.f32 %v2306_v10, %v2305_v6  ;;  %v574_v3 = vld [vmem:[#allocation2 + $0x68] sm:$0xff] }
 0x16c   : > { %v590_v5 = vld [vmem:[#allocation2 + $0xe8] sm:$0xff] }
 0x16d   : > { %1112 = vst [vmem:[#allocation2 + $0x30] sm:$0xff] %v1080_v11  ;;  %1128 = vst [vmem:[#allocation2 + $0xb0] sm:$0xff] %v1096_v12  ;;  %v1081_v15 = vadd.f32 %v2259_v13, %v568_v7  ;;  %v1097_v16 = vadd.f32 %v2307_v14, %v584_v9 }
 0x16f   : > { %1113 = vst [vmem:[#allocation2 + $0x38] sm:$0xff] %v1081_v15  ;;  %1129 = vst [vmem:[#allocation2 + $0xb8] sm:$0xff] %v1097_v16  ;;  %v2260_v17 = vpop.f32.mrb[16].mxu0  ;;  %v2308_v18 = vpop.f32.mrb[16].mxu1  ;;  %v575_v15 = vld [vmem:[#allocation2 + $0x70] sm:$0xff] }
 0x170   : > { %v2261_v20 = vpop.f32.mrb[17].mxu0  ;;  %v2309_v22 = vpop.f32.mrb[17].mxu1 }
 0x171   : > { %v2262_v23 = vadd.f32 %v2261_v20, %v2260_v17  ;;  %v2310_v24 = vadd.f32 %v2309_v22, %v2308_v18  ;;  %v2263_v25 = vpop.f32.mrb[18].mxu0  ;;  %v2311_v26 = vpop.f32.mrb[18].mxu1  ;;  %v591_v17 = vld [vmem:[#allocation2 + $0xf0] sm:$0xff] }
 0x172   : > { %v2264_v28 = vpop.f32.mrb[19].mxu0  ;;  %v2312_v30 = vpop.f32.mrb[19].mxu1 }
 0x173   : > { %v1082_v31 = vadd.f32 %v2262_v23, %v569_v19  ;;  %v1098_v32 = vadd.f32 %v2310_v24, %v585_v21  ;;  %v2265_v33 = vadd.f32 %v2264_v28, %v2263_v25  ;;  %v2313_v34 = vadd.f32 %v2312_v30, %v2311_v26  ;;  %v576_v23 = vld [vmem:[#allocation2 + $0x78] sm:$0xff] }
 0x174   : > { %v592_v25 = vld [vmem:[#allocation2 + $0xf8] sm:$0xff] }
 0x175   : > { %1114 = vst [vmem:[#allocation2 + $0x40] sm:$0xff] %v1082_v31  ;;  %1130 = vst [vmem:[#allocation2 + $0xc0] sm:$0xff] %v1098_v32  ;;  %v1083_v35 = vadd.f32 %v2265_v33, %v570_v27  ;;  %v1099_v36 = vadd.f32 %v2313_v34, %v586_v29  ;;  %v2631_v33 = vld [vmem:[%s3286_s18 + $0x40] sm:$0xff] (!%p2040_p8)  }
 0x176   : > { %v2632_v34 = vld [vmem:[%s3286_s18] sm:$0xff] (!%p2040_p8)   ;;  %2332 = vmatprep.subr.bf16.mxu0 (!%p2040_p8), %v2631_v33  ;;  %2460 = vmatprep.subr.bf16.mxu1 (!%p2040_p8), %v2631_v33 }
 0x177   : > { %1115 = vst [vmem:[#allocation2 + $0x48] sm:$0xff] %v1083_v35  ;;  %1131 = vst [vmem:[#allocation2 + $0xc8] sm:$0xff] %v1099_v36  ;;  %v2266_v37 = vpop.f32.mrb[20].mxu0  ;;  %v2314_v38 = vpop.f32.mrb[20].mxu1  ;;  %v2633_v35 = vld [vmem:[%s3286_s18 + $0x48] sm:$0xff] (!%p2040_p8)   ;;  %2333 = vmatpush3.bf16.msra.mxu0 (!%p2040_p8), %v2632_v34  ;;  %2468 = vmatpush3.bf16.msra.mxu1 (!%p2040_p8), %v2632_v34  ;;  %v1222_v33 = vld [vmem:[#allocation3 + $0x80] sm:$0xff] (!%p2040_p8) }
 0x178   : > { %v2267_v40 = vpop.f32.mrb[21].mxu0  ;;  %v2315_v42 = vpop.f32.mrb[21].mxu1  ;;  %v2634_v36 = vld [vmem:[%s3286_s18 + $0x8] sm:$0xff] (!%p2040_p8)   ;;  %2334 = vmatprep.subr.bf16.mxu0 (!%p2040_p8), %v2633_v35  ;;  %2461 = vmatprep.subr.bf16.mxu1 (!%p2040_p8), %v2633_v35  ;;  %v1208_v35 = vld [vmem:[#allocation3 + $0x10] sm:$0xff] (!%p2040_p8) }
 0x179   : > { %v2268_v43 = vadd.f32 %v2267_v40, %v2266_v37  ;;  %v2316_v44 = vadd.f32 %v2315_v42, %v2314_v38  ;;  %v2269_v45 = vpop.f32.mrb[22].mxu0  ;;  %v2317_v46 = vpop.f32.mrb[22].mxu1  ;;  %v2635_v37 = vld [vmem:[%s3286_s18 + $0x50] sm:$0xff] (!%p2040_p8)   ;;  %v2638_v40 = vld [vmem:[%s3286_s18 + $0x18] sm:$0xff] (!%p2040_p8)   ;;  %v2640_v42 = vld [vmem:[%s3286_s18 + $0x20] sm:$0xff] (!%p2040_p8)  }
 0x17a   : > { %v2270_v48 = vpop.f32.mrb[23].mxu0  ;;  %v2318_v50 = vpop.f32.mrb[23].mxu1  ;;  %v2636_v38 = vld [vmem:[%s3286_s18 + $0x10] sm:$0xff] (!%p2040_p8)  }
 0x17b   : > { %v1084_v51 = vadd.f32 %v2268_v43, %v571_v39  ;;  %v1100_v52 = vadd.f32 %v2316_v44, %v587_v41  ;;  %v2271_v53 = vadd.f32 %v2270_v48, %v2269_v45  ;;  %v2319_v54 = vadd.f32 %v2318_v50, %v2317_v46  ;;  %2335 = vmatpush3.bf16.msra.mxu0 (!%p2040_p8), %v2634_v36  ;;  %v2637_v39 = vld [vmem:[%s3286_s18 + $0x58] sm:$0xff] (!%p2040_p8)   ;;  %v2639_v41 = vld [vmem:[%s3286_s18 + $0x60] sm:$0xff] (!%p2040_p8)   ;;  %v2641_v43 = vld [vmem:[%s3286_s18 + $0x68] sm:$0xff] (!%p2040_p8)  }
 0x17c   : > { %2469 = vmatpush3.bf16.msra.mxu1 (!%p2040_p8), %v2634_v36  ;;  %2336 = vmatprep.subr.bf16.mxu0 (!%p2040_p8), %v2635_v37  ;;  %v1142_v44 = vld [vmem:[#allocation2] sm:$0xff] (!%p2040_p8)  ;;  %v1143_v45 = vld [vmem:[#allocation2 + $0x8] sm:$0xff] (!%p2040_p8)  ;;  %v3042_v48 = vld [vmem:[#allocation2 + $0x18] sm:$0xff] (!%p2040_p8) }
 0x17d   : > { %1116 = vst [vmem:[#allocation2 + $0x50] sm:$0xff] %v1084_v51  ;;  %1132 = vst [vmem:[#allocation2 + $0xd0] sm:$0xff] %v1100_v52  ;;  %v1085_v55 = vadd.f32 %v2271_v53, %v572_v47  ;;  %v1101_v56 = vadd.f32 %v2319_v54, %v588_v49  ;;  %2462 = vmatprep.subr.bf16.mxu1 (!%p2040_p8), %v2635_v37  ;;  %v1174_v46 = vpack.c.bf16 (!%p2040_p8), %v1143_v45, %v1142_v44  ;;  %v3040_v47 = vld [vmem:[#allocation2 + $0x10] sm:$0xff] (!%p2040_p8)  ;;  %v3046_v50 = vld [vmem:[#allocation2 + $0x20] sm:$0xff] (!%p2040_p8) }
 0x17e   : > { %v1175_v49 = vpack.c.bf16 (!%p2040_p8), %v3042_v48, %v3040_v47  ;;  %v3048_v51 = vld [vmem:[#allocation2 + $0x28] sm:$0xff] (!%p2040_p8)  ;;  %v3055_v54 = vld [vmem:[#allocation2 + $0x30] sm:$0xff] (!%p2040_p8)  ;;  %v1210_v37 = vld [vmem:[#allocation3 + $0x20] sm:$0xff] (!%p2040_p8) }
 0x17f   : > { %1117 = vst [vmem:[#allocation2 + $0x58] sm:$0xff] %v1085_v55  ;;  %1133 = vst [vmem:[#allocation2 + $0xd8] sm:$0xff] %v1101_v56  ;;  %v2272_v57 = vpop.f32.mrb[24].mxu0  ;;  %v2320_v58 = vpop.f32.mrb[24].mxu1  ;;  %2337 = vmatpush3.bf16.msra.mxu0 (!%p2040_p8), %v2636_v38  ;;  %v2642_v52 = vld [vmem:[%s3286_s18 + $0x28] sm:$0xff] (!%p2040_p8)   ;;  %1405 = vmatprep.mubr.bf16.mxu0 (!%p2040_p8), %v1174_v46  ;;  %v1176_v53 = vpack.c.bf16 (!%p2040_p8), %v3048_v51, %v3046_v50  ;;  %v3057_v55 = vld [vmem:[#allocation2 + $0x38] sm:$0xff] (!%p2040_p8) }
 0x180   : > { %v2273_v60 = vpop.f32.mrb[25].mxu0  ;;  %v2321_v62 = vpop.f32.mrb[25].mxu1  ;;  %2470 = vmatpush3.bf16.msra.mxu1 (!%p2040_p8), %v2636_v38  ;;  %2338 = vmatprep.subr.bf16.mxu0 (!%p2040_p8), %v2637_v39  ;;  %v2643_v56 = vld [vmem:[%s3286_s18 + $0x70] sm:$0xff] (!%p2040_p8)   ;;  %v1226_v38 = vld [vmem:[#allocation3 + $0xa0] sm:$0xff] (!%p2040_p8) }
 0x181   : > { %v2274_v63 = vadd.f32 %v2273_v60, %v2272_v57  ;;  %v2322_v0 = vadd.f32 %v2321_v62, %v2320_v58  ;;  %v2275_v1 = vpop.f32.mrb[26].mxu0  ;;  %v2323_v2 = vpop.f32.mrb[26].mxu1  ;;  %2463 = vmatprep.subr.bf16.mxu1 (!%p2040_p8), %v2637_v39  ;;  %v1177_v57 = vpack.c.bf16 (!%p2040_p8), %v3057_v55, %v3055_v54  ;;  %v1158_v58 = vld [vmem:[#allocation2 + $0x80] sm:$0xff] (!%p2040_p8)  ;;  %v3066_v62 = vld [vmem:[#allocation2 + $0x48] sm:$0xff] (!%p2040_p8)  ;;  %v1224_v36 = vld [vmem:[#allocation3 + $0x90] sm:$0xff] (!%p2040_p8) }
 0x182   : > { %v2276_v4 = vpop.f32.mrb[27].mxu0  ;;  %v2324_v6 = vpop.f32.mrb[27].mxu1  ;;  %v1212_v39 = vld [vmem:[#allocation3 + $0x30] sm:$0xff] (!%p2040_p8)  ;;  %v1218_v45 = vld [vmem:[#allocation3 + $0x60] sm:$0xff] (!%p2040_p8) }
 0x183   : > { %v1086_v7 = vadd.f32 %v2274_v63, %v573_v59  ;;  %v1102_v8 = vadd.f32 %v2322_v0, %v589_v61  ;;  %v2277_v9 = vadd.f32 %v2276_v4, %v2275_v1  ;;  %v2325_v10 = vadd.f32 %v2324_v6, %v2323_v2  ;;  %2339 = vmatpush3.bf16.msra.mxu0 (!%p2040_p8), %v2638_v40  ;;  %v1159_v59 = vld [vmem:[#allocation2 + $0x88] sm:$0xff] (!%p2040_p8)  ;;  %v3064_v61 = vld [vmem:[#allocation2 + $0x40] sm:$0xff] (!%p2040_p8)  ;;  %v1160_v0 = vld [vmem:[#allocation2 + $0x90] sm:$0xff] (!%p2040_p8) }
 0x184   : > { %2471 = vmatpush3.bf16.msra.mxu1 (!%p2040_p8), %v2638_v40  ;;  %2340 = vmatprep.subr.bf16.mxu0 (!%p2040_p8), %v2639_v41  ;;  %v1182_v60 = vpack.c.bf16 (!%p2040_p8), %v1159_v59, %v1158_v58  ;;  %v1178_v63 = vpack.c.bf16 (!%p2040_p8), %v3066_v62, %v3064_v61  ;;  %v1161_v1 = vld [vmem:[#allocation2 + $0x98] sm:$0xff] (!%p2040_p8)  ;;  %v2644_v2 = vld [vmem:[%s3286_s18 + $0x30] sm:$0xff] (!%p2040_p8)   ;;  %v1234_v46 = vld [vmem:[#allocation3 + $0xe0] sm:$0xff] (!%p2040_p8) }
 0x185   : > { %1118 = vst [vmem:[#allocation2 + $0x60] sm:$0xff] %v1086_v7  ;;  %1134 = vst [vmem:[#allocation2 + $0xe0] sm:$0xff] %v1102_v8  ;;  %v1087_v11 = vadd.f32 %v2277_v9, %v574_v3  ;;  %v1103_v12 = vadd.f32 %v2325_v10, %v590_v5  ;;  %2464 = vmatprep.subr.bf16.mxu1 (!%p2040_p8), %v2639_v41  ;;  %v1183_v3 = vpack.c.bf16 (!%p2040_p8), %v1161_v1, %v1160_v0  ;;  %v3073_v4 = vld [vmem:[#allocation2 + $0x50] sm:$0xff] (!%p2040_p8)  ;;  %v2645_v6 = vld [vmem:[%s3286_s18 + $0x78] sm:$0xff] (!%p2040_p8)  }
 0x186   : > { %1469 = vmatprep.mubr.bf16.mxu1 (!%p2040_p8), %v1182_v60  ;;  %v3075_v5 = vld [vmem:[#allocation2 + $0x58] sm:$0xff] (!%p2040_p8)  ;;  %v1162_v8 = vld [vmem:[#allocation2 + $0xa0] sm:$0xff] (!%p2040_p8)  ;;  %v1163_v9 = vld [vmem:[#allocation2 + $0xa8] sm:$0xff] (!%p2040_p8) }
 0x187   : > { %1119 = vst [vmem:[#allocation2 + $0x68] sm:$0xff] %v1087_v11  ;;  %1135 = vst [vmem:[#allocation2 + $0xe8] sm:$0xff] %v1103_v12  ;;  %v2278_v13 = vpop.f32.mrb[28].mxu0  ;;  %v2326_v14 = vpop.f32.mrb[28].mxu1  ;;  %2341 = vmatpush3.bf16.msra.mxu0 (!%p2040_p8), %v2640_v42  ;;  %v1179_v7 = vpack.c.bf16 (!%p2040_p8), %v3075_v5, %v3073_v4  ;;  %v1184_v10 = vpack.c.bf16 (!%p2040_p8), %v1163_v9, %v1162_v8  ;;  %v1228_v40 = vld [vmem:[#allocation3 + $0xb0] sm:$0xff] (!%p2040_p8)  ;;  %v1214_v41 = vld [vmem:[#allocation3 + $0x40] sm:$0xff] (!%p2040_p8) }
 0x188   : > { %v2279_v16 = vpop.f32.mrb[29].mxu0  ;;  %v2327_v18 = vpop.f32.mrb[29].mxu1  ;;  %2342 = vmatprep.subr.bf16.mxu0 (!%p2040_p8), %v2641_v43  ;;  %2472 = vmatpush3.bf16.msra.mxu1 (!%p2040_p8), %v2640_v42  ;;  %v1230_v42 = vld [vmem:[#allocation3 + $0xc0] sm:$0xff] (!%p2040_p8)  ;;  %v1232_v44 = vld [vmem:[#allocation3 + $0xd0] sm:$0xff] (!%p2040_p8) }
 0x189   : > { %v2280_v19 = vadd.f32 %v2279_v16, %v2278_v13  ;;  %v2328_v20 = vadd.f32 %v2327_v18, %v2326_v14  ;;  %v2281_v21 = vpop.f32.mrb[30].mxu0  ;;  %v2329_v22 = vpop.f32.mrb[30].mxu1  ;;  %1141 = sbr.rel (%p2040_p8) target bundleno = 730 (0x2da), region = 52  ;;  %2465 = vmatprep.subr.bf16.mxu1 (!%p2040_p8), %v2641_v43  ;;  %v1164_v14 = vld [vmem:[#allocation2 + $0xb0] sm:$0xff] (!%p2040_p8)  ;;  %v2646_v16 = vld [vmem:[%s3286_s18 + $0x38] sm:$0xff] (!%p2040_p8)  }
 0x18a   : > { %v2282_v24 = vpop.f32.mrb[31].mxu0  ;;  %v2330_v26 = vpop.f32.mrb[31].mxu1  ;;  %v1216_v43 = vld [vmem:[#allocation3 + $0x50] sm:$0xff] (!%p2040_p8)  ;;  %v3100_v50 = vld [vmem:[%s3287_s23] ss:$0 sm:$0xff] (!%p2040_p8) }
 0x18b   : > { %v1088_v27 = vadd.f32 %v2280_v19, %v575_v15  ;;  %v1104_v28 = vadd.f32 %v2328_v20, %v591_v17  ;;  %v2283_v29 = vadd.f32 %v2282_v24, %v2281_v21  ;;  %v2331_v30 = vadd.f32 %v2330_v26, %v2329_v22  ;;  %2343 = vmatpush3.bf16.msra.mxu0 (!%p2040_p8), %v2642_v52  ;;  %v1165_v15 = vld [vmem:[#allocation2 + $0xb8] sm:$0xff] (!%p2040_p8)  ;;  %v1166_v21 = vld [vmem:[#allocation2 + $0xc0] sm:$0xff] (!%p2040_p8)  ;;  %v1167_v22 = vld [vmem:[#allocation2 + $0xc8] sm:$0xff] (!%p2040_p8) }
 0x18c   : > { %2344 = vmatprep.subr.bf16.mxu0 (!%p2040_p8), %v2643_v56  ;;  %2473 = vmatpush3.bf16.msra.mxu1 (!%p2040_p8), %v2642_v52  ;;  %v1154_v11 = vld [vmem:[#allocation2 + $0x60] sm:$0xff] (!%p2040_p8)  ;;  %v1185_v17 = vpack.c.bf16 (!%p2040_p8), %v1165_v15, %v1164_v14  ;;  %v1168_v24 = vld [vmem:[#allocation2 + $0xd0] sm:$0xff] (!%p2040_p8) }
 0x18d   : > { %1120 = vst [vmem:[#allocation2 + $0x70] sm:$0xff] %v1088_v27  ;;  %1136 = vst [vmem:[#allocation2 + $0xf0] sm:$0xff] %v1104_v28  ;;  %v1089_v31 = vadd.f32 %v2283_v29, %v576_v23  ;;  %v1105_v32 = vadd.f32 %v2331_v30, %v592_v25  ;;  %2466 = vmatprep.subr.bf16.mxu1 (!%p2040_p8), %v2643_v56  ;;  %v1186_v23 = vpack.c.bf16 (!%p2040_p8), %v1167_v22, %v1166_v21  ;;  %v1169_v25 = vld [vmem:[#allocation2 + $0xd8] sm:$0xff] (!%p2040_p8)  ;;  %v1170_v27 = vld [vmem:[#allocation2 + $0xe0] sm:$0xff] (!%p2040_p8) }
 0x18e   : > { %v1155_v12 = vld [vmem:[#allocation2 + $0x68] sm:$0xff] (!%p2040_p8)  ;;  %v1187_v26 = vpack.c.bf16 (!%p2040_p8), %v1169_v25, %v1168_v24  ;;  %v1206_v29 = vld [vmem:[#allocation3] sm:$0xff] (!%p2040_p8)  ;;  %v1220_v47 = vld [vmem:[#allocation3 + $0x70] sm:$0xff] (!%p2040_p8) }
 0x18f   : > { %1121 = vst [vmem:[#allocation2 + $0x78] sm:$0xff] %v1089_v31  ;;  %1137 = vst [vmem:[#allocation2 + $0xf8] sm:$0xff] %v1105_v32  ;;  %v1180_v13 = vpack.c.bf16 (!%p2040_p8), %v1155_v12, %v1154_v11  ;;  %2345 = vmatpush3.bf16.msra.mxu0 (!%p2040_p8), %v2644_v2  ;;  %v1171_v28 = vld [vmem:[#allocation2 + $0xe8] sm:$0xff] (!%p2040_p8)  ;;  %v1236_v48 = vld [vmem:[#allocation3 + $0xf0] sm:$0xff] (!%p2040_p8) }
 0x190   : > { %2346 = vmatprep.subr.bf16.mxu0 %v2645_v6  ;;  %2474 = vmatpush3.bf16.msra.mxu1 %v2644_v2  ;;  %v1188_v30 = vpack.c.bf16 %v1171_v28, %v1170_v27 }
 0x191   : > { %2467 = vmatprep.subr.bf16.mxu1 %v2645_v6 }
 0x193   : > { %2347 = vmatpush3.bf16.msra.mxu0 %v2646_v16 }
 0x194   : > { %v1156_v18 = vld [vmem:[#allocation2 + $0x70] sm:$0xff]  ;;  %2475 = vmatpush3.bf16.msra.mxu1 %v2646_v16 }
 0x195   : > { %v1172_v31 = vld [vmem:[#allocation2 + $0xf0] sm:$0xff] }
 0x196   : > { %v1157_v19 = vld [vmem:[#allocation2 + $0x78] sm:$0xff]  ;;  %1406 = vmatmul.mubr.bf16.vlgmr.msra.gmra.mrb[0].mxu0 %v1206_v29 }
 0x197   : > { %v1181_v20 = vpack.c.bf16 %v1157_v19, %v1156_v18  ;;  %v1173_v32 = vld [vmem:[#allocation2 + $0xf8] sm:$0xff]  ;;  %1413 = vmatprep.mubr.bf16.mxu0 %v1175_v49  ;;  %1470 = vmatmul.mubr.bf16.vlgmr.msra.gmra.mrb[0].mxu1 %v1222_v33 }
 0x198   : > { %v1189_v34 = vpack.c.bf16 %v1173_v32, %v1172_v31  ;;  %1477 = vmatprep.mubr.bf16.mxu1 %v1183_v3 }
 0x19e   : > { %1414 = vmatmul.mubr.bf16.gmra.mrb[4].mxu0 %v1208_v35 }
 0x19f   : > { %1421 = vmatprep.mubr.bf16.mxu0 %v1176_v53  ;;  %1478 = vmatmul.mubr.bf16.gmra.mrb[4].mxu1 %v1224_v36 }
 0x1a0   : > { %1485 = vmatprep.mubr.bf16.mxu1 %v1184_v10 }
 0x1a6   : > { %1422 = vmatmul.mubr.bf16.gmra.mrb[8].mxu0 %v1210_v37 }
 0x1a7   : > { %1429 = vmatprep.mubr.bf16.mxu0 %v1177_v57  ;;  %1486 = vmatmul.mubr.bf16.gmra.mrb[8].mxu1 %v1226_v38 }
 0x1a8   : > { %1493 = vmatprep.mubr.bf16.mxu1 %v1185_v17 }
 0x1ae   : > { %1430 = vmatmul.mubr.bf16.gmra.mrb[12].mxu0 %v1212_v39 }
 0x1af   : > { %1437 = vmatprep.mubr.bf16.mxu0 %v1178_v63  ;;  %1494 = vmatmul.mubr.bf16.gmra.mrb[12].mxu1 %v1228_v40 }
 0x1b0   : > { %1501 = vmatprep.mubr.bf16.mxu1 %v1186_v23 }
 0x1b6   : > { %1438 = vmatmul.mubr.bf16.gmra.mrb[16].mxu0 %v1214_v41 }
 0x1b7   : > { %1445 = vmatprep.mubr.bf16.mxu0 %v1179_v7  ;;  %1502 = vmatmul.mubr.bf16.gmra.mrb[16].mxu1 %v1230_v42 }
 0x1b8   : > { %1509 = vmatprep.mubr.bf16.mxu1 %v1187_v26 }
 0x1be   : > { %1446 = vmatmul.mubr.bf16.gmra.mrb[20].mxu0 %v1216_v43 }
 0x1bf   : > { %1453 = vmatprep.mubr.bf16.mxu0 %v1180_v13  ;;  %1510 = vmatmul.mubr.bf16.gmra.mrb[20].mxu1 %v1232_v44 }
 0x1c0   : > { %1517 = vmatprep.mubr.bf16.mxu1 %v1188_v30 }
 0x1c6   : > { %1454 = vmatmul.mubr.bf16.gmra.mrb[24].mxu0 %v1218_v45 }
 0x1c7   : > { %1461 = vmatprep.mubr.bf16.mxu0 %v1181_v20  ;;  %1518 = vmatmul.mubr.bf16.gmra.mrb[24].mxu1 %v1234_v46 }
 0x1c8   : > { %1525 = vmatprep.mubr.bf16.mxu1 %v1189_v34 }
 0x1ce   : > { %1462 = vmatmul.mubr.bf16.gmra.mrb[28].mxu0 %v1220_v47 }
 0x1cf   : > { %1526 = vmatmul.mubr.bf16.gmra.mrb[28].mxu1 %v1236_v48 }
 0x269   : > { %v2348_v49 = vpop.f32.mrb[0].mxu0 }
 0x26a   : > { %v2349_v51 = vpop.f32.mrb[1].mxu0  ;;  %v2396_v52 = vpop.f32.mrb[0].mxu1 }
 0x26b   : > { %v2350_v53 = vadd.f32 %v2349_v51, %v2348_v49  ;;  %v2351_v54 = vpop.f32.mrb[2].mxu0  ;;  %v2397_v55 = vpop.f32.mrb[1].mxu1 }
 0x26c   : > { %v2352_v56 = vpop.f32.mrb[3].mxu0  ;;  %v2398_v57 = vadd.f32 %v2397_v55, %v2396_v52  ;;  %v2399_v58 = vpop.f32.mrb[2].mxu1 }
 0x26d   : > { %v1408_v59 = vadd.f32 %v2350_v53, %v3100_v50  ;;  %v2353_v60 = vadd.f32 %v2352_v56, %v2351_v54  ;;  %v2400_v61 = vpop.f32.mrb[3].mxu1 }
 0x26e   : > { %v3104_v62 = vadd.f32 %v2398_v57, %v3100_v50  ;;  %v2401_v63 = vadd.f32 %v2400_v61, %v2399_v58 }
 0x26f   : > { %v1411_v0 = vadd.f32 %v2353_v60, %v3100_v50  ;;  %v1572_v2 = vmul.f32 %v1408_v59, %v1408_v59 }
 0x270   : > { %v3108_v1 = vadd.f32 %v2401_v63, %v3100_v50 }
 0x271   : > { %v1534_v3 = vadd.f32 %v1411_v0, %v1408_v59  ;;  %v1573_v4 = vmul.f32 %v1411_v0, %v1411_v0  ;;  %v2128_v5 = vpack.c.bf16 %v1411_v0, %v1408_v59  ;;  %v2354_v6 = vpop.f32.mrb[4].mxu0 }
 0x272   : > { %v2355_v7 = vpop.f32.mrb[5].mxu0  ;;  %v2168_v8 = vpack.c.bf16 %v3108_v1, %v3104_v62  ;;  %v2402_v9 = vpop.f32.mrb[4].mxu1 }
 0x273   : > { %v1604_v10 = vadd.f32 %v1573_v4, %v1572_v2  ;;  %2129 = vst [vmem:[%s2928_s16] sm:$0xff] %v2128_v5   ;;  %v2356_v11 = vadd.f32 %v2355_v7, %v2354_v6  ;;  %v2357_v12 = vpop.f32.mrb[6].mxu0  ;;  %v2403_v13 = vpop.f32.mrb[5].mxu1 }
 0x274   : > { %v2358_v14 = vpop.f32.mrb[7].mxu0  ;;  %2212 = vst [vmem:[%s2928_s16 + $0x40] sm:$0xff] %v2168_v8   ;;  %v2404_v15 = vadd.f32 %v2403_v13, %v2402_v9  ;;  %v2405_v16 = vpop.f32.mrb[6].mxu1 }
 0x275   : > { %v1416_v17 = vadd.f32 %v2356_v11, %v3100_v50  ;;  %v2359_v18 = vadd.f32 %v2358_v14, %v2357_v12  ;;  %v2406_v19 = vpop.f32.mrb[7].mxu1 }
 0x276   : > { %v3116_v20 = vadd.f32 %v2404_v15, %v3100_v50  ;;  %v2407_v21 = vadd.f32 %v2406_v19, %v2405_v16 }
 0x277   : > { %v1535_v22 = vadd.f32 %v1534_v3, %v1416_v17  ;;  %v1574_v23 = vmul.f32 %v1416_v17, %v1416_v17  ;;  %v1419_v24 = vadd.f32 %v2359_v18, %v3100_v50 }
 0x278   : > { %v3120_v25 = vadd.f32 %v2407_v21, %v3100_v50 }
 0x279   : > { %v1605_v26 = vadd.f32 %v1604_v10, %v1574_v23  ;;  %v1536_v27 = vadd.f32 %v1535_v22, %v1419_v24  ;;  %v1575_v28 = vmul.f32 %v1419_v24, %v1419_v24  ;;  %v2133_v29 = vpack.c.bf16 %v1419_v24, %v1416_v17  ;;  %v2360_v30 = vpop.f32.mrb[8].mxu0 }
 0x27a   : > { %v2361_v31 = vpop.f32.mrb[9].mxu0  ;;  %v2173_v32 = vpack.c.bf16 %v3120_v25, %v3116_v20  ;;  %v2408_v33 = vpop.f32.mrb[8].mxu1 }
 0x27b   : > { %v1606_v34 = vadd.f32 %v1605_v26, %v1575_v28  ;;  %2205 = vst [vmem:[%s2928_s16 + $0x8] sm:$0xff] %v2133_v29   ;;  %v2362_v35 = vadd.f32 %v2361_v31, %v2360_v30  ;;  %v2363_v36 = vpop.f32.mrb[10].mxu0  ;;  %v2409_v37 = vpop.f32.mrb[9].mxu1 }
 0x27c   : > { %v2364_v38 = vpop.f32.mrb[11].mxu0  ;;  %2213 = vst [vmem:[%s2928_s16 + $0x48] sm:$0xff] %v2173_v32   ;;  %v2410_v39 = vadd.f32 %v2409_v37, %v2408_v33  ;;  %v2411_v40 = vpop.f32.mrb[10].mxu1 }
 0x27d   : > { %v1424_v41 = vadd.f32 %v2362_v35, %v3100_v50  ;;  %v2365_v42 = vadd.f32 %v2364_v38, %v2363_v36  ;;  %v2412_v43 = vpop.f32.mrb[11].mxu1 }
 0x27e   : > { %v3128_v44 = vadd.f32 %v2410_v39, %v3100_v50  ;;  %v2413_v45 = vadd.f32 %v2412_v43, %v2411_v40 }
 0x27f   : > { %v1537_v46 = vadd.f32 %v1536_v27, %v1424_v41  ;;  %v1576_v47 = vmul.f32 %v1424_v41, %v1424_v41  ;;  %v1427_v48 = vadd.f32 %v2365_v42, %v3100_v50 }
 0x280   : > { %v3132_v49 = vadd.f32 %v2413_v45, %v3100_v50 }
 0x281   : > { %v1607_v51 = vadd.f32 %v1606_v34, %v1576_v47  ;;  %v1538_v52 = vadd.f32 %v1537_v46, %v1427_v48  ;;  %v1577_v53 = vmul.f32 %v1427_v48, %v1427_v48  ;;  %v2138_v54 = vpack.c.bf16 %v1427_v48, %v1424_v41  ;;  %v2366_v55 = vpop.f32.mrb[12].mxu0 }
 0x282   : > { %v2367_v56 = vpop.f32.mrb[13].mxu0  ;;  %v2178_v57 = vpack.c.bf16 %v3132_v49, %v3128_v44  ;;  %v2414_v58 = vpop.f32.mrb[12].mxu1 }
 0x283   : > { %v1608_v59 = vadd.f32 %v1607_v51, %v1577_v53  ;;  %2206 = vst [vmem:[%s2928_s16 + $0x10] sm:$0xff] %v2138_v54   ;;  %v2368_v60 = vadd.f32 %v2367_v56, %v2366_v55  ;;  %v2369_v61 = vpop.f32.mrb[14].mxu0  ;;  %v2415_v63 = vpop.f32.mrb[13].mxu1 }
 0x284   : > { %v2370_v0 = vpop.f32.mrb[15].mxu0  ;;  %2214 = vst [vmem:[%s2928_s16 + $0x50] sm:$0xff] %v2178_v57   ;;  %v2416_v2 = vadd.f32 %v2415_v63, %v2414_v58  ;;  %v2417_v3 = vpop.f32.mrb[14].mxu1 }
 0x285   : > { %v1432_v4 = vadd.f32 %v2368_v60, %v3100_v50  ;;  %v2371_v5 = vadd.f32 %v2370_v0, %v2369_v61  ;;  %v2418_v6 = vpop.f32.mrb[15].mxu1 }
 0x286   : > { %v3140_v7 = vadd.f32 %v2416_v2, %v3100_v50  ;;  %v2419_v8 = vadd.f32 %v2418_v6, %v2417_v3 }
 0x287   : > { %v1539_v9 = vadd.f32 %v1538_v52, %v1432_v4  ;;  %v1578_v10 = vmul.f32 %v1432_v4, %v1432_v4  ;;  %v1435_v11 = vadd.f32 %v2371_v5, %v3100_v50 }
 0x288   : > { %v3144_v12 = vadd.f32 %v2419_v8, %v3100_v50 }
 0x289   : > { %v1609_v13 = vadd.f32 %v1608_v59, %v1578_v10  ;;  %v1540_v14 = vadd.f32 %v1539_v9, %v1435_v11  ;;  %v1579_v15 = vmul.f32 %v1435_v11, %v1435_v11  ;;  %v2143_v16 = vpack.c.bf16 %v1435_v11, %v1432_v4  ;;  %v2372_v17 = vpop.f32.mrb[16].mxu0 }
 0x28a   : > { %v2373_v18 = vpop.f32.mrb[17].mxu0  ;;  %v2183_v19 = vpack.c.bf16 %v3144_v12, %v3140_v7  ;;  %v2420_v21 = vpop.f32.mrb[16].mxu1 }
 0x28b   : > { %v1610_v22 = vadd.f32 %v1609_v13, %v1579_v15  ;;  %2207 = vst [vmem:[%s2928_s16 + $0x18] sm:$0xff] %v2143_v16   ;;  %v2374_v23 = vadd.f32 %v2373_v18, %v2372_v17  ;;  %v2375_v24 = vpop.f32.mrb[18].mxu0  ;;  %v2421_v26 = vpop.f32.mrb[17].mxu1 }
 0x28c   : > { %v2376_v27 = vpop.f32.mrb[19].mxu0  ;;  %2215 = vst [vmem:[%s2928_s16 + $0x58] sm:$0xff] %v2183_v19   ;;  %v2422_v28 = vadd.f32 %v2421_v26, %v2420_v21  ;;  %v2423_v29 = vpop.f32.mrb[18].mxu1 }
 0x28d   : > { %v1440_v30 = vadd.f32 %v2374_v23, %v3100_v50  ;;  %v2377_v31 = vadd.f32 %v2376_v27, %v2375_v24  ;;  %v2424_v32 = vpop.f32.mrb[19].mxu1 }
 0x28e   : > { %v3152_v33 = vadd.f32 %v2422_v28, %v3100_v50  ;;  %v2425_v34 = vadd.f32 %v2424_v32, %v2423_v29 }
 0x28f   : > { %v1541_v35 = vadd.f32 %v1540_v14, %v1440_v30  ;;  %v1580_v36 = vmul.f32 %v1440_v30, %v1440_v30  ;;  %v1443_v37 = vadd.f32 %v2377_v31, %v3100_v50 }
 0x290   : > { %v3156_v38 = vadd.f32 %v2425_v34, %v3100_v50 }
 0x291   : > { %v1611_v39 = vadd.f32 %v1610_v22, %v1580_v36  ;;  %v1542_v40 = vadd.f32 %v1541_v35, %v1443_v37  ;;  %v1581_v41 = vmul.f32 %v1443_v37, %v1443_v37  ;;  %v2148_v42 = vpack.c.bf16 %v1443_v37, %v1440_v30  ;;  %v2378_v43 = vpop.f32.mrb[20].mxu0 }
 0x292   : > { %v2379_v45 = vpop.f32.mrb[21].mxu0  ;;  %v2188_v46 = vpack.c.bf16 %v3156_v38, %v3152_v33  ;;  %v2426_v47 = vpop.f32.mrb[20].mxu1 }
 0x293   : > { %v1612_v48 = vadd.f32 %v1611_v39, %v1581_v41  ;;  %2208 = vst [vmem:[%s2928_s16 + $0x20] sm:$0xff] %v2148_v42   ;;  %v2380_v51 = vadd.f32 %v2379_v45, %v2378_v43  ;;  %v2381_v52 = vpop.f32.mrb[22].mxu0  ;;  %v2427_v53 = vpop.f32.mrb[21].mxu1 }
 0x294   : > { %v2382_v54 = vpop.f32.mrb[23].mxu0  ;;  %2216 = vst [vmem:[%s2928_s16 + $0x60] sm:$0xff] %v2188_v46   ;;  %v2428_v55 = vadd.f32 %v2427_v53, %v2426_v47  ;;  %v2429_v56 = vpop.f32.mrb[22].mxu1 }
 0x295   : > { %v1448_v57 = vadd.f32 %v2380_v51, %v3100_v50  ;;  %v2383_v58 = vadd.f32 %v2382_v54, %v2381_v52  ;;  %v2430_v59 = vpop.f32.mrb[23].mxu1 }
 0x296   : > { %v3164_v60 = vadd.f32 %v2428_v55, %v3100_v50  ;;  %v2431_v61 = vadd.f32 %v2430_v59, %v2429_v56 }
 0x297   : > { %v1543_v63 = vadd.f32 %v1542_v40, %v1448_v57  ;;  %v1582_v0 = vmul.f32 %v1448_v57, %v1448_v57  ;;  %v1451_v2 = vadd.f32 %v2383_v58, %v3100_v50 }
 0x298   : > { %v3168_v3 = vadd.f32 %v2431_v61, %v3100_v50 }
 0x299   : > { %v1613_v4 = vadd.f32 %v1612_v48, %v1582_v0  ;;  %v1544_v5 = vadd.f32 %v1543_v63, %v1451_v2  ;;  %v1583_v6 = vmul.f32 %v1451_v2, %v1451_v2  ;;  %v2153_v8 = vpack.c.bf16 %v1451_v2, %v1448_v57  ;;  %v2384_v9 = vpop.f32.mrb[24].mxu0 }
 0x29a   : > { %v2385_v10 = vpop.f32.mrb[25].mxu0  ;;  %v2193_v11 = vpack.c.bf16 %v3168_v3, %v3164_v60  ;;  %v2432_v13 = vpop.f32.mrb[24].mxu1 }
 0x29b   : > { %v1614_v14 = vadd.f32 %v1613_v4, %v1583_v6  ;;  %2209 = vst [vmem:[%s2928_s16 + $0x28] sm:$0xff] %v2153_v8   ;;  %v2386_v15 = vadd.f32 %v2385_v10, %v2384_v9  ;;  %v2387_v16 = vpop.f32.mrb[26].mxu0  ;;  %v2433_v17 = vpop.f32.mrb[25].mxu1  ;;  %v1588_v6 = vmul.f32 %v3104_v62, %v3104_v62  ;;  %v1589_v10 = vmul.f32 %v3108_v1, %v3108_v1 }
 0x29c   : > { %v2388_v18 = vpop.f32.mrb[27].mxu0  ;;  %2217 = vst [vmem:[%s2928_s16 + $0x68] sm:$0xff] %v2193_v11   ;;  %v2434_v19 = vadd.f32 %v2433_v17, %v2432_v13  ;;  %v2435_v21 = vpop.f32.mrb[26].mxu1 }
 0x29d   : > { %v1456_v22 = vadd.f32 %v2386_v15, %v3100_v50  ;;  %v2389_v23 = vadd.f32 %v2388_v18, %v2387_v16  ;;  %v2436_v24 = vpop.f32.mrb[27].mxu1  ;;  %v1591_v16 = vmul.f32 %v3120_v25, %v3120_v25  ;;  %v1592_v18 = vmul.f32 %v3128_v44, %v3128_v44 }
 0x29e   : > { %v3176_v26 = vadd.f32 %v2434_v19, %v3100_v50  ;;  %v2437_v27 = vadd.f32 %v2436_v24, %v2435_v21 }
 0x29f   : > { %v1545_v28 = vadd.f32 %v1544_v5, %v1456_v22  ;;  %v1584_v29 = vmul.f32 %v1456_v22, %v1456_v22  ;;  %v1459_v30 = vadd.f32 %v2389_v23, %v3100_v50 }
 0x2a0   : > { %v3180_v31 = vadd.f32 %v2437_v27, %v3100_v50 }
 0x2a1   : > { %v1615_v32 = vadd.f32 %v1614_v14, %v1584_v29  ;;  %v1546_v34 = vadd.f32 %v1545_v28, %v1459_v30  ;;  %v1585_v35 = vmul.f32 %v1459_v30, %v1459_v30  ;;  %v2158_v36 = vpack.c.bf16 %v1459_v30, %v1456_v22  ;;  %v2390_v37 = vpop.f32.mrb[28].mxu0 }
 0x2a2   : > { %v2391_v39 = vpop.f32.mrb[29].mxu0  ;;  %v2198_v40 = vpack.c.bf16 %v3180_v31, %v3176_v26  ;;  %v2438_v41 = vpop.f32.mrb[28].mxu1  ;;  %v1596_v30 = vmul.f32 %v3152_v33, %v3152_v33 }
 0x2a3   : > { %v1616_v42 = vadd.f32 %v1615_v32, %v1585_v35  ;;  %2210 = vst [vmem:[%s2928_s16 + $0x30] sm:$0xff] %v2158_v36   ;;  %v2392_v43 = vadd.f32 %v2391_v39, %v2390_v37  ;;  %v2393_v45 = vpop.f32.mrb[30].mxu0  ;;  %v2439_v46 = vpop.f32.mrb[29].mxu1  ;;  %v1597_v35 = vmul.f32 %v3156_v38, %v3156_v38  ;;  %v1598_v37 = vmul.f32 %v3164_v60, %v3164_v60 }
 0x2a4   : > { %v2394_v47 = vpop.f32.mrb[31].mxu0  ;;  %2218 = vst [vmem:[%s2928_s16 + $0x70] sm:$0xff] %v2198_v40   ;;  %v2440_v48 = vadd.f32 %v2439_v46, %v2438_v41  ;;  %v2441_v51 = vpop.f32.mrb[30].mxu1  ;;  %v1599_v40 = vmul.f32 %v3168_v3, %v3168_v3 }
 0x2a5   : > { %v1464_v52 = vadd.f32 %v2392_v43, %v3100_v50  ;;  %v2395_v53 = vadd.f32 %v2394_v47, %v2393_v45  ;;  %v2442_v54 = vpop.f32.mrb[31].mxu1  ;;  %v1601_v45 = vmul.f32 %v3180_v31, %v3180_v31 }
 0x2a6   : > { %v1528_v55 = vadd.f32 %v2440_v48, %v3100_v50  ;;  %v2443_v56 = vadd.f32 %v2442_v54, %v2441_v51 }
 0x2a7   : > { %v1547_v57 = vadd.f32 %v1546_v34, %v1464_v52  ;;  %v1586_v58 = vmul.f32 %v1464_v52, %v1464_v52  ;;  %v1467_v59 = vadd.f32 %v2395_v53, %v3100_v50 }
 0x2a8   : > { %v1531_v61 = vadd.f32 %v2443_v56, %v3100_v50  ;;  %v1590_v50 = vmul.f32 %v3116_v20, %v3116_v20  ;;  %v1602_v46 = vmul.f32 %v1528_v55, %v1528_v55 }
 0x2a9   : > { %v1617_v63 = vadd.f32 %v1616_v42, %v1586_v58  ;;  %v1548_v0 = vadd.f32 %v1547_v57, %v1467_v59  ;;  %v1587_v2 = vmul.f32 %v1467_v59, %v1467_v59  ;;  %v2163_v4 = vpack.c.bf16 %v1467_v59, %v1464_v52 }
 0x2aa   : > { %v2203_v5 = vpack.c.bf16 %v1531_v61, %v1528_v55  ;;  %v1600_v42 = vmul.f32 %v3176_v26, %v3176_v26 }
 0x2ab   : > { %v1549_v8 = vadd.f32 %v1548_v0, %v3104_v62  ;;  %v1618_v9 = vadd.f32 %v1617_v63, %v1587_v2  ;;  %2211 = vst [vmem:[%s2928_s16 + $0x38] sm:$0xff] %v2163_v4  }
 0x2ac   : > { %2219 = vst [vmem:[%s2928_s16 + $0x78] sm:$0xff] %v2203_v5  }
 0x2ad   : > { %v1550_v11 = vadd.f32 %v1549_v8, %v3108_v1  ;;  %v1619_v13 = vadd.f32 %v1618_v9, %v1588_v6  ;;  %v1593_v1 = vmul.f32 %v3132_v49, %v3132_v49 }
 0x2af   : > { %v1551_v14 = vadd.f32 %v1550_v11, %v3116_v20  ;;  %v1620_v15 = vadd.f32 %v1619_v13, %v1589_v10  ;;  %v1594_v20 = vmul.f32 %v3140_v7, %v3140_v7 }
 0x2b1   : > { %v1552_v62 = vadd.f32 %v1551_v14, %v3120_v25  ;;  %v1621_v17 = vadd.f32 %v1620_v15, %v1590_v50  ;;  %v1595_v25 = vmul.f32 %v3144_v12, %v3144_v12 }
 0x2b3   : > { %v1622_v19 = vadd.f32 %v1621_v17, %v1591_v16  ;;  %v1553_v21 = vadd.f32 %v1552_v62, %v3128_v44 }
 0x2b5   : > { %v1554_v22 = vadd.f32 %v1553_v21, %v3132_v49  ;;  %v1623_v23 = vadd.f32 %v1622_v19, %v1592_v18 }
 0x2b7   : > { %v1555_v24 = vadd.f32 %v1554_v22, %v3140_v7  ;;  %v1624_v27 = vadd.f32 %v1623_v23, %v1593_v1 }
 0x2b9   : > { %v1556_v28 = vadd.f32 %v1555_v24, %v3144_v12  ;;  %v1625_v29 = vadd.f32 %v1624_v27, %v1594_v20 }
 0x2bb   : > { %v1557_v44 = vadd.f32 %v1556_v28, %v3152_v33  ;;  %v1626_v32 = vadd.f32 %v1625_v29, %v1595_v25 }
 0x2bd   : > { %v1627_v49 = vadd.f32 %v1626_v32, %v1596_v30  ;;  %v1558_v34 = vadd.f32 %v1557_v44, %v3156_v38 }
 0x2bf   : > { %v1628_v7 = vadd.f32 %v1627_v49, %v1597_v35  ;;  %v1559_v36 = vadd.f32 %v1558_v34, %v3164_v60 }
 0x2c1   : > { %v1629_v12 = vadd.f32 %v1628_v7, %v1598_v37  ;;  %v1560_v39 = vadd.f32 %v1559_v36, %v3168_v3  ;;  %v1603_v3 = vmul.f32 %v1531_v61, %v1531_v61 }
 0x2c3   : > { %v1630_v33 = vadd.f32 %v1629_v12, %v1599_v40  ;;  %v1561_v41 = vadd.f32 %v1560_v39, %v3176_v26 }
 0x2c5   : > { %v1631_v43 = vadd.f32 %v1630_v33, %v1600_v42  ;;  %v1562_v38 = vadd.f32 %v1561_v41, %v3180_v31 }
 0x2c7   : > { %v1632_v60 = vadd.f32 %v1631_v43, %v1601_v45  ;;  %v1563_v47 = vadd.f32 %v1562_v38, %v1528_v55 }
 0x2c9   : > { %v1633_v48 = vadd.f32 %v1632_v60, %v1602_v46  ;;  %v1564_v51 = vadd.f32 %v1563_v47, %v1531_v61 }
 0x2cb   : > { %v1565_v52 = vrot.slane %v1564_v51, 4  ;;  %v1634_v53 = vadd.f32 %v1633_v48, %v1603_v3 }
 0x2cd   : > { %v1566_v54 = vadd.f32 %v1565_v52, %v1564_v51  ;;  %v1635_v56 = vrot.slane %v1634_v53, 4 }
 0x2cf   : > { %v1567_v57 = vrot.slane %v1566_v54, 2  ;;  %v1636_v26 = vadd.f32 %v1635_v56, %v1634_v53 }
 0x2d1   : > { %v1568_v58 = vadd.f32 %v1567_v57, %v1566_v54  ;;  %v1637_v59 = vrot.slane %v1636_v26, 2 }
 0x2d3   : > { %v1569_v63 = vrot.slane %v1568_v58, 1  ;;  %v1638_v0 = vadd.f32 %v1637_v59, %v1636_v26 }
 0x2d5   : > { %v1570_v2 = vadd.f32 %v1569_v63, %v1568_v58  ;;  %v1639_v31 = vrot.slane %v1638_v0, 1 }
 0x2d7   : > { %1571 = vst [vmem:[%s376_s10] sm:$0x1] %v1570_v2  ;;  %v1640_v55 = vadd.f32 %v1639_v31, %v1638_v0 }
 0x2d9   : > { %1641 = vst [vmem:[%s379_s13] sm:$0x1] %v1640_v55 }
 0x2da PF: > { %s21_s8 = sadd.s32 1, %s2743_s8   ;;  %s3289_s7 = sld [smem:[#allocation7_spill]] }
 0x2db   : > { %p18_p9 = scmp.ge.s32.totalorder %s21_s8, 6   ;;  %s3290_s24 = smov %s2719_s25 }
 0x2dc   : > { %s3291_s25 = smov %s2723_s26  ;;  %s3292_s26 = smov %s2857_s21 }
 0x2dd   : > { %s3293_s27 = smov %s2735_s29  ;;  %s3294_s28 = smov %s2739_s30 }
 0x2de   : > { %s3296_s30 = smov %s3302_s11  ;;  %20 = sbr.rel (!%p18_p9) target bundleno = 9 (0x9), region = 118 }
 0x2e0   : > { %s3295_s29 = smov %s3289_s7 }
 0x2e5   :  { %1848 = vsyncpa [#allocation5], 1 }
 0x2e6   :  { %1850 = vsyncpa [#allocation5 + $0x1], 1 }

</bundles_post_ra>
